<compile_context>
chip_gen: v7x
topology: tpu7x:2x2x1
jax: 0.10.0
libtpu: 0.0.40
codegen_flags: <defaults>
</compile_context>

<pallas_src>
import functools

import jax
import jax.numpy as jnp
from jax import lax
from jax.experimental import pallas as pl
from jax.experimental.pallas import tpu as pltpu

N_LAYERS = 7


def _gat_kernel(x_ref, adj_ref,
                wa_ref, ba_ref,
                w0_ref, b0_ref,
                w1_ref, b1_ref,
                wf_ref, bf_ref,
                out_ref,
                x_state, xbf_scr, xt_scr, h_scr,
                *, tile_q, n_tiles):
    n = xbf_scr.shape[0]
    bf16 = jnp.bfloat16
    f32 = jnp.float32

    # Layer state ping-pong: layer l reads slot l&1, writes slot 1-(l&1).
    x_state[0] = x_ref[0]

    # Diagonal detector, hoisted out of both loops (JAX does not CSE iotas).
    col = lax.broadcasted_iota(jnp.int32, (tile_q, n), 1)
    row = lax.broadcasted_iota(jnp.int32, (tile_q, n), 0)
    delta = col - row          # delta == q0  <=>  global row (q0+row) == global col

    def layer_body(l, carry):
        in_slot = l & 1
        out_slot = 1 - in_slot

        x_bf = x_state[in_slot].astype(bf16)         # (N, D) bf16 MXU operand
        xbf_scr[...] = x_bf
        xt_scr[...] = x_bf.T                         # (D, N) bf16 transpose, once/layer

        # h = w_attn[l](x)   (weights are already bf16; accumulate in f32)
        h = jnp.dot(x_bf, wa_ref[l], preferred_element_type=f32) + ba_ref[l]
        h_scr[...] = h.astype(bf16)

        def tile_body(t, c):
            q0 = pl.multiple_of(t * tile_q, tile_q)
            adj_q = adj_ref[0, pl.ds(q0, tile_q), :]                  # (TQ, N) bf16 0/1
            s = jnp.dot(h_scr[pl.ds(q0, tile_q), :], xt_scr[...],
                        preferred_element_type=f32)                   # (TQ, N) f32
            p = jax.nn.sigmoid(s)
            # torch: adj[:, i, i] = 1 ; a = (sigmoid(s) + 1e-5*eye) * adj
            #   off-diag -> sigmoid * adj ;  diag -> sigmoid + 1e-5
            a = jnp.where(delta == q0, p + 1e-5, p * adj_q)           # f32
            rowsum = jnp.sum(a, axis=-1, keepdims=True)               # (TQ, 1) f32
            # Aggregate un-normalized, then scale the (TQ, D) result (deferred
            # normalization: 4x fewer multiplies, reciprocal on the EUP).
            agg = jnp.dot(a.astype(bf16), xbf_scr[...],
                          preferred_element_type=f32)                 # (TQ, D) f32
            agg = agg * pl.reciprocal(rowsum, approx=True)
            # Fused FFN + residual: x_out = relu(relu(agg@w0+b0)@w1+b1) + x_in
            t0 = jnp.maximum(
                jnp.dot(agg.astype(bf16), w0_ref[l],
                        preferred_element_type=f32) + b0_ref[l], 0.0)
            t1 = jnp.maximum(
                jnp.dot(t0.astype(bf16), w1_ref[l],
                        preferred_element_type=f32) + b1_ref[l], 0.0)
            x_state[out_slot, pl.ds(q0, tile_q), :] = (
                t1 + x_state[in_slot, pl.ds(q0, tile_q), :])
            return c

        lax.fori_loop(0, n_tiles, tile_body, 0)
        return carry

    lax.fori_loop(0, N_LAYERS, layer_body, 0)

    xf = x_state[N_LAYERS & 1]
    out_ref[0] = (jnp.dot(xf.astype(bf16), wf_ref[...],
                          preferred_element_type=f32) + bf_ref[...])


def _vmem_limit_bytes():
    cap = 64 * 1024 * 1024
    try:
        cap = int(pltpu.get_tpu_info().vmem_capacity_bytes)
    except Exception:
        pass
    # leave headroom; <= ~60 MiB on v7x (64 MiB/TC), cap at 100 MiB on v5e/v6e.
    return int(min(max(cap - 4 * 1024 * 1024, 32 * 1024 * 1024), 100 * 1024 * 1024))


def _round_up(v, m):
    return (v + m - 1) // m * m


def net_prot_gat_pallas(x, adj, params, *, tile_q=None):
    B, N, D = x.shape
    assert adj.shape == (B, N, N)
    assert D % 128 == 0
    wa, ba, w0, b0, w1, b1, wf, bf = params

    # tile_q=256 matches the 256x256 MXU on v6e/v7x (v5e is happy with any x128
    # multiple; raise to 512 there if desired -- plenty of VMEM).
    if tile_q is None:
        tile_q = 128 if N <= 128 else 256
    assert tile_q % 128 == 0

    # Mandatory padding of the node dim (e.g. 1000 -> 1024): keeps the lane dim of the
    # (TQ, N) intermediates a multiple of 128 (no masked partial vst/vld) and every
    # query tile full.  Zero-padded adj rows/cols cannot leak into real rows because
    # their off-diagonal attention entries are multiplied by adj == 0.
    n_pad = _round_up(N, tile_q)
    n_tiles = n_pad // tile_q
    if n_pad != N:
        x = jnp.pad(x, ((0, 0), (0, n_pad - N), (0, 0)))
        adj = jnp.pad(adj, ((0, 0), (0, n_pad - N), (0, n_pad - N)))

    bf16 = jnp.bfloat16
    adj = adj.astype(bf16)                               # 0/1 exact in bf16
    wa_b, w0_b, w1_b, wf_b = (w.astype(bf16) for w in (wa, w0, w1, wf))

    kernel = functools.partial(_gat_kernel, tile_q=tile_q, n_tiles=n_tiles)

    def resident():
        # Whole-array, single-buffered VMEM resident (constant across the batch grid).
        return pl.BlockSpec(memory_space=pltpu.MemorySpace.VMEM)

    grid_spec = pltpu.PrefetchScalarGridSpec(
        num_scalar_prefetch=0,
        grid=(B,),                                       # B even -> both v7x TCs busy
        in_specs=[
            pl.BlockSpec((1, n_pad, D), lambda b: (b, 0, 0)),      # x
            pl.BlockSpec((1, n_pad, n_pad), lambda b: (b, 0, 0)),  # adj (bf16)
            resident(), resident(),                                # w_attn (bf16), b_attn
            resident(), resident(),                                # linear0 w (bf16), b
            resident(), resident(),                                # linear1 w (bf16), b
            resident(), resident(),                                # linear_final w (bf16), b
        ],
        out_specs=pl.BlockSpec((1, n_pad, D), lambda b: (b, 0, 0)),
        scratch_shapes=[
            pltpu.VMEM((2, n_pad, D), jnp.float32),      # ping-pong layer state
            pltpu.VMEM((n_pad, D), bf16),                # x (bf16 MXU operand)
            pltpu.VMEM((D, n_pad), bf16),                # x^T (bf16)
            pltpu.VMEM((n_pad, D), bf16),                # h = w_attn(x) (bf16)
        ],
    )

    flops = B * (N_LAYERS * 2 * n_pad * D * (2 * n_pad + 3 * D) + 2 * n_pad * D * D)
    transcendentals = B * N_LAYERS * n_pad * n_pad
    bytes_accessed = (B * (n_pad * n_pad * 2 + 2 * n_pad * D * 4)
                      + (3 * N_LAYERS + 1) * D * D * 2)

    out = pl.pallas_call(
        kernel,
        out_shape=jax.ShapeDtypeStruct((B, n_pad, D), jnp.float32),
        grid_spec=grid_spec,
        compiler_params=pltpu.CompilerParams(
            dimension_semantics=("parallel",),
            vmem_limit_bytes=_vmem_limit_bytes()),
        cost_estimate=pl.CostEstimate(flops=flops,
                                      transcendentals=transcendentals,
                                      bytes_accessed=bytes_accessed),
    )(x, adj, wa_b, ba, w0_b, b0, w1_b, b1, wf_b, bf)

    if n_pad != N:
        out = out[:, :N, :]
    return out


def init_params(key, D):
    """Deterministic synthetic parameters (PyTorch Linear shapes, stored as (in,out))."""
    keys = jax.random.split(key, 4)
    scale = 0.05

    def stack_lin(k):
        kw, kb = jax.random.split(k)
        w = scale * jax.random.normal(kw, (N_LAYERS, D, D), jnp.float32)
        b = scale * jax.random.normal(kb, (N_LAYERS, 1, D), jnp.float32)
        return w, b

    wa, ba = stack_lin(keys[0])
    w0, b0 = stack_lin(keys[1])
    w1, b1 = stack_lin(keys[2])
    kfw, kfb = jax.random.split(keys[3])
    wf = scale * jax.random.normal(kfw, (D, D), jnp.float32)
    bf = scale * jax.random.normal(kfb, (1, D), jnp.float32)
    return wa, ba, w0, b0, w1, b1, wf, bf


def net_prot_gat_reference(x, adj, params, mxu_dtype=jnp.float32):
    """Pure-JAX mirror of the torch forward.

    mxu_dtype=bfloat16 mirrors the kernel's MXU-input casts and its deferred row
    normalization (f32 row-sum of the un-normalized attention, bf16 aggregation,
    post-scale); mxu_dtype=float32 is the exact torch semantics (the deferred divide
    is mathematically identical there)."""
    wa, ba, w0, b0, w1, b1, wf, bf = params
    B, N, D = x.shape
    f32 = jnp.float32
    c = lambda t: t.astype(mxu_dtype)
    eye = jnp.eye(N, dtype=f32)
    # TODO(synk): torch mutates the caller's adj in place (diag set to 1); that side
    #             effect is not propagated out of the kernel / this reference.
    adj = jnp.where(eye > 0, 1.0, adj.astype(f32))
    for l in range(N_LAYERS):
        x0 = x
        h = jnp.einsum('bnd,de->bne', c(x), c(wa[l]), preferred_element_type=f32) + ba[l]
        scores = jnp.einsum('bij,bkj->bik', c(h), c(x), preferred_element_type=f32)
        a = (jax.nn.sigmoid(scores) + 1e-5 * eye) * adj
        rowsum = jnp.sum(a, axis=-1, keepdims=True)
        x = jnp.einsum('bij,bjd->bid', c(a), c(x), preferred_element_type=f32) / rowsum
        x = jax.nn.relu(jnp.einsum('bnd,de->bne', c(x), c(w0[l]),
                                   preferred_element_type=f32) + b0[l])
        x = jax.nn.relu(jnp.einsum('bnd,de->bne', c(x), c(w1[l]),
                                   preferred_element_type=f32) + b1[l])
        x = x + x0
    return jnp.einsum('bnd,de->bne', c(x), c(wf), preferred_element_type=f32) + bf


if __name__ == "__main__":
    # Small shapes consistent with the module: D must be 256 (Linear(256, 256));
    # the graph size N is shrunk from 1000 to 128 for a quick test.  B=2 (even)
    # exposes one parallel grid step per v7x TensorCore.
    B, N, D = 2, 128, 256

    key = jax.random.PRNGKey(0)
    kx, kadj, kp = jax.random.split(key, 3)
    x = jax.random.normal(kx, (B, N, D), jnp.float32)
    adj = (jax.random.uniform(kadj, (B, N, N)) < 0.3).astype(jnp.float32)
    params = init_params(kp, D)

    out = jax.block_until_ready(net_prot_gat_pallas(x, adj, params))
    assert out.shape == (B, N, D)

    # Tight check against a JAX reference mirroring the kernel's bf16 MXU casts and
    # deferred normalization (residual diff: approx reciprocal + accumulation order).
    ref_bf16 = jax.block_until_ready(
        net_prot_gat_reference(x, adj, params, mxu_dtype=jnp.bfloat16))
    err_bf16 = float(jnp.max(jnp.abs(out - ref_bf16)))
    assert jnp.allclose(out, ref_bf16, rtol=2e-2, atol=2e-2), (
        f"max abs err vs bf16 reference {err_bf16}")

    # Loose sanity check against the exact f32 semantics of the torch module
    # (difference is bf16 MXU rounding accumulated over 7 residual layers).
    ref_f32 = jax.block_until_ready(
        net_prot_gat_reference(x, adj, params, mxu_dtype=jnp.float32))
    err_f32 = float(jnp.max(jnp.abs(out - ref_f32)))
    assert jnp.allclose(out, ref_f32, rtol=5e-2, atol=2e-1), (
        f"max abs err vs f32 reference {err_f32}")

    # Padding path: N not a multiple of the tile is zero-padded inside the wrapper
    # (as N=1000 -> 1024 would be at the real module size); padded rows/cols cannot
    # leak into real rows, so the sliced output matches the unpadded reference.
    Np = 120
    xp, adjp = x[:, :Np, :], adj[:, :Np, :Np]
    outp = jax.block_until_ready(net_prot_gat_pallas(xp, adjp, params))
    assert outp.shape == (B, Np, D)
    refp = jax.block_until_ready(
        net_prot_gat_reference(xp, adjp, params, mxu_dtype=jnp.bfloat16))
    err_pad = float(jnp.max(jnp.abs(outp - refp)))
    assert jnp.allclose(outp, refp, rtol=2e-2, atol=2e-2), (
        f"padded-path max abs err {err_pad}")

    print("KERNEL_OK")
</pallas_src>

<mosaic_0001>
module attributes {stable_mosaic.version = 11 : i64} {
  func.func @_gat_kernel(%arg0: i32, %arg1: memref<1x128x256xf32, #tpu.memory_space<vmem>>, %arg2: memref<1x128x128xbf16, #tpu.memory_space<vmem>>, %arg3: memref<7x256x256xbf16, #tpu.memory_space<vmem>>, %arg4: memref<7x1x256xf32, #tpu.memory_space<vmem>>, %arg5: memref<7x256x256xbf16, #tpu.memory_space<vmem>>, %arg6: memref<7x1x256xf32, #tpu.memory_space<vmem>>, %arg7: memref<7x256x256xbf16, #tpu.memory_space<vmem>>, %arg8: memref<7x1x256xf32, #tpu.memory_space<vmem>>, %arg9: memref<256x256xbf16, #tpu.memory_space<vmem>>, %arg10: memref<1x256xf32, #tpu.memory_space<vmem>>, %arg11: memref<1x128x256xf32, #tpu.memory_space<vmem>>, %arg12: memref<2x128x256xf32, #tpu.memory_space<vmem>>, %arg13: memref<128x256xbf16, #tpu.memory_space<vmem>>, %arg14: memref<256x128xbf16, #tpu.memory_space<vmem>>, %arg15: memref<128x256xbf16, #tpu.memory_space<vmem>>) attributes {dimension_semantics = [#tpu.dimension_semantics<parallel>], iteration_bounds = array<i64: 2>, scalar_prefetch = 0 : i64, scratch_operands = 4 : i64, tpu.core_type = #tpu.core_type<tc>, window_params = [{transform_indices = @transform_0, window_bounds = array<i64: 1, 128, 256>}, {transform_indices = @transform_1, window_bounds = array<i64: 1, 128, 128>}, {pipeline_mode = #tpu.pipeline_mode<synchronous>, transform_indices = @transform_2, window_bounds = array<i64: 7, 256, 256>}, {pipeline_mode = #tpu.pipeline_mode<synchronous>, transform_indices = @transform_3, window_bounds = array<i64: 7, 1, 256>}, {pipeline_mode = #tpu.pipeline_mode<synchronous>, transform_indices = @transform_4, window_bounds = array<i64: 7, 256, 256>}, {pipeline_mode = #tpu.pipeline_mode<synchronous>, transform_indices = @transform_5, window_bounds = array<i64: 7, 1, 256>}, {pipeline_mode = #tpu.pipeline_mode<synchronous>, transform_indices = @transform_6, window_bounds = array<i64: 7, 256, 256>}, {pipeline_mode = #tpu.pipeline_mode<synchronous>, transform_indices = @transform_7, window_bounds = array<i64: 7, 1, 256>}, {pipeline_mode = #tpu.pipeline_mode<synchronous>, transform_indices = @transform_8, window_bounds = array<i64: 256, 256>}, {pipeline_mode = #tpu.pipeline_mode<synchronous>, transform_indices = @transform_9, window_bounds = array<i64: 1, 256>}, {transform_indices = @transform_10, window_bounds = array<i64: 1, 128, 256>}]} {
    %c0 = arith.constant 0 : index
    %c0_0 = arith.constant 0 : index
    %c0_1 = arith.constant 0 : index
    %0 = vector.load %arg1[%c0, %c0_0, %c0_1] : memref<1x128x256xf32, #tpu.memory_space<vmem>>, vector<1x128x256xf32>
    %1 = vector.shape_cast %0 : vector<1x128x256xf32> to vector<128x256xf32>
    %c0_2 = arith.constant 0 : index
    %c0_3 = arith.constant 0 : index
    %c0_4 = arith.constant 0 : index
    %2 = vector.load %arg12[%c0_2, %c0_3, %c0_4] : memref<2x128x256xf32, #tpu.memory_space<vmem>>, vector<1x128x256xf32>
    %3 = vector.shape_cast %2 : vector<1x128x256xf32> to vector<128x256xf32>
    %4 = vector.shape_cast %1 : vector<128x256xf32> to vector<1x128x256xf32>
    tpu.vector_store %arg12[%c0_2, %c0_3, %c0_4], %4 {strides = array<i32>} : memref<2x128x256xf32, #tpu.memory_space<vmem>>, vector<1x128x256xf32>,
    %5 = tpu.iota {dimensions = array<i32: 1>} : vector<128x128xi32>
    %6 = tpu.iota {dimensions = array<i32: 0>} : vector<128x128xi32>
    %7 = arith.subi %5, %6 : vector<128x128xi32>
    %c0_i32 = arith.constant 0 : i32
    %c7_i32 = arith.constant 7 : i32
    %8 = arith.addi %c0_i32, %c7_i32 : i32
    %c1_i32 = arith.constant 1 : i32
    scf.for %arg16 = %c0_i32 to %8 step %c1_i32  : i32 {
      %c1_i32_15 = arith.constant 1 : i32
      %20 = arith.andi %arg16, %c1_i32_15 : i32
      %c1_i32_16 = arith.constant 1 : i32
      %21 = arith.subi %c1_i32_16, %20 : i32
      %22 = arith.index_cast %20 : i32 to index
      %c0_17 = arith.constant 0 : index
      %c0_18 = arith.constant 0 : index
      %23 = vector.load %arg12[%22, %c0_17, %c0_18] : memref<2x128x256xf32, #tpu.memory_space<vmem>>, vector<1x128x256xf32>
      %24 = vector.shape_cast %23 : vector<1x128x256xf32> to vector<128x256xf32>
      %25 = arith.truncf %24 : vector<128x256xf32> to vector<128x256xbf16>
      %c0_19 = arith.constant 0 : index
      %c0_20 = arith.constant 0 : index
      %26 = vector.load %arg13[%c0_19, %c0_20] : memref<128x256xbf16, #tpu.memory_space<vmem>>, vector<128x256xbf16>
      tpu.vector_store %arg13[%c0_19, %c0_20], %25 {strides = array<i32>} : memref<128x256xbf16, #tpu.memory_space<vmem>>, vector<128x256xbf16>,
      %27 = tpu.transpose %25, [1, 0] : vector<128x256xbf16> -> vector<256x128xbf16>
      %c0_21 = arith.constant 0 : index
      %c0_22 = arith.constant 0 : index
      %28 = vector.load %arg14[%c0_21, %c0_22] : memref<256x128xbf16, #tpu.memory_space<vmem>>, vector<256x128xbf16>
      tpu.vector_store %arg14[%c0_21, %c0_22], %27 {strides = array<i32>} : memref<256x128xbf16, #tpu.memory_space<vmem>>, vector<256x128xbf16>,
      %29 = arith.index_cast %arg16 : i32 to index
      %c0_23 = arith.constant 0 : index
      %c0_24 = arith.constant 0 : index
      %30 = vector.load %arg3[%29, %c0_23, %c0_24] : memref<7x256x256xbf16, #tpu.memory_space<vmem>>, vector<1x256x256xbf16>
      %31 = vector.shape_cast %30 : vector<1x256x256xbf16> to vector<256x256xbf16>
      %cst_25 = arith.constant dense<0.000000e+00> : vector<128x256xf32>
      %32 = tpu.matmul %25, %31, %cst_25 {dimension_numbers = #tpu.dot_dimension_numbers<[1], [0], [0], [1], [0, 0, 1, 1], [], []>} : vector<128x256xbf16>, vector<256x256xbf16>, vector<128x256xf32> -> vector<128x256xf32>
      %33 = arith.index_cast %arg16 : i32 to index
      %c0_26 = arith.constant 0 : index
      %c0_27 = arith.constant 0 : index
      %34 = vector.load %arg4[%33, %c0_26, %c0_27] : memref<7x1x256xf32, #tpu.memory_space<vmem>>, vector<1x1x256xf32>
      %35 = vector.shape_cast %34 : vector<1x1x256xf32> to vector<1x256xf32>
      %36 = vector.broadcast %35 : vector<1x256xf32> to vector<128x256xf32>
      %37 = arith.addf %32, %36 : vector<128x256xf32>
      %38 = arith.truncf %37 : vector<128x256xf32> to vector<128x256xbf16>
      %c0_28 = arith.constant 0 : index
      %c0_29 = arith.constant 0 : index
      %39 = vector.load %arg15[%c0_28, %c0_29] : memref<128x256xbf16, #tpu.memory_space<vmem>>, vector<128x256xbf16>
      tpu.vector_store %arg15[%c0_28, %c0_29], %38 {strides = array<i32>} : memref<128x256xbf16, #tpu.memory_space<vmem>>, vector<128x256xbf16>,
      %c0_i32_30 = arith.constant 0 : i32
      %c128_i32 = arith.constant 128 : i32
      %40 = arith.muli %c0_i32_30, %c128_i32 : i32
      %41 = tpu.assume_multiple %40, 128 : i32
      %c0_31 = arith.constant 0 : index
      %42 = arith.index_cast %41 : i32 to index
      %c0_32 = arith.constant 0 : index
      %43 = vector.load %arg2[%c0_31, %42, %c0_32] : memref<1x128x128xbf16, #tpu.memory_space<vmem>>, vector<1x128x128xbf16>
      %44 = vector.shape_cast %43 : vector<1x128x128xbf16> to vector<128x128xbf16>
      %45 = arith.index_cast %41 : i32 to index
      %c0_33 = arith.constant 0 : index
      %46 = vector.load %arg15[%45, %c0_33] : memref<128x256xbf16, #tpu.memory_space<vmem>>, vector<128x256xbf16>
      %c0_34 = arith.constant 0 : index
      %c0_35 = arith.constant 0 : index
      %47 = vector.load %arg14[%c0_34, %c0_35] : memref<256x128xbf16, #tpu.memory_space<vmem>>, vector<256x128xbf16>
      %cst_36 = arith.constant dense<0.000000e+00> : vector<128x128xf32>
      %48 = tpu.matmul %46, %47, %cst_36 {dimension_numbers = #tpu.dot_dimension_numbers<[1], [0], [0], [1], [0, 0, 1, 1], [], []>} : vector<128x256xbf16>, vector<256x128xbf16>, vector<128x128xf32> -> vector<128x128xf32>
      %49 = arith.negf %48 : vector<128x128xf32>
      %50 = math.exp %49 : vector<128x128xf32>
      %cst_37 = arith.constant 1.000000e+00 : f32
      %51 = vector.broadcast %cst_37 : f32 to vector<128x128xf32>
      %52 = arith.addf %51, %50 : vector<128x128xf32>
      %53 = arith.divf %51, %52 : vector<128x128xf32>
      %54 = vector.broadcast %41 : i32 to vector<128x128xi32>
      %55 = arith.cmpi eq, %7, %54 : vector<128x128xi32>
      %cst_38 = arith.constant 9.99999974E-6 : f32
      %56 = vector.broadcast %cst_38 : f32 to vector<128x128xf32>
      %57 = arith.addf %53, %56 : vector<128x128xf32>
      %58 = arith.extf %44 : vector<128x128xbf16> to vector<128x128xf32>
      %59 = arith.mulf %53, %58 : vector<128x128xf32>
      %60 = arith.select %55, %57, %59 : vector<128x128xi1>, vector<128x128xf32>
      %cst_39 = arith.constant dense<0.000000e+00> : vector<128xf32>
      %61 = vector.multi_reduction <add>, %60, %cst_39 [1] : vector<128x128xf32> to vector<128xf32>
      %62 = vector.shape_cast %61 : vector<128xf32> to vector<128x1xf32>
      %63 = arith.truncf %60 : vector<128x128xf32> to vector<128x128xbf16>
      %c0_40 = arith.constant 0 : index
      %c0_41 = arith.constant 0 : index
      %64 = vector.load %arg13[%c0_40, %c0_41] : memref<128x256xbf16, #tpu.memory_space<vmem>>, vector<128x256xbf16>
      %cst_42 = arith.constant dense<0.000000e+00> : vector<128x256xf32>
      %65 = tpu.matmul %63, %64, %cst_42 {dimension_numbers = #tpu.dot_dimension_numbers<[1], [0], [0], [1], [0, 0, 1, 1], [], []>} : vector<128x128xbf16>, vector<128x256xbf16>, vector<128x256xf32> -> vector<128x256xf32>
      %66 = tpu.reciprocal %62 {approx = true} : vector<128x1xf32> -> vector<128x1xf32>
      %67 = vector.broadcast %66 : vector<128x1xf32> to vector<128x256xf32>
      %68 = arith.mulf %65, %67 : vector<128x256xf32>
      %69 = arith.truncf %68 : vector<128x256xf32> to vector<128x256xbf16>
      %70 = arith.index_cast %arg16 : i32 to index
      %c0_43 = arith.constant 0 : index
      %c0_44 = arith.constant 0 : index
      %71 = vector.load %arg5[%70, %c0_43, %c0_44] : memref<7x256x256xbf16, #tpu.memory_space<vmem>>, vector<1x256x256xbf16>
      %72 = vector.shape_cast %71 : vector<1x256x256xbf16> to vector<256x256xbf16>
      %cst_45 = arith.constant dense<0.000000e+00> : vector<128x256xf32>
      %73 = tpu.matmul %69, %72, %cst_45 {dimension_numbers = #tpu.dot_dimension_numbers<[1], [0], [0], [1], [0, 0, 1, 1], [], []>} : vector<128x256xbf16>, vector<256x256xbf16>, vector<128x256xf32> -> vector<128x256xf32>
      %74 = arith.index_cast %arg16 : i32 to index
      %c0_46 = arith.constant 0 : index
      %c0_47 = arith.constant 0 : index
      %75 = vector.load %arg6[%74, %c0_46, %c0_47] : memref<7x1x256xf32, #tpu.memory_space<vmem>>, vector<1x1x256xf32>
      %76 = vector.shape_cast %75 : vector<1x1x256xf32> to vector<1x256xf32>
      %77 = vector.broadcast %76 : vector<1x256xf32> to vector<128x256xf32>
      %78 = arith.addf %73, %77 : vector<128x256xf32>
      %cst_48 = arith.constant 0.000000e+00 : f32
      %79 = vector.broadcast %cst_48 : f32 to vector<128x256xf32>
      %80 = arith.maximumf %78, %79 : vector<128x256xf32>
      %81 = arith.truncf %80 : vector<128x256xf32> to vector<128x256xbf16>
      %82 = arith.index_cast %arg16 : i32 to index
      %c0_49 = arith.constant 0 : index
      %c0_50 = arith.constant 0 : index
      %83 = vector.load %arg7[%82, %c0_49, %c0_50] : memref<7x256x256xbf16, #tpu.memory_space<vmem>>, vector<1x256x256xbf16>
      %84 = vector.shape_cast %83 : vector<1x256x256xbf16> to vector<256x256xbf16>
      %cst_51 = arith.constant dense<0.000000e+00> : vector<128x256xf32>
      %85 = tpu.matmul %81, %84, %cst_51 {dimension_numbers = #tpu.dot_dimension_numbers<[1], [0], [0], [1], [0, 0, 1, 1], [], []>} : vector<128x256xbf16>, vector<256x256xbf16>, vector<128x256xf32> -> vector<128x256xf32>
      %86 = arith.index_cast %arg16 : i32 to index
      %c0_52 = arith.constant 0 : index
      %c0_53 = arith.constant 0 : index
      %87 = vector.load %arg8[%86, %c0_52, %c0_53] : memref<7x1x256xf32, #tpu.memory_space<vmem>>, vector<1x1x256xf32>
      %88 = vector.shape_cast %87 : vector<1x1x256xf32> to vector<1x256xf32>
      %89 = vector.broadcast %88 : vector<1x256xf32> to vector<128x256xf32>
      %90 = arith.addf %85, %89 : vector<128x256xf32>
      %cst_54 = arith.constant 0.000000e+00 : f32
      %91 = vector.broadcast %cst_54 : f32 to vector<128x256xf32>
      %92 = arith.maximumf %90, %91 : vector<128x256xf32>
      %93 = arith.index_cast %20 : i32 to index
      %94 = arith.index_cast %41 : i32 to index
      %c0_55 = arith.constant 0 : index
      %95 = vector.load %arg12[%93, %94, %c0_55] : memref<2x128x256xf32, #tpu.memory_space<vmem>>, vector<1x128x256xf32>
      %96 = vector.shape_cast %95 : vector<1x128x256xf32> to vector<128x256xf32>
      %97 = arith.addf %92, %96 : vector<128x256xf32>
      %98 = arith.index_cast %21 : i32 to index
      %99 = arith.index_cast %41 : i32 to index
      %c0_56 = arith.constant 0 : index
      %100 = vector.load %arg12[%98, %99, %c0_56] : memref<2x128x256xf32, #tpu.memory_space<vmem>>, vector<1x128x256xf32>
      %101 = vector.shape_cast %100 : vector<1x128x256xf32> to vector<128x256xf32>
      %102 = vector.shape_cast %97 : vector<128x256xf32> to vector<1x128x256xf32>
      tpu.vector_store %arg12[%98, %99, %c0_56], %102 {strides = array<i32>} : memref<2x128x256xf32, #tpu.memory_space<vmem>>, vector<1x128x256xf32>,
      %c1_i32_57 = arith.constant 1 : i32
    }
    %c7_i32_5 = arith.constant 7 : i32
    %c1 = arith.constant 1 : index
    %c0_6 = arith.constant 0 : index
    %c0_7 = arith.constant 0 : index
    %9 = vector.load %arg12[%c1, %c0_6, %c0_7] : memref<2x128x256xf32, #tpu.memory_space<vmem>>, vector<1x128x256xf32>
    %10 = vector.shape_cast %9 : vector<1x128x256xf32> to vector<128x256xf32>
    %11 = arith.truncf %10 : vector<128x256xf32> to vector<128x256xbf16>
    %c0_8 = arith.constant 0 : index
    %c0_9 = arith.constant 0 : index
    %12 = vector.load %arg9[%c0_8, %c0_9] : memref<256x256xbf16, #tpu.memory_space<vmem>>, vector<256x256xbf16>
    %cst = arith.constant dense<0.000000e+00> : vector<128x256xf32>
    %13 = tpu.matmul %11, %12, %cst {dimension_numbers = #tpu.dot_dimension_numbers<[1], [0], [0], [1], [0, 0, 1, 1], [], []>} : vector<128x256xbf16>, vector<256x256xbf16>, vector<128x256xf32> -> vector<128x256xf32>
    %c0_10 = arith.constant 0 : index
    %c0_11 = arith.constant 0 : index
    %14 = vector.load %arg10[%c0_10, %c0_11] : memref<1x256xf32, #tpu.memory_space<vmem>>, vector<1x256xf32>
    %15 = vector.broadcast %14 : vector<1x256xf32> to vector<128x256xf32>
    %16 = arith.addf %13, %15 : vector<128x256xf32>
    %c0_12 = arith.constant 0 : index
    %c0_13 = arith.constant 0 : index
    %c0_14 = arith.constant 0 : index
    %17 = vector.load %arg11[%c0_12, %c0_13, %c0_14] : memref<1x128x256xf32, #tpu.memory_space<vmem>>, vector<1x128x256xf32>
    %18 = vector.shape_cast %17 : vector<1x128x256xf32> to vector<128x256xf32>
    %19 = vector.shape_cast %16 : vector<128x256xf32> to vector<1x128x256xf32>
    tpu.vector_store %arg11[%c0_12, %c0_13, %c0_14], %19 {strides = array<i32>} : memref<1x128x256xf32, #tpu.memory_space<vmem>>, vector<1x128x256xf32>,
    return
  }
  func.func @transform_0(%arg0: i32) -> (i32, i32, i32) {
    %c0_i32 = arith.constant 0 : i32
    %c0_i32_0 = arith.constant 0 : i32
    %c0_i32_1 = arith.constant 0 : i32
    return %arg0, %c0_i32, %c0_i32_0 : i32, i32, i32
  }
  func.func @transform_1(%arg0: i32) -> (i32, i32, i32) {
    %c0_i32 = arith.constant 0 : i32
    %c0_i32_0 = arith.constant 0 : i32
    %c0_i32_1 = arith.constant 0 : i32
    return %arg0, %c0_i32, %c0_i32_0 : i32, i32, i32
  }
  func.func @transform_2(%arg0: i32) -> (i32, i32, i32) {
    %c0_i32 = arith.constant 0 : i32
    %c0_i32_0 = arith.constant 0 : i32
    %c0_i32_1 = arith.constant 0 : i32
    %c0_i32_2 = arith.constant 0 : i32
    return %c0_i32, %c0_i32_0, %c0_i32_1 : i32, i32, i32
  }
  func.func @transform_3(%arg0: i32) -> (i32, i32, i32) {
    %c0_i32 = arith.constant 0 : i32
    %c0_i32_0 = arith.constant 0 : i32
    %c0_i32_1 = arith.constant 0 : i32
    %c0_i32_2 = arith.constant 0 : i32
    return %c0_i32, %c0_i32_0, %c0_i32_1 : i32, i32, i32
  }
  func.func @transform_4(%arg0: i32) -> (i32, i32, i32) {
    %c0_i32 = arith.constant 0 : i32
    %c0_i32_0 = arith.constant 0 : i32
    %c0_i32_1 = arith.constant 0 : i32
    %c0_i32_2 = arith.constant 0 : i32
    return %c0_i32, %c0_i32_0, %c0_i32_1 : i32, i32, i32
  }
  func.func @transform_5(%arg0: i32) -> (i32, i32, i32) {
    %c0_i32 = arith.constant 0 : i32
    %c0_i32_0 = arith.constant 0 : i32
    %c0_i32_1 = arith.constant 0 : i32
    %c0_i32_2 = arith.constant 0 : i32
    return %c0_i32, %c0_i32_0, %c0_i32_1 : i32, i32, i32
  }
  func.func @transform_6(%arg0: i32) -> (i32, i32, i32) {
    %c0_i32 = arith.constant 0 : i32
    %c0_i32_0 = arith.constant 0 : i32
    %c0_i32_1 = arith.constant 0 : i32
    %c0_i32_2 = arith.constant 0 : i32
    return %c0_i32, %c0_i32_0, %c0_i32_1 : i32, i32, i32
  }
  func.func @transform_7(%arg0: i32) -> (i32, i32, i32) {
    %c0_i32 = arith.constant 0 : i32
    %c0_i32_0 = arith.constant 0 : i32
    %c0_i32_1 = arith.constant 0 : i32
    %c0_i32_2 = arith.constant 0 : i32
    return %c0_i32, %c0_i32_0, %c0_i32_1 : i32, i32, i32
  }
  func.func @transform_8(%arg0: i32) -> (i32, i32) {
    %c0_i32 = arith.constant 0 : i32
    %c0_i32_0 = arith.constant 0 : i32
    %c0_i32_1 = arith.constant 0 : i32
    return %c0_i32, %c0_i32_0 : i32, i32
  }
  func.func @transform_9(%arg0: i32) -> (i32, i32) {
    %c0_i32 = arith.constant 0 : i32
    %c0_i32_0 = arith.constant 0 : i32
    %c0_i32_1 = arith.constant 0 : i32
    return %c0_i32, %c0_i32_0 : i32, i32
  }
  func.func @transform_10(%arg0: i32) -> (i32, i32, i32) {
    %c0_i32 = arith.constant 0 : i32
    %c0_i32_0 = arith.constant 0 : i32
    %c0_i32_1 = arith.constant 0 : i32
    return %arg0, %c0_i32, %c0_i32_0 : i32, i32, i32
  }
}

</mosaic_0001>

<bundles_post_ra>
// kernel: tpu_custom_call.1
= control target key start
LH: loop header
LB: loop body
LE: loop exit
PB: predicated region body
PF: predicated region fallthrough
CT: control target
= control target key end

     0   :  { %s5421_s0 = inlined_call_operand.hbm [shape: f32[2,128,256], index: 0, kind: input, shape index: {}]   ;;  %s5422_s1 = inlined_call_operand.hbm [shape: bf16[2,128,128], index: 1, kind: input, shape index: {}]   ;;  %s5423_s2 = inlined_call_operand.hbm [shape: bf16[7,256,256], index: 2, kind: input, shape index: {}]   ;;  %s5424_s3 = inlined_call_operand.hbm [shape: f32[7,1,256], index: 3, kind: input, shape index: {}]   ;;  %s5425_s4 = inlined_call_operand.hbm [shape: bf16[7,256,256], index: 4, kind: input, shape index: {}]   ;;  %s5426_s5 = inlined_call_operand.vmem [shape: f32[7,1,256], index: 5, kind: input, shape index: {}]   ;;  %s5427_s6 = inlined_call_operand.hbm [shape: bf16[7,256,256], index: 6, kind: input, shape index: {}]   ;;  %s5428_s7 = inlined_call_operand.hbm [shape: f32[7,1,256], index: 7, kind: input, shape index: {}]   ;;  %s5429_s8 = inlined_call_operand.hbm [shape: bf16[256,256], index: 8, kind: input, shape index: {}]   ;;  %s5430_s9 = inlined_call_operand.vmem [shape: f32[1,256], index: 9, kind: input, shape index: {}]   ;;  %s5431_s10 = inlined_call_operand.hbm [shape: f32[2,128,256], index: 10, kind: output, shape index: {}]  }
   0x1   :  { %5445 = sst [smem:[#allocation30_spill]] %s5421_s0 }
   0x2   :  { %5446 = sst [smem:[#allocation31_spill]] %s5423_s2 }
   0x3   :  { %5447 = sst [smem:[#allocation32_spill]] %s5424_s3 }
   0x4   :  { %5448 = sst [smem:[#allocation33_spill]] %s5425_s4 }
   0x5   :  { %5449 = sst [smem:[#allocation34_spill]] %s5427_s6 }
   0x6   :  { %5450 = sst [smem:[#allocation35_spill]] %s5428_s7 }
   0x7   :  { %5451 = sst [smem:[#allocation36_spill]] %s5430_s9 }
   0x8   :  { %5452 = sst [smem:[#allocation37_spill]] %s5431_s10 }
   0x9   :  { %15 = vsyncpa [#allocation7], 0 }
   0xa   :  { %17 = vsyncpa [#allocation7 + $0x1], 0 }
   0xb   :  { %18 = vsyncpa [#allocation10], 0 }
   0xc   :  { %20 = vsyncpa [#allocation10 + $0x1], 0 }
   0xd   :  { %21 = vsyncpa [#allocation13], 0 }
   0xe   :  { %22 = vsyncpa [#allocation16], 0 }
   0xf   :  { %23 = vsyncpa [#allocation19], 0 }
  0x10   :  { %24 = vsyncpa [#allocation8], 0 }
  0x11   :  { %26 = vsyncpa [#allocation8 + $0x1], 0  ;;  %s4232_s13 = smov 0   ;;  %s4234_s14 = smov 0  }
  0x12   :  { %s4236_s15 = smov 0   ;;  %s4238_s16 = smov 0  }
  0x13 LB: > { %s4157_s17 = smov [#allocation11]   ;;  %s4253_s19 = sadd.s32 4294967295, %s4151_s16   ;;  %s4151_s16 = sphi %s4238_s16, %s5510_s16   ;;  %s4147_s15 = sphi %s4236_s15, %s5509_s15   ;;  %s4143_s14 = sphi %s4234_s14, %s5508_s14   ;;  %s4139_s13 = sphi %s4232_s13, %s5507_s13  }
  0x14   : > { %s295_s18 = sshll.u32 %s4157_s17, 4  ;;  %p3055_p0 = scmp.ge.s32.totalorder %s4151_s16, 1  ;;  %s4258_s18 = int_to_ptr.vmem [resolvable:$true] %s295_s18 }
  0x15   : > { %p5435_p1 = scmp.eq.s32.totalorder %s4253_s19, 0  ;;  %p283_p2 = scmp.lt.s32.totalorder %s4151_s16, 3 }
  0x16   : > { %s4158_s21 = smov [#allocation12]   ;;  %s4159_s24 = smov [#allocation15]  }
  0x17   : > { %p4260_p3 = pnand %p3055_p0, %p283_p2  ;;  %s308_s22 = sshll.u32 %s4158_s21, 4  ;;  %s4273_s22 = int_to_ptr.vmem [resolvable:$true] %s308_s22 }
  0x18   : > { %s4275_s25 = sshll.u32 %s4159_s24, 4  ;;  %s5455_s2 = sld [smem:[#allocation31_spill]]  ;;  %s338_s25 = int_to_ptr.vmem [resolvable:$true] %s4275_s25 }
  0x19   : > { %s5453_s20 = scalar_select %p4260_p3, 1, 0 }
  0x1a   : > { %p3444_p5 = pneg %p4260_p3 }
  0x1c   : > { %p4269_p6 = pnand %p3444_p5, %p5435_p1 }
  0x1e   : > { %s3833_s28 = scalar_lea.hbm %s5455_s2, 28672  ;;  %p4285_p8 = pneg %p4269_p6 }
  0x1f   : > { %p3834_p7 = scmp.ne.s32.totalorder %s5455_s2, %s3833_s28  ;;  %p3840_p11 = scmp.lt.u32.totalorder %s3833_s28, %s5455_s2 }
  0x21   : > { %p3836_p9 = pnand %p4285_p8, %p3834_p7 }
  0x23   : > { %p3837_p10 = pneg %p3836_p9 }
  0x25   : > { %p3842_p12 = pnand %p3840_p11, %p3837_p10 }
  0x27   : > { %3845 = shalt.err (!%p3842_p12)
}
  0x28   : > { %s3846_s21 = scalar_lea.vmem %s4258_s18, 28672  ;;  %p3854_p5 = scmp.lt.s32.totalorder %s4258_s18, %s4258_s18 }
  0x29   : > { %p3847_p13 = scmp.ne.s32.totalorder %s4258_s18, %s3846_s21  ;;  %p3855_p4 = scmp.lt.s32.totalorder %s3846_s21, %s3846_s21 }
  0x2b   : > { %p3849_p0 = pnand %p3847_p13, %p4285_p8  ;;  %p3856_p7 = por %p3855_p4, %p3854_p5 }
  0x2d   : > { %p3850_p2 = pneg %p3849_p0 }
  0x2f   : > { %p3857_p9 = pnand %p3856_p7, %p3850_p2 }
  0x31   : > { %3860 = shalt.err (!%p3857_p9)
}
  0x32   : > { %s5433_s24 = smov 128   ;;  %s5439_s26 = smov 8  }
  0x33   : > { %3447 = dma.hbm_to_vmem [thread:$0]  (!%p4269_p6), %s5455_s2, 28672, %s4258_s18, [#allocation10], %s5433_s24, %s5433_s24, %s5439_s26  }
  0x34   : > { %s5457_s3 = sld [smem:[#allocation32_spill]] }
  0x3a   : > { %s3861_s12 = scalar_lea.hbm %s5457_s3, 224 }
  0x3b   : > { %p3862_p4 = scmp.ne.s32.totalorder %s5457_s3, %s3861_s12  ;;  %p3868_p12 = scmp.lt.u32.totalorder %s3861_s12, %s5457_s3 }
  0x3d   : > { %p3864_p10 = pnand %p3862_p4, %p4285_p8 }
  0x3f   : > { %p3865_p11 = pneg %p3864_p10 }
  0x41   : > { %p3870_p13 = pnand %p3868_p12, %p3865_p11 }
  0x43   : > { %3873 = shalt.err (!%p3870_p13)
}
  0x44   : > { %s3874_s18 = scalar_lea.vmem %s4273_s22, 224  ;;  %p3882_p7 = scmp.lt.s32.totalorder %s4273_s22, %s4273_s22 }
  0x45   : > { %p3875_p0 = scmp.ne.s32.totalorder %s4273_s22, %s3874_s18  ;;  %p3883_p9 = scmp.lt.s32.totalorder %s3874_s18, %s3874_s18 }
  0x47   : > { %p3877_p2 = pnand %p3875_p0, %p4285_p8  ;;  %p3884_p4 = por %p3883_p9, %p3882_p7 }
  0x49   : > { %p3878_p5 = pneg %p3877_p2 }
  0x4b   : > { %p3885_p10 = pnand %p3884_p4, %p3878_p5 }
  0x4d   : > { %3888 = shalt.err (!%p3885_p10)
}
  0x4e   : > { %s5437_s27 = smov 32   ;;  %s5438_s9 = smov 2  }
  0x4f   : > { %3450 = dma.hbm_to_vmem [thread:$0]  (!%p4269_p6), %s5457_s3, 224, %s4273_s22, [#allocation13], %s5437_s27, %s5437_s27, %s5438_s9  }
  0x50   : > { %s5458_s6 = sld [smem:[#allocation34_spill]] }
  0x56   : > { %s3889_s12 = scalar_lea.hbm %s5458_s6, 28672 }
  0x57   : > { %p3890_p11 = scmp.ne.s32.totalorder %s5458_s6, %s3889_s12  ;;  %p3896_p0 = scmp.lt.u32.totalorder %s3889_s12, %s5458_s6 }
  0x59   : > { %p3892_p12 = pnand %p3890_p11, %p4285_p8 }
  0x5b   : > { %p3893_p13 = pneg %p3892_p12 }
  0x5d   : > { %p3898_p2 = pnand %p3896_p0, %p3893_p13 }
  0x5f   : > { %3901 = shalt.err (!%p3898_p2)
}
  0x60   : > { %s3902_s10 = scalar_lea.vmem %s338_s25, 28672  ;;  %p3910_p4 = scmp.lt.s32.totalorder %s338_s25, %s338_s25 }
  0x61   : > { %p3903_p5 = scmp.ne.s32.totalorder %s338_s25, %s3902_s10  ;;  %p3911_p10 = scmp.lt.s32.totalorder %s3902_s10, %s3902_s10 }
  0x63   : > { %p3905_p7 = pnand %p3903_p5, %p4285_p8  ;;  %p3912_p1 = por %p3911_p10, %p3910_p4 }
  0x65   : > { %p3906_p9 = pneg %p3905_p7 }
  0x67   : > { %p3913_p3 = pnand %p3912_p1, %p3906_p9 }
  0x69   : > { %3916 = shalt.err (!%p3913_p3)
}
  0x6a   : > { %s5459_s22 = smov 128   ;;  %s4164_s29 = smov [#allocation14]  }
  0x6b   : > { %3456 = dma.hbm_to_vmem [thread:$0]  (!%p4269_p6), %s5458_s6, 28672, %s338_s25, [#allocation16], %s5459_s22, %s5459_s22, %s5439_s26  }
  0x6c   : > { %s321_s30 = sshll.u32 %s4164_s29, 4  ;;  %s4165_s12 = smov [#allocation17]   ;;  %s322_s30 = int_to_ptr.vmem [resolvable:$true] %s321_s30 }
  0x6d   : > { %s350_s17 = sshll.u32 %s4165_s12, 4  ;;  %s5460_s4 = sld [smem:[#allocation33_spill]]  ;;  %s351_s17 = int_to_ptr.vmem [resolvable:$true] %s350_s17 }
  0x73   : > { %s3917_s10 = scalar_lea.hbm %s5460_s4, 28672 }
  0x74   : > { %p3918_p1 = scmp.ne.s32.totalorder %s5460_s4, %s3917_s10  ;;  %p3924_p12 = scmp.lt.u32.totalorder %s3917_s10, %s5460_s4 }
  0x76   : > { %p3920_p3 = pnand %p3918_p1, %p4285_p8 }
  0x78   : > { %p3921_p11 = pneg %p3920_p3 }
  0x7a   : > { %p3926_p13 = pnand %p3924_p12, %p3921_p11 }
  0x7c   : > { %3929 = shalt.err (!%p3926_p13)
}
  0x7d   : > { %s3930_s25 = scalar_lea.vmem %s322_s30, 28672  ;;  %p3938_p7 = scmp.lt.s32.totalorder %s322_s30, %s322_s30 }
  0x7e   : > { %p3931_p0 = scmp.ne.s32.totalorder %s322_s30, %s3930_s25  ;;  %p3939_p9 = scmp.lt.s32.totalorder %s3930_s25, %s3930_s25 }
  0x80   : > { %p3933_p2 = pnand %p3931_p0, %p4285_p8  ;;  %p3940_p4 = por %p3939_p9, %p3938_p7 }
  0x82   : > { %p3934_p5 = pneg %p3933_p2 }
  0x84   : > { %p3941_p10 = pnand %p3940_p4, %p3934_p5 }
  0x86   : > { %3944 = shalt.err (!%p3941_p10)
}
  0x87   : > { %3453 = dma.hbm_to_vmem [thread:$0]  (!%p4269_p6), %s5460_s4, 28672, %s322_s30, [#allocation13], %s5459_s22, %s5459_s22, %s5439_s26  }
  0x88   : > { %s5461_s7 = sld [smem:[#allocation35_spill]] }
  0x8e   : > { %s3945_s29 = scalar_lea.hbm %s5461_s7, 224 }
  0x8f   : > { %p3946_p1 = scmp.ne.s32.totalorder %s5461_s7, %s3945_s29  ;;  %p3952_p12 = scmp.lt.u32.totalorder %s3945_s29, %s5461_s7 }
  0x91   : > { %p3948_p3 = pnand %p3946_p1, %p4285_p8 }
  0x93   : > { %p3949_p11 = pneg %p3948_p3 }
  0x95   : > { %p3954_p13 = pnand %p3952_p12, %p3949_p11 }
  0x97   : > { %3957 = shalt.err (!%p3954_p13)
}
  0x98   : > { %s3958_s24 = scalar_lea.vmem %s351_s17, 224  ;;  %p3966_p7 = scmp.lt.s32.totalorder %s351_s17, %s351_s17 }
  0x99   : > { %p3959_p0 = scmp.ne.s32.totalorder %s351_s17, %s3958_s24  ;;  %p3967_p9 = scmp.lt.s32.totalorder %s3958_s24, %s3958_s24 }
  0x9b   : > { %p3961_p2 = pnand %p3959_p0, %p4285_p8  ;;  %p3968_p4 = por %p3967_p9, %p3966_p7 }
  0x9d   : > { %p3962_p5 = pneg %p3961_p2 }
  0x9f   : > { %p3969_p10 = pnand %p3968_p4, %p3962_p5 }
  0xa1   : > { %3972 = shalt.err (!%p3969_p10)
}
  0xa2   : > { %s5462_s30 = smov 2   ;;  %s5463_s25 = smov 32  }
  0xa3   : > { %3459 = dma.hbm_to_vmem [thread:$0]  (!%p4269_p6), %s5461_s7, 224, %s351_s17, [#allocation16], %s5463_s25, %s5463_s25, %s5462_s30  }
  0xa4   : > { %s4166_s9 = smov [#allocation18]   ;;  %s3973_s21 = scalar_lea.hbm %s5429_s8, 4096 }
  0xa5   : > { %s363_s28 = sshll.u32 %s4166_s9, 4  ;;  %p3974_p1 = scmp.ne.s32.totalorder %s5429_s8, %s3973_s21  ;;  %s364_s28 = int_to_ptr.vmem [resolvable:$true] %s363_s28 }
  0xa6   : > { %p3980_p12 = scmp.lt.u32.totalorder %s3973_s21, %s5429_s8 }
  0xa7   : > { %p3976_p3 = pnand %p3974_p1, %p4285_p8 }
  0xa9   : > { %p3977_p11 = pneg %p3976_p3 }
  0xab   : > { %p3982_p13 = pnand %p3980_p12, %p3977_p11 }
  0xad   : > { %3985 = shalt.err (!%p3982_p13)
}
  0xae   : > { %s3986_s17 = scalar_lea.vmem %s364_s28, 4096  ;;  %p3994_p7 = scmp.lt.s32.totalorder %s364_s28, %s364_s28 }
  0xaf   : > { %p3987_p0 = scmp.ne.s32.totalorder %s364_s28, %s3986_s17  ;;  %p3995_p9 = scmp.lt.s32.totalorder %s3986_s17, %s3986_s17 }
  0xb1   : > { %p3989_p2 = pnand %p3987_p0, %p4285_p8  ;;  %p3996_p4 = por %p3995_p9, %p3994_p7 }
  0xb3   : > { %p3990_p5 = pneg %p3989_p2 }
  0xb5   : > { %p3997_p10 = pnand %p3996_p4, %p3990_p5 }
  0xb7   : > { %4000 = shalt.err (!%p3997_p10)
}
  0xb8   : > { %s5464_s30 = smov 8   ;;  %s3054_s23 = sadd.s32 4294967294, %s4151_s16  }
  0xb9   : > { %3462 = dma.hbm_to_vmem [thread:$0]  (!%p4269_p6), %s5429_s8, 4096, %s364_s28, [#allocation19], %s5459_s22, %s5459_s22, %s5464_s30  }
  0xba   : > { %s4422_s11 = sadd.s32 1, %s4151_s16   ;;  %s39_s27 = sadd.s32 1, %s4147_s15 }
  0xbb   : > { %s36_s2 = ssub.s32 %s4151_s16, %s4422_s11  ;;  %p46_p1 = scmp.ne.s32.totalorder %s4147_s15, %s4143_s14 }
  0xbc   : > { %p37_p8 = scmp.eq.s32.totalorder %s36_s2, 0  ;;  %p47_p3 = scmp.eq.s32.totalorder %s4151_s16, 0 }
  0xbd   : > { %p52_p11 = scmp.ne.s32.totalorder %s4143_s14, %s4139_s13  ;;  %p5466_p13 = scmp.eq.s32.totalorder %s4253_s19, 0 }
  0xbe   : > { %s4433_s9 = scalar_select %p37_p8, %s4147_s15, %s39_s27  }
  0xbf   : > { %p4435_p12 = por %p47_p3, %p46_p1  ;;  %p4441_p6 = por %p5466_p13, %p52_p11 }
  0xc0   : > { %p270_p0 = scmp.eq.s32.totalorder %s4253_s19, 1  ;;  %p276_p2 = scmp.eq.s32.totalorder %s3054_s23, 1 }
  0xc1   : > { %p3480_p5 = scmp.lt.s32.totalorder %s4151_s16, 2  ;;  %s4448_s28 = sand.u32 1, %s4147_s15  }
  0xc2   : > { %p4450_p7 = por %p270_p0, %p46_p1  ;;  %p4454_p9 = por %p276_p2, %p52_p11 }
  0xc3   : > { %s3063_s18 = sshll.u32 %s4448_s28, 8  ;;  %s3238_s10 = sshll.u32 %s4151_s16, 12 }
  0xc4   : > { %s5468_s12 = scalar_select %p4450_p7, 1, 0 }
  0xc5   : > { %s5469_s21 = scalar_select %p4454_p9, 1, 0 }
  0xc6   : > { %s5470_s0 = sld [smem:[#allocation30_spill]]  ;;  %s384_s26 = scalar_lea.vmem [#allocation6], %s3063_s18 }
  0xc7   : > { %s391_s25 = sshll.u32 %s384_s26, 4  ;;  %p4469_p4 = pnand %p3480_p5, %p4435_p12  ;;  %s4465_s25 = int_to_ptr.vmem [resolvable:$true] %s391_s25 }
  0xc8   : > { %s381_s27 = scalar_lea.sflag [#allocation7], %s4448_s28 }
  0xc9   : > { %p4003_p8 = pneg %p4469_p4 }
  0xcc   : > { %s4463_s30 = scalar_lea.hbm %s5470_s0, %s3238_s10  ;;  %s4006_s29 = scalar_lea.hbm %s5470_s0, 8192 }
  0xcd   : > { %s4001_s24 = scalar_lea.hbm %s4463_s30, 4096  ;;  %p4007_p11 = scmp.lt.u32.totalorder %s4463_s30, %s5470_s0 }
  0xce   : > { %p4002_p10 = scmp.ne.s32.totalorder %s4463_s30, %s4001_s24  ;;  %p4008_p12 = scmp.lt.u32.totalorder %s4006_s29, %s4001_s24 }
  0xcf   : > { %p4010_p0 = scmp.lt.u32.totalorder %s4001_s24, %s4463_s30 }
  0xd0   : > { %p4004_p1 = pnand %p4003_p8, %p4002_p10  ;;  %p4009_p13 = por %p4008_p12, %p4007_p11 }
  0xd2   : > { %p4005_p3 = pneg %p4004_p1  ;;  %p4011_p2 = por %p4010_p0, %p4009_p13 }
  0xd4   : > { %p4012_p5 = pnand %p4011_p2, %p4005_p3 }
  0xd6   : > { %4015 = shalt.err (!%p4012_p5)
}
  0xd7   : > { %s4016_s2 = scalar_lea.vmem %s4465_s25, 4096  ;;  %s4167_s18 = smov [#allocation6]  }
  0xd8   : > { %p4017_p10 = scmp.ne.s32.totalorder %s4465_s25, %s4016_s2  ;;  %s4021_s10 = sshll.u32 %s4167_s18, 4  ;;  %s4022_s10 = int_to_ptr.vmem [resolvable:$false] %s4021_s10 }
  0xd9   : > { %s4023_s17 = scalar_lea.vmem %s4022_s10, 8192  ;;  %p4024_p7 = scmp.lt.s32.totalorder %s4465_s25, %s4022_s10 }
  0xda   : > { %p4019_p1 = pnand %p4017_p10, %p4003_p8  ;;  %p4025_p11 = scmp.lt.s32.totalorder %s4023_s17, %s4016_s2 }
  0xdc   : > { %p4020_p9 = pneg %p4019_p1  ;;  %p4026_p12 = por %p4025_p11, %p4024_p7 }
  0xde   : > { %p4027_p13 = pnand %p4026_p12, %p4020_p9 }
  0xe0   : > { %4030 = shalt.err (!%p4027_p13)
}
  0xe1   : > { %s4168_s24 = smov 256   ;;  %s4169_s29 = smov 16  }
  0xe2   : > { %3466 = dma.hbm_to_vmem [thread:$0]  (!%p4469_p4), %s4463_s30, 4096, %s4465_s25, %s381_s27, %s4168_s24, %s4168_s24, %s4169_s29  }
  0xe3   : > { %s3066_s26 = sshll.u32 %s4448_s28, 6  ;;  %s3239_s18 = sshll.u32 %s4151_s16, 10 }
  0xe4   : > { %s4507_s17 = scalar_lea.hbm %s5422_s1, %s3239_s18  ;;  %s405_s0 = scalar_lea.vmem [#allocation9], %s3066_s26 }
  0xe5   : > { %s412_s3 = sshll.u32 %s405_s0, 4  ;;  %s5472_s4 = sand.u32 1, %s4151_s16   ;;  %s4509_s3 = int_to_ptr.vmem [resolvable:$true] %s412_s3 }
  0xe6   : > { %s4513_s6 = scalar_lea.sflag [#allocation10], %s5472_s4  ;;  %s4031_s7 = scalar_lea.hbm %s4507_s17, 1024 }
  0xe7   : > { %p4032_p7 = scmp.ne.s32.totalorder %s4507_s17, %s4031_s7  ;;  %s4036_s25 = scalar_lea.hbm %s5422_s1, 2048 }
  0xe8   : > { %p4037_p0 = scmp.lt.u32.totalorder %s4507_s17, %s5422_s1  ;;  %p4038_p2 = scmp.lt.u32.totalorder %s4036_s25, %s4031_s7 }
  0xe9   : > { %p4034_p9 = pnand %p4032_p7, %p4003_p8  ;;  %p4040_p10 = scmp.lt.u32.totalorder %s4031_s7, %s4507_s17 }
  0xea   : > { %p4039_p5 = por %p4038_p2, %p4037_p0 }
  0xeb   : > { %p4035_p3 = pneg %p4034_p9 }
  0xec   : > { %p4041_p1 = por %p4040_p10, %p4039_p5 }
  0xee   : > { %p4042_p11 = pnand %p4041_p1, %p4035_p3 }
  0xf0   : > { %4045 = shalt.err (!%p4042_p11)
}
  0xf1   : > { %s4046_s0 = scalar_lea.vmem %s4509_s3, 1024  ;;  %s4170_s4 = smov [#allocation9]  }
  0xf2   : > { %p4047_p12 = scmp.ne.s32.totalorder %s4509_s3, %s4046_s0  ;;  %s4051_s29 = sshll.u32 %s4170_s4, 4  ;;  %s4052_s29 = int_to_ptr.vmem [resolvable:$false] %s4051_s29 }
  0xf3   : > { %s4053_s26 = scalar_lea.vmem %s4052_s29, 2048  ;;  %p4054_p9 = scmp.lt.s32.totalorder %s4509_s3, %s4052_s29 }
  0xf4   : > { %p4049_p13 = pnand %p4047_p12, %p4003_p8  ;;  %p4055_p0 = scmp.lt.s32.totalorder %s4053_s26, %s4046_s0 }
  0xf6   : > { %p4050_p7 = pneg %p4049_p13  ;;  %p4056_p2 = por %p4055_p0, %p4054_p9 }
  0xf8   : > { %p4057_p5 = pnand %p4056_p2, %p4050_p7 }
  0xfa   : > { %4060 = shalt.err (!%p4057_p5)
}
  0xfb   : > { %s4171_s7 = smov 64   ;;  %s4172_s18 = smov 4  }
  0xfc   : > { %3469 = dma.hbm_to_vmem [thread:$0]  (!%p4469_p4), %s4507_s17, 1024, %s4509_s3, %s4513_s6, %s4171_s7, %s4171_s7, %s4172_s18  }
  0xfd   : > { %p5473_p8 = scmp.ne.s32.totalorder %s5453_s20, 0 }
  0xff   : > { %424 = sbr.rel (%p5473_p8) target bundleno = 1873 (0x751), region = 60 }
 0x106   : > { %s4542_s10 = sand.u32 1, %s4143_s14  }
 0x107   : > { %s3070_s2 = sshll.u32 %s4542_s10, 8  ;;  %s427_s28 = scalar_lea.sflag [#allocation7], %s4542_s10 }
 0x108   : > { %s4548_s30 = scalar_lea.vmem [#allocation6], %s3070_s2 }
 0x109   : > { %4110 = dma.done.wait (%p4441_p6), %s427_s28, 4096  }
 0x10a   : > { %4112 = vsyncadd (%p4441_p6), %s427_s28, 4294963200  ;;  %s435_s3 = sand.u32 1, %s4253_s19   ;;  %s3071_s6 = sshll.u32 %s4542_s10, 6 }
 0x10b   : > { %s436_s20 = scalar_lea.sflag [#allocation10], %s435_s3  ;;  %s4556_s23 = scalar_lea.vmem [#allocation9], %s3071_s6 }
 0x10c   : > { %4114 = dma.done.wait (%p4441_p6), %s436_s20, 1024  }
 0x10d   : > { %4116 = vsyncadd (%p4441_p6), %s436_s20, 4294966272  ;;  %p5474_p4 = scmp.eq.s32.totalorder %s4253_s19, 0 }
 0x10f   : > { %4118 = dma.done.wait (%p5474_p4), [#allocation10], 28672   ;;  %p5475_p3 = pmov %p5474_p4 }
 0x111   : > { %4120 = vsyncadd (%p5475_p3), [#allocation10], 4294938624  ;;  %p5476_p10 = pmov %p5475_p3 }
 0x112   : > { %p5477_p1 = pmov %p5475_p3 }
 0x113   : > { %4122 = dma.done.wait (%p5476_p10), [#allocation13], 28896  }
 0x114   : > { %4124 = vsyncadd (%p5477_p1), [#allocation13], 4294938400  ;;  %p5478_p11 = pmov %p5477_p1 }
 0x115   : > { %p5479_p12 = pmov %p5477_p1 }
 0x116   : > { %4126 = dma.done.wait (%p5478_p11), [#allocation16], 28896  }
 0x117   : > { %4128 = vsyncadd (%p5479_p12), [#allocation16], 4294938400  ;;  %p5480_p6 = pmov %p5477_p1 }
 0x118   : > { %p5481_p13 = pmov %p5477_p1 }
 0x119   : > { %4130 = dma.done.wait (%p5480_p6), [#allocation19], 4096  }
 0x11a   : > { %4132 = vsyncadd (%p5481_p13), [#allocation19], 4294963200  ;;  %v570_v0 = vlaneseq  ;;  %v506_v15 = vld [vmem:[%s4548_s30] sm:$0xff]  ;;  %v507_v16 = vld [vmem:[%s4548_s30 + $0x8] sm:$0xff]  ;;  %s4693_s22 = scalar_lea.vmem [#allocation20], %s3070_s2  ;;  %s4695_s17 = smov 0  }
 0x11b   : > { %v508_v17 = vld [vmem:[%s4548_s30 + $0x10] sm:$0xff]  ;;  %538 = vst [vmem:[#allocation2] sm:$0xff] %v506_v15  ;;  %539 = vst [vmem:[#allocation2 + $0x8] sm:$0xff] %v507_v16  ;;  %v509_v22 = vld [vmem:[%s4548_s30 + $0x18] sm:$0xff] }
 0x11c   : > { %v4578_v1 = vshrl.u32 %v570_v0, 7  ;;  %v4580_v2 = vand.u32 127, %v570_v0  ;;  %540 = vst [vmem:[#allocation2 + $0x10] sm:$0xff] %v508_v17  ;;  %v510_v23 = vld [vmem:[%s4548_s30 + $0x20] sm:$0xff]  ;;  %v511_v24 = vld [vmem:[%s4548_s30 + $0x28] sm:$0xff]  ;;  %541 = vst [vmem:[#allocation2 + $0x18] sm:$0xff] %v509_v22 }
 0x11d   : > { %542 = vst [vmem:[#allocation2 + $0x20] sm:$0xff] %v510_v23  ;;  %543 = vst [vmem:[#allocation2 + $0x28] sm:$0xff] %v511_v24  ;;  %v512_v29 = vld [vmem:[%s4548_s30 + $0x30] sm:$0xff]  ;;  %v513_v30 = vld [vmem:[%s4548_s30 + $0x38] sm:$0xff] }
 0x11e   : > { %5482 = vst [vmem:[#allocation28_spill] sm:$0xff] %v4578_v1  ;;  %5483 = vst [vmem:[#allocation29_spill] sm:$0xff] %v4580_v2  ;;  %v4583_v3 = vadd.s32 8, %v4578_v1  ;;  %v4586_v4 = vadd.s32 16, %v4578_v1  ;;  %v4589_v5 = vadd.s32 24, %v4578_v1  ;;  %v4592_v6 = vadd.s32 32, %v4578_v1 }
 0x11f   : > { %v4595_v7 = vadd.s32 40, %v4578_v1  ;;  %v4598_v8 = vadd.s32 48, %v4578_v1  ;;  %v4601_v9 = vadd.s32 56, %v4578_v1  ;;  %v4604_v10 = vadd.s32 64, %v4578_v1  ;;  %v514_v31 = vld [vmem:[%s4548_s30 + $0x40] sm:$0xff]  ;;  %544 = vst [vmem:[#allocation2 + $0x30] sm:$0xff] %v512_v29 }
 0x120   : > { %v4607_v11 = vadd.s32 72, %v4578_v1  ;;  %v4610_v12 = vadd.s32 80, %v4578_v1  ;;  %v4613_v13 = vadd.s32 88, %v4578_v1  ;;  %v4616_v14 = vadd.s32 96, %v4578_v1  ;;  %545 = vst [vmem:[#allocation2 + $0x38] sm:$0xff] %v513_v30  ;;  %546 = vst [vmem:[#allocation2 + $0x40] sm:$0xff] %v514_v31 }
 0x121   : > { %v4622_v18 = vadd.s32 104, %v4578_v1  ;;  %v4625_v19 = vadd.s32 112, %v4578_v1  ;;  %v4628_v20 = vadd.s32 120, %v4578_v1  ;;  %v515_v36 = vld [vmem:[%s4548_s30 + $0x48] sm:$0xff]  ;;  %v516_v37 = vld [vmem:[%s4548_s30 + $0x50] sm:$0xff]  ;;  %v517_v38 = vld [vmem:[%s4548_s30 + $0x58] sm:$0xff] }
 0x122   : > { %547 = vst [vmem:[#allocation2 + $0x48] sm:$0xff] %v515_v36  ;;  %548 = vst [vmem:[#allocation2 + $0x50] sm:$0xff] %v516_v37  ;;  %v518_v43 = vld [vmem:[%s4548_s30 + $0x60] sm:$0xff]  ;;  %v519_v44 = vld [vmem:[%s4548_s30 + $0x68] sm:$0xff] }
 0x123   : > { %549 = vst [vmem:[#allocation2 + $0x58] sm:$0xff] %v517_v38  ;;  %v520_v45 = vld [vmem:[%s4548_s30 + $0x70] sm:$0xff]  ;;  %550 = vst [vmem:[#allocation2 + $0x60] sm:$0xff] %v518_v43  ;;  %v521_v49 = vld [vmem:[%s4548_s30 + $0x78] sm:$0xff] }
 0x124   : > { %551 = vst [vmem:[#allocation2 + $0x68] sm:$0xff] %v519_v44  ;;  %552 = vst [vmem:[#allocation2 + $0x70] sm:$0xff] %v520_v45  ;;  %v522_v50 = vld [vmem:[%s4548_s30 + $0x80] sm:$0xff]  ;;  %v523_v51 = vld [vmem:[%s4548_s30 + $0x88] sm:$0xff] }
 0x125   : > { %553 = vst [vmem:[#allocation2 + $0x78] sm:$0xff] %v521_v49  ;;  %554 = vst [vmem:[#allocation2 + $0x80] sm:$0xff] %v522_v50  ;;  %v524_v52 = vld [vmem:[%s4548_s30 + $0x90] sm:$0xff]  ;;  %v525_v53 = vld [vmem:[%s4548_s30 + $0x98] sm:$0xff] }
 0x126   : > { %555 = vst [vmem:[#allocation2 + $0x88] sm:$0xff] %v523_v51  ;;  %v526_v54 = vld [vmem:[%s4548_s30 + $0xa0] sm:$0xff]  ;;  %556 = vst [vmem:[#allocation2 + $0x90] sm:$0xff] %v524_v52  ;;  %v527_v55 = vld [vmem:[%s4548_s30 + $0xa8] sm:$0xff] }
 0x127   : > { %557 = vst [vmem:[#allocation2 + $0x98] sm:$0xff] %v525_v53  ;;  %558 = vst [vmem:[#allocation2 + $0xa0] sm:$0xff] %v526_v54  ;;  %v528_v56 = vld [vmem:[%s4548_s30 + $0xb0] sm:$0xff]  ;;  %v529_v57 = vld [vmem:[%s4548_s30 + $0xb8] sm:$0xff] }
 0x128   : > { %559 = vst [vmem:[#allocation2 + $0xa8] sm:$0xff] %v527_v55  ;;  %560 = vst [vmem:[#allocation2 + $0xb0] sm:$0xff] %v528_v56  ;;  %v530_v58 = vld [vmem:[%s4548_s30 + $0xc0] sm:$0xff]  ;;  %v531_v59 = vld [vmem:[%s4548_s30 + $0xc8] sm:$0xff] }
 0x129   : > { %561 = vst [vmem:[#allocation2 + $0xb8] sm:$0xff] %v529_v57  ;;  %v532_v60 = vld [vmem:[%s4548_s30 + $0xd0] sm:$0xff]  ;;  %562 = vst [vmem:[#allocation2 + $0xc0] sm:$0xff] %v530_v58  ;;  %v533_v61 = vld [vmem:[%s4548_s30 + $0xd8] sm:$0xff] }
 0x12a   : > { %563 = vst [vmem:[#allocation2 + $0xc8] sm:$0xff] %v531_v59  ;;  %564 = vst [vmem:[#allocation2 + $0xd0] sm:$0xff] %v532_v60  ;;  %v534_v62 = vld [vmem:[%s4548_s30 + $0xe0] sm:$0xff]  ;;  %v535_v63 = vld [vmem:[%s4548_s30 + $0xe8] sm:$0xff] }
 0x12b   : > { %565 = vst [vmem:[#allocation2 + $0xd8] sm:$0xff] %v533_v61  ;;  %566 = vst [vmem:[#allocation2 + $0xe0] sm:$0xff] %v534_v62  ;;  %v536_v0 = vld [vmem:[%s4548_s30 + $0xf0] sm:$0xff]  ;;  %v537_v15 = vld [vmem:[%s4548_s30 + $0xf8] sm:$0xff] }
 0x12c   : > { %567 = vst [vmem:[#allocation2 + $0xe8] sm:$0xff] %v535_v63  ;;  %568 = vst [vmem:[#allocation2 + $0xf0] sm:$0xff] %v536_v0 }
 0x12d   : > { %569 = vst [vmem:[#allocation2 + $0xf8] sm:$0xff] %v537_v15 }
 0x12e LB: >> { %v5484_v2 = vld [vmem:[#allocation29_spill] sm:$0xff]  ;;  %v5485_v1 = vld [vmem:[#allocation28_spill] sm:$0xff]  ;;  %s4701_s25 = sshll.u32 %s4155_s17, 8  ;;  %s611_s24 = sand.u32 1, %s4155_s17  ;;  %s4155_s17 = sphi %s4695_s17, %s610_s17  }
 0x12f   : >> { %s4704_s27 = scalar_lea.vmem [#allocation11], %s4701_s25  ;;  %s3240_s0 = sshll.u32 %s611_s24, 8  ;;  %v5486_v21 = vsub.s32 %v5484_v2, %v5485_v1  ;;  %v5487_v25 = vsub.s32 %v5484_v2, %v4583_v3  ;;  %v5488_v26 = vsub.s32 %v5484_v2, %v4586_v4  ;;  %v5489_v27 = vsub.s32 %v5484_v2, %v4589_v5 }
 0x130   : >> { %v3545_v16 = vld [vmem:[%s4704_s27 + $0x4] ss:$8 sps:$4 sm:$0xff]   ;;  %v3547_v17 = vld [vmem:[%s4704_s27] ss:$8 sps:$4 sm:$0xff]   ;;  %v3548_v22 = vld [vmem:[%s4704_s27 + $0x14] ss:$8 sps:$4 sm:$0xff]   ;;  %v5490_v28 = vsub.s32 %v5484_v2, %v4592_v6  ;;  %v5491_v32 = vsub.s32 %v5484_v2, %v4595_v7  ;;  %v5492_v33 = vsub.s32 %v5484_v2, %v4598_v8  ;;  %v5493_v34 = vsub.s32 %v5484_v2, %v4601_v9 }
 0x131   : >> { %937 = vmatprep.subr.bf16.mxu0 %v3545_v16  ;;  %v3550_v23 = vld [vmem:[%s4704_s27 + $0x10] ss:$8 sps:$4 sm:$0xff]   ;;  %v3551_v24 = vld [vmem:[%s4704_s27 + $0x24] ss:$8 sps:$4 sm:$0xff]   ;;  %v3553_v29 = vld [vmem:[%s4704_s27 + $0x20] ss:$8 sps:$4 sm:$0xff]   ;;  %v5494_v35 = vsub.s32 %v5484_v2, %v4604_v10  ;;  %v5495_v39 = vsub.s32 %v5484_v2, %v4607_v11  ;;  %v5496_v40 = vsub.s32 %v5484_v2, %v4610_v12  ;;  %v5497_v41 = vsub.s32 %v5484_v2, %v4613_v13 }
 0x132   : >> { %938 = vmatpush1.bf16.msra.mxu0 %v3547_v17  ;;  %v3554_v30 = vld [vmem:[%s4704_s27 + $0x34] ss:$8 sps:$4 sm:$0xff]   ;;  %v3556_v31 = vld [vmem:[%s4704_s27 + $0x30] ss:$8 sps:$4 sm:$0xff]   ;;  %v3557_v36 = vld [vmem:[%s4704_s27 + $0x44] ss:$8 sps:$4 sm:$0xff]   ;;  %v5498_v42 = vsub.s32 %v5484_v2, %v4616_v14 }
 0x133   : >> { %939 = vmatprep.subr.bf16.mxu0 %v3548_v22  ;;  %v3559_v37 = vld [vmem:[%s4704_s27 + $0x40] ss:$8 sps:$4 sm:$0xff]   ;;  %v3560_v38 = vld [vmem:[%s4704_s27 + $0x54] ss:$8 sps:$4 sm:$0xff]   ;;  %v3562_v43 = vld [vmem:[%s4704_s27 + $0x50] ss:$8 sps:$4 sm:$0xff]  }
 0x134   : >> { %v3563_v44 = vld [vmem:[%s4704_s27 + $0x64] ss:$8 sps:$4 sm:$0xff]   ;;  %s4722_s4 = scalar_lea.vmem [#allocation2], %s3240_s0  ;;  %v3565_v53 = vld [vmem:[%s4704_s27 + $0x60] ss:$8 sps:$4 sm:$0xff]   ;;  %s4841_s29 = sshll.u32 %s4155_s17, 1 }
 0x135   : >> { %v617_v45 = vld [vmem:[%s4722_s4 + $0x8] sm:$0xff]  ;;  %v619_v49 = vld [vmem:[%s4722_s4 + $0x18] sm:$0xff]  ;;  %v616_v51 = vld [vmem:[%s4722_s4] sm:$0xff]  ;;  %s764_s26 = scalar_lea.vmem [#allocation12], %s4841_s29  ;;  %vm1327_vm0 = vcmp.eq.s32.totalorder %v5486_v21, 0  ;;  %vm1328_vm1 = vcmp.eq.s32.totalorder %v5487_v25, 0  ;;  %s1674_s30 = scalar_lea.vmem %s5426_s5, %s4841_s29 }
 0x136   : >> { %940 = vmatpush1.bf16.msra.mxu0 %v3550_v23  ;;  %v4726_v50 = vpack.c.bf16 %v619_v49, %v617_v45  ;;  %v618_v52 = vld [vmem:[%s4722_s4 + $0x10] sm:$0xff]  ;;  %v621_v56 = vld [vmem:[%s4722_s4 + $0x28] sm:$0xff]  ;;  %v623_v57 = vld [vmem:[%s4722_s4 + $0x38] sm:$0xff]  ;;  %vm1329_vm2 = vcmp.eq.s32.totalorder %v5488_v26, 0  ;;  %vm1330_vm3 = vcmp.eq.s32.totalorder %v5489_v27, 0  ;;  %vm1331_vm4 = vcmp.eq.s32.totalorder %v5490_v28, 0 }
 0x137   : >> { %941 = vmatprep.subr.bf16.mxu0 %v3551_v24  ;;  %v3566_v54 = vld [vmem:[%s4704_s27 + $0x74] ss:$8 sps:$4 sm:$0xff]   ;;  %v4732_v55 = vpack.c.bf16 %v618_v52, %v616_v51  ;;  %v620_v58 = vld [vmem:[%s4722_s4 + $0x20] sm:$0xff]  ;;  %v3568_v60 = vld [vmem:[%s4704_s27 + $0x70] ss:$8 sps:$4 sm:$0xff]   ;;  %v4743_v62 = vpack.c.bf16 %v623_v57, %v621_v56  ;;  %vm1332_vm5 = vcmp.eq.s32.totalorder %v5491_v32, 0 }
 0x138   : >> { %969 = vmatprep.mubr.bf16.mxu0 %v4726_v50  ;;  %v622_v59 = vld [vmem:[%s4722_s4 + $0x30] sm:$0xff]  ;;  %696 = vxpose.xlu0.c.b16.start [1/8] %v4726_v50, 128  ;;  %v3569_v61 = vld [vmem:[%s4704_s27 + $0x84] ss:$8 sps:$4 sm:$0xff]   ;;  %v627_v15 = vld [vmem:[%s4722_s4 + $0x58] sm:$0xff]  ;;  %vm1333_vm6 = vcmp.eq.s32.totalorder %v5492_v33, 0  ;;  %vm1334_vm7 = vcmp.eq.s32.totalorder %v5493_v34, 0 }
 0x139   : >> { %680 = vxpose.xlu1.c.b16.start [1/8] %v4732_v55, 128  ;;  %v4745_v63 = vpack.c.bf16 %v622_v59, %v620_v58  ;;  %v625_v0 = vld [vmem:[%s4722_s4 + $0x48] sm:$0xff]  ;;  %v624_v16 = vld [vmem:[%s4722_s4 + $0x40] sm:$0xff]  ;;  %v626_v17 = vld [vmem:[%s4722_s4 + $0x50] sm:$0xff]  ;;  %vm1335_vm8 = vcmp.eq.s32.totalorder %v5494_v35, 0  ;;  %vm1336_vm9 = vcmp.eq.s32.totalorder %v5495_v39, 0  ;;  %s4945_s7 = scalar_lea.vmem [#allocation14], %s4701_s25 }
 0x13a   : >> { %942 = vmatpush1.bf16.msra.mxu0 %v3553_v29  ;;  %v3571_v22 = vld [vmem:[%s4704_s27 + $0x80] ss:$8 sps:$4 sm:$0xff]   ;;  %v3572_v23 = vld [vmem:[%s4704_s27 + $0x94] ss:$8 sps:$4 sm:$0xff]   ;;  %v4755_v24 = vpack.c.bf16 %v627_v15, %v625_v0  ;;  %v4757_v29 = vpack.c.bf16 %v626_v17, %v624_v16  ;;  %v3580_v15 = vld [vmem:[%s4704_s27 + $0xb0] ss:$8 sps:$4 sm:$0xff]  }
 0x13b   : >> { %943 = vmatprep.subr.bf16.mxu0 %v3554_v30  ;;  %v629_v30 = vld [vmem:[%s4722_s4 + $0x68] sm:$0xff]  ;;  %v635_v51 = vld [vmem:[%s4722_s4 + $0x98] sm:$0xff]  ;;  %v632_v52 = vld [vmem:[%s4722_s4 + $0x80] sm:$0xff]  ;;  %vm1337_vm10 = vcmp.eq.s32.totalorder %v5496_v40, 0  ;;  %vm1338_vm11 = vcmp.eq.s32.totalorder %v5497_v41, 0  ;;  %vm1339_vm12 = vcmp.eq.s32.totalorder %v5498_v42, 0 }
 0x13c   : >> { %697 = vxpose.xlu0.c.b16.cont [2/8] %v4743_v62, 128  ;;  %v633_v49 = vld [vmem:[%s4722_s4 + $0x88] sm:$0xff]  ;;  %v3578_v56 = vld [vmem:[%s4704_s27 + $0xb4] ss:$8 sps:$4 sm:$0xff]   ;;  %s5003_s18 = scalar_lea.vmem [#allocation15], %s4701_s25  ;;  %s2042_s3 = scalar_lea.vmem [#allocation17], %s4841_s29 }
 0x13d   : >> { %681 = vxpose.xlu1.c.b16.cont [2/8] %v4745_v63, 128  ;;  %v4779_v57 = vpack.c.bf16 %v635_v51, %v633_v49  ;;  %v637_v59 = vld [vmem:[%s4722_s4 + $0xa8] sm:$0xff]  ;;  %v638_v0 = vld [vmem:[%s4722_s4 + $0xb0] sm:$0xff]  ;;  %s612_s6 = ssub.s32 1, %s611_s24  ;;  %s610_s17 = sadd.s32 1, %s4155_s17  }
 0x13e   : >> { %944 = vmatpush1.bf16.msra.mxu0 %v3556_v31  ;;  %v631_v31 = vld [vmem:[%s4722_s4 + $0x78] sm:$0xff]  ;;  %v3581_v16 = vld [vmem:[%s4704_s27 + $0xc4] ss:$8 sps:$4 sm:$0xff]   ;;  %s3245_s20 = sshll.u32 %s612_s6, 8  ;;  %p607_p7 = scmp.ge.s32.totalorder %s610_s17, 7  }
 0x13f   : >> { %945 = vmatprep.subr.bf16.mxu0 %v3557_v36  ;;  %v628_v36 = vld [vmem:[%s4722_s4 + $0x60] sm:$0xff]  ;;  %v645_v51 = vld [vmem:[%s4722_s4 + $0xe8] sm:$0xff]  ;;  %s5204_s25 = scalar_lea.vmem [#allocation2], %s3245_s20  ;;  %v3800_v5 = vld [vmem:[#allocation18 + $0x54] ss:$8 sps:$4 sm:$0xff] (%p607_p7)   ;;  %s3246_s24 = sshll.u32 (%p607_p7), %s4253_s19, 12 }
 0x140   : >> { %698 = vxpose.xlu0.c.b16.cont [3/8] %v4755_v24, 128  ;;  %v3797_v3 = vld [vmem:[#allocation18 + $0x44] ss:$8 sps:$4 sm:$0xff] (%p607_p7)   ;;  %v3799_v4 = vld [vmem:[#allocation18 + $0x40] ss:$8 sps:$4 sm:$0xff] (%p607_p7)   ;;  %v3802_v6 = vld [vmem:[#allocation18 + $0x50] ss:$8 sps:$4 sm:$0xff] (%p607_p7)  }
 0x141   : >> { %682 = vxpose.xlu1.c.b16.cont [3/8] %v4757_v29, 128  ;;  %v3803_v7 = vld [vmem:[#allocation18 + $0x64] ss:$8 sps:$4 sm:$0xff] (%p607_p7)   ;;  %v3805_v13 = vld [vmem:[#allocation18 + $0x60] ss:$8 sps:$4 sm:$0xff] (%p607_p7)   ;;  %s2876_s0 = sshll.u32 (%p607_p7), %s4693_s22, 4  ;;  %s5503_s29 = sld [smem:[#allocation37_spill]] (%p607_p7)  ;;  %s5369_s0 = int_to_ptr.vmem [resolvable:$true] %s2876_s0 }
 0x142   : >> { %946 = vmatpush1.bf16.msra.mxu0 %v3559_v37  ;;  %v630_v37 = vld [vmem:[%s4722_s4 + $0x70] sm:$0xff]  ;;  %p5504_p0 = scmp.ne.s32.totalorder (%p607_p7), %s5468_s12, 0  ;;  %s4174_s2 = smov (%p607_p7), [#allocation20]  }
 0x143   : >> { %947 = vmatprep.subr.bf16.mxu0 %v3560_v38  ;;  %v3574_v38 = vld [vmem:[%s4704_s27 + $0x90] ss:$8 sps:$4 sm:$0xff]   ;;  %v4769_v45 = vpack.c.bf16 %v630_v37, %v628_v36  ;;  %v3583_v37 = vld [vmem:[%s4704_s27 + $0xc0] ss:$8 sps:$4 sm:$0xff]   ;;  %s4065_s28 = sshll.u32 (%p607_p7), %s4174_s2, 4  ;;  %s4066_s28 = int_to_ptr.vmem [resolvable:$false] %s4065_s28 }
 0x144   : >> { %v642_v36 = vld [vmem:[%s4722_s4 + $0xd0] sm:$0xff]  ;;  %p4068_p8 = scmp.lt.s32.totalorder (%p607_p7), %s5369_s0, %s4066_s28 }
 0x145   : >> { %683 = vxpose.xlu1.c.b16.cont [4/8] %v4769_v45, 128 }
 0x146   : >> { %948 = vmatpush1.bf16.msra.mxu0 %v3562_v43  ;;  %v3575_v43 = vld [vmem:[%s4704_s27 + $0xa4] ss:$8 sps:$4 sm:$0xff]  }
 0x147   : >> { %949 = vmatprep.subr.bf16.mxu0 %v3563_v44  ;;  %v4767_v44 = vpack.c.bf16 %v631_v31, %v629_v30  ;;  %v643_v30 = vld [vmem:[%s4722_s4 + $0xd8] sm:$0xff]  ;;  %v640_v31 = vld [vmem:[%s4722_s4 + $0xc0] sm:$0xff] }
 0x148   : >> { %v4805_v49 = vpack.c.bf16 %v642_v36, %v640_v31 }
 0x149   : >> { %699 = vxpose.xlu0.c.b16.cont [4/8] %v4767_v44, 128 }
 0x14a   : >> { %950 = vmatpush1.bf16.msra.mxu0 %v3565_v53  ;;  %v634_v53 = vld [vmem:[%s4722_s4 + $0x90] sm:$0xff] }
 0x14b   : >> { %951 = vmatprep.subr.bf16.mxu0 %v3566_v54  ;;  %v3577_v54 = vld [vmem:[%s4704_s27 + $0xa0] ss:$8 sps:$4 sm:$0xff]   ;;  %v4781_v58 = vpack.c.bf16 %v634_v53, %v632_v52  ;;  %v647_v52 = vld [vmem:[%s4722_s4 + $0xf8] sm:$0xff] }
 0x14c   : >> { %v644_v53 = vld [vmem:[%s4722_s4 + $0xe0] sm:$0xff] }
 0x14d   : >> { %700 = vxpose.xlu0.c.b16.cont [5/8] %v4779_v57, 128  ;;  %684 = vxpose.xlu1.c.b16.cont [5/8] %v4781_v58, 128 }
 0x14e   : >> { %952 = vmatpush1.bf16.msra.mxu0 %v3568_v60  ;;  %v639_v60 = vld [vmem:[%s4722_s4 + $0xb8] sm:$0xff] }
 0x14f   : >> { %953 = vmatprep.subr.bf16.mxu0 %v3569_v61  ;;  %v636_v61 = vld [vmem:[%s4722_s4 + $0xa0] sm:$0xff]  ;;  %v4791_v17 = vpack.c.bf16 %v639_v60, %v637_v59  ;;  %v4814_v59 = vpack.c.bf16 %v647_v52, %v645_v51 }
 0x151   : >> { %701 = vxpose.xlu0.c.b16.cont [6/8] %v4791_v17, 128 }
 0x152   : >> { %954 = vmatpush1.bf16.msra.mxu0 %v3571_v22  ;;  %v4793_v22 = vpack.c.bf16 %v638_v0, %v636_v61  ;;  %v3587_v61 = vld [vmem:[%s4704_s27 + $0xe4] ss:$8 sps:$4 sm:$0xff]   ;;  %v3589_v0 = vld [vmem:[%s4704_s27 + $0xe0] ss:$8 sps:$4 sm:$0xff]  }
 0x153   : >> { %955 = vmatprep.subr.bf16.mxu0 %v3572_v23  ;;  %v641_v23 = vld [vmem:[%s4722_s4 + $0xc8] sm:$0xff] }
 0x154   : >> { %685 = vxpose.xlu1.c.b16.cont [6/8] %v4793_v22, 128 }
 0x156   : >> { %956 = vmatpush1.bf16.msra.mxu0 %v3574_v38  ;;  %v3584_v38 = vld [vmem:[%s4704_s27 + $0xd4] ss:$8 sps:$4 sm:$0xff]  }
 0x157   : >> { %957 = vmatprep.subr.bf16.mxu0 %v3575_v43  ;;  %v4803_v43 = vpack.c.bf16 %v643_v30, %v641_v23 }
 0x158   : >> { %686 = vxpose.xlu1.c.b16.cont [7/8] %v4805_v49, 128 }
 0x159   : >> { %702 = vxpose.xlu0.c.b16.cont [7/8] %v4803_v43, 128 }
 0x15a   : >> { %958 = vmatpush1.bf16.msra.mxu0 %v3577_v54  ;;  %v646_v54 = vld [vmem:[%s4722_s4 + $0xf0] sm:$0xff] }
 0x15b   : >> { %959 = vmatprep.subr.bf16.mxu0 %v3578_v56  ;;  %v3586_v56 = vld [vmem:[%s4704_s27 + $0xd0] ss:$8 sps:$4 sm:$0xff]   ;;  %v4816_v60 = vpack.c.bf16 %v646_v54, %v644_v53 }
 0x15d   : >> { %703 = vxpose.xlu0.c.b16.end [8/8] %v4814_v59, 128  ;;  %687 = vxpose.xlu1.c.b16.end [8/8] %v4816_v60, 128 }
 0x15e   : >> { %960 = vmatpush1.bf16.msra.mxu0 %v3580_v15  ;;  %v3590_v15 = vld [vmem:[%s4704_s27 + $0xf4] ss:$8 sps:$4 sm:$0xff]  }
 0x15f   : >> { %961 = vmatprep.subr.bf16.mxu0 %v3581_v16  ;;  %v3592_v16 = vld [vmem:[%s4704_s27 + $0xf0] ss:$8 sps:$4 sm:$0xff]   ;;  %s5502_s27 = sld [smem:[#allocation36_spill]] (%p607_p7) }
 0x162   : >> { %962 = vmatpush1.bf16.msra.mxu0 %v3583_v37 }
 0x163   : >> { %963 = vmatprep.subr.bf16.mxu0 %v3584_v38 }
 0x166   : >> { %964 = vmatpush1.bf16.msra.mxu0 %v3586_v56 }
 0x167   : >> { %965 = vmatprep.subr.bf16.mxu0 %v3587_v61 }
 0x16a   : >> { %966 = vmatpush1.bf16.msra.mxu0 %v3589_v0 }
 0x16b   : >> { %967 = vmatprep.subr.bf16.mxu0 %v3590_v15 }
 0x16e   : >> { %968 = vmatpush1.bf16.msra.mxu0 %v3592_v16 }
 0x171   : >> { %970 = vmatmul.mubr.bf16.vlgmr.msra.gmra.mrb[0].mxu0 %v4732_v55 }
 0x172   : >> { %979 = vmatprep.mubr.bf16.mxu0 %v4743_v62 }
 0x179   : >> { %980 = vmatmul.mubr.bf16.gmra.mrb[4].mxu0 %v4745_v63 }
 0x17a   : >> { %989 = vmatprep.mubr.bf16.mxu0 %v4755_v24 }
 0x181   : >> { %990 = vmatmul.mubr.bf16.gmra.mrb[8].mxu0 %v4757_v29 }
 0x182   : >> { %999 = vmatprep.mubr.bf16.mxu0 %v4767_v44 }
 0x189   : >> { %1000 = vmatmul.mubr.bf16.gmra.mrb[12].mxu0 %v4769_v45 }
 0x18a   : >> { %1009 = vmatprep.mubr.bf16.mxu0 %v4779_v57 }
 0x191   : >> { %1010 = vmatmul.mubr.bf16.gmra.mrb[16].mxu0 %v4781_v58 }
 0x192   : >> { %1019 = vmatprep.mubr.bf16.mxu0 %v4791_v17 }
 0x199   : >> { %1020 = vmatmul.mubr.bf16.gmra.mrb[20].mxu0 %v4793_v22 }
 0x19a   : >> { %1029 = vmatprep.mubr.bf16.mxu0 %v4803_v43 }
 0x1a1   : >> { %1030 = vmatmul.mubr.bf16.gmra.mrb[24].mxu0 %v4805_v49 }
 0x1a2   : >> { %1039 = vmatprep.mubr.bf16.mxu0 %v4814_v59 }
 0x1a7   : >> { %v704_v23 = vpop.trf.xlu0  ;;  %v688_v30 = vpop.trf.xlu1 }
 0x1a8   : >> { %3286 = vmatprep.subr.bf16.mxu1 %v704_v23 }
 0x1a9   : >> { %1040 = vmatmul.mubr.bf16.gmra.mrb[28].mxu0 %v4816_v60  ;;  %3287 = vmatpush3.bf16.msra.mxu1 %v688_v30  ;;  %v4844_v30 = vsub.s32 0, %v5485_v1 }
 0x1ab   : >> { %v705_v31 = vpop.trf.xlu0  ;;  %v689_v36 = vpop.trf.xlu1 }
 0x1ac   : >> { %3288 = vmatprep.subr.bf16.mxu1 %v705_v31  ;;  %v765_v31 = vld [vmem:[%s764_s26] sm:$0x3]  ;;  %s5367_s26 = scalar_lea.hbm (%p607_p7), %s5503_s29, %s3246_s24 }
 0x1ad   : >> { %3289 = vmatpush3.bf16.msra.mxu1 %v689_v36  ;;  %v4848_v36 = vsub.s32 1, %v5485_v1 }
 0x1af   : >> { %v706_v37 = vpop.trf.xlu0  ;;  %v690_v38 = vpop.trf.xlu1 }
 0x1b0   : >> { %3290 = vmatprep.subr.bf16.mxu1 %v706_v37  ;;  %v4851_v37 = vrot.slane %v765_v31, %v4844_v30 }
 0x1b1   : >> { %3291 = vmatpush3.bf16.msra.mxu1 %v690_v38 }
 0x1b3   : >> { %v707_v51 = vpop.trf.xlu0  ;;  %v691_v52 = vpop.trf.xlu1 }
 0x1b4   : >> { %3292 = vmatprep.subr.bf16.mxu1 %v707_v51  ;;  %v4854_v51 = vrot.slane %v765_v31, %v4848_v36 }
 0x1b5   : >> { %3293 = vmatpush3.bf16.msra.mxu1 %v691_v52 }
 0x1b7   : >> { %v708_v53 = vpop.trf.xlu0  ;;  %v692_v54 = vpop.trf.xlu1 }
 0x1b8   : >> { %3294 = vmatprep.subr.bf16.mxu1 %v708_v53 }
 0x1b9   : >> { %3295 = vmatpush3.bf16.msra.mxu1 %v692_v54 }
 0x1bb   : >> { %v709_v56 = vpop.trf.xlu0  ;;  %v693_v61 = vpop.trf.xlu1 }
 0x1bc   : >> { %3296 = vmatprep.subr.bf16.mxu1 %v709_v56 }
 0x1bd   : >> { %3297 = vmatpush3.bf16.msra.mxu1 %v693_v61 }
 0x1bf   : >> { %v710_v0 = vpop.trf.xlu0  ;;  %v694_v15 = vpop.trf.xlu1 }
 0x1c0   : >> { %3298 = vmatprep.subr.bf16.mxu1 %v710_v0 }
 0x1c1   : >> { %3299 = vmatpush3.bf16.msra.mxu1 %v694_v15 }
 0x1c3   : >> { %v711_v16 = vpop.trf.xlu0  ;;  %v695_v23 = vpop.trf.xlu1 }
 0x1c4   : >> { %3300 = vmatprep.subr.bf16.mxu1 %v711_v16 }
 0x1c5   : >> { %3301 = vmatpush3.bf16.msra.mxu1 %v695_v23 }
 0x1c6   : >> { %1463 = vmatprep.subr.bf16.mxu1 %v4726_v50 }
 0x244   : >> { %v971_v38 = vpop.f32.mrb[0].mxu0 }
 0x245   : >> { %v973_v52 = vpop.f32.mrb[1].mxu0  ;;  %v972_v53 = vadd.f32 %v971_v38, %v4851_v37 }
 0x246   : >> { %v975_v50 = vpop.f32.mrb[2].mxu0  ;;  %v974_v61 = vadd.f32 %v973_v52, %v4854_v51 }
 0x247   : >> { %v976_v54 = vadd.f32 %v975_v50, %v4851_v37  ;;  %v977_v56 = vpop.f32.mrb[3].mxu0 }
 0x248   : >> { %v978_v0 = vadd.f32 %v977_v56, %v4854_v51 }
 0x249   : >> { %v1050_v15 = vpack.c.bf16 %v976_v54, %v972_v53 }
 0x24a   : >> { %v1051_v16 = vpack.c.bf16 %v978_v0, %v974_v61 }
 0x24c   : >> { %v981_v23 = vpop.f32.mrb[4].mxu0  ;;  %1165 = vmatprep.mubr.bf16.mxu1 %v1051_v16 }
 0x24d   : >> { %v983_v48 = vpop.f32.mrb[5].mxu0  ;;  %1166 = vmatmul.mubr.bf16.vlgmr.msra.gmra.mrb[0].mxu1 %v1050_v15  ;;  %v982_v31 = vadd.f32 %v981_v23, %v4851_v37 }
 0x24e   : >> { %v985_v47 = vpop.f32.mrb[6].mxu0  ;;  %1464 = vmatpush1.bf16.msra.mxu1 %v4732_v55  ;;  %v984_v52 = vadd.f32 %v983_v48, %v4854_v51 }
 0x24f   : >> { %v986_v38 = vadd.f32 %v985_v47, %v4851_v37  ;;  %v987_v46 = vpop.f32.mrb[7].mxu0  ;;  %1465 = vmatprep.subr.bf16.mxu1 %v4743_v62 }
 0x250   : >> { %v988_v50 = vadd.f32 %v987_v46, %v4854_v51 }
 0x251   : >> { %v1052_v53 = vpack.c.bf16 %v986_v38, %v982_v31 }
 0x252   : >> { %v1053_v54 = vpack.c.bf16 %v988_v50, %v984_v52  ;;  %1466 = vmatpush1.bf16.msra.mxu1 %v4745_v63 }
 0x253   : >> { %1467 = vmatprep.subr.bf16.mxu1 %v4755_v24 }
 0x254   : >> { %v991_v56 = vpop.f32.mrb[8].mxu0  ;;  %1173 = vmatprep.mubr.bf16.mxu1 %v1053_v54 }
 0x255   : >> { %v993_v55 = vpop.f32.mrb[9].mxu0  ;;  %1174 = vmatmul.mubr.bf16.gmra.mrb[4].mxu1 %v1052_v53  ;;  %v992_v47 = vadd.f32 %v991_v56, %v4851_v37 }
 0x256   : >> { %v995_v61 = vpop.f32.mrb[10].mxu0  ;;  %1468 = vmatpush1.bf16.msra.mxu1 %v4757_v29  ;;  %v994_v46 = vadd.f32 %v993_v55, %v4854_v51 }
 0x257   : >> { %v996_v62 = vadd.f32 %v995_v61, %v4851_v37  ;;  %v997_v48 = vpop.f32.mrb[11].mxu0  ;;  %1469 = vmatprep.subr.bf16.mxu1 %v4767_v44 }
 0x258   : >> { %v998_v63 = vadd.f32 %v997_v48, %v4854_v51 }
 0x259   : >> { %v1054_v0 = vpack.c.bf16 %v996_v62, %v992_v47 }
 0x25a   : >> { %v1055_v24 = vpack.c.bf16 %v998_v63, %v994_v46  ;;  %1470 = vmatpush1.bf16.msra.mxu1 %v4769_v45 }
 0x25b   : >> { %1471 = vmatprep.subr.bf16.mxu1 %v4779_v57 }
 0x25c   : >> { %v1001_v15 = vpop.f32.mrb[12].mxu0  ;;  %1181 = vmatprep.mubr.bf16.mxu1 %v1055_v24 }
 0x25d   : >> { %v1003_v29 = vpop.f32.mrb[13].mxu0  ;;  %1182 = vmatmul.mubr.bf16.gmra.mrb[8].mxu1 %v1054_v0  ;;  %v1002_v23 = vadd.f32 %v1001_v15, %v4851_v37 }
 0x25e   : >> { %v1005_v16 = vpop.f32.mrb[14].mxu0  ;;  %1472 = vmatpush1.bf16.msra.mxu1 %v4781_v58  ;;  %v1004_v38 = vadd.f32 %v1003_v29, %v4854_v51 }
 0x25f   : >> { %v1006_v44 = vadd.f32 %v1005_v16, %v4851_v37  ;;  %v1007_v31 = vpop.f32.mrb[15].mxu0  ;;  %1473 = vmatprep.subr.bf16.mxu1 %v4791_v17 }
 0x260   : >> { %v1008_v45 = vadd.f32 %v1007_v31, %v4854_v51 }
 0x261   : >> { %v1056_v52 = vpack.c.bf16 %v1006_v44, %v1002_v23 }
 0x262   : >> { %v1057_v57 = vpack.c.bf16 %v1008_v45, %v1004_v38  ;;  %1474 = vmatpush1.bf16.msra.mxu1 %v4793_v22 }
 0x263   : >> { %1475 = vmatprep.subr.bf16.mxu1 %v4803_v43 }
 0x264   : >> { %v1011_v50 = vpop.f32.mrb[16].mxu0  ;;  %1189 = vmatprep.mubr.bf16.mxu1 %v1057_v57 }
 0x265   : >> { %v1013_v58 = vpop.f32.mrb[17].mxu0  ;;  %1190 = vmatmul.mubr.bf16.gmra.mrb[12].mxu1 %v1056_v52  ;;  %v1012_v54 = vadd.f32 %v1011_v50, %v4851_v37 }
 0x266   : >> { %v1015_v53 = vpop.f32.mrb[18].mxu0  ;;  %1476 = vmatpush1.bf16.msra.mxu1 %v4805_v49  ;;  %v1014_v55 = vadd.f32 %v1013_v58, %v4854_v51 }
 0x267   : >> { %v1016_v17 = vadd.f32 %v1015_v53, %v4851_v37  ;;  %v1017_v56 = vpop.f32.mrb[19].mxu0  ;;  %1477 = vmatprep.subr.bf16.mxu1 %v4814_v59 }
 0x268   : >> { %v1018_v22 = vadd.f32 %v1017_v56, %v4854_v51 }
 0x269   : >> { %v1058_v61 = vpack.c.bf16 %v1016_v17, %v1012_v54 }
 0x26a   : >> { %v1059_v43 = vpack.c.bf16 %v1018_v22, %v1014_v55  ;;  %1478 = vmatpush1.bf16.msra.mxu1 %v4816_v60 }
 0x26c   : >> { %v1021_v47 = vpop.f32.mrb[20].mxu0  ;;  %1197 = vmatprep.mubr.bf16.mxu1 %v1059_v43 }
 0x26d   : >> { %v1023_v62 = vpop.f32.mrb[21].mxu0  ;;  %1198 = vmatmul.mubr.bf16.gmra.mrb[16].mxu1 %v1058_v61  ;;  %v1022_v48 = vadd.f32 %v1021_v47, %v4851_v37  ;;  %v4173_v47 = vmov 0  }
 0x26e   : >> { %v1025_v49 = vpop.f32.mrb[22].mxu0  ;;  %v1024_v59 = vadd.f32 %v1023_v62, %v4854_v51 }
 0x26f   : >> { %v1026_v46 = vadd.f32 %v1025_v49, %v4851_v37  ;;  %v1027_v63 = vpop.f32.mrb[23].mxu0 }
 0x270   : >> { %v1028_v0 = vadd.f32 %v1027_v63, %v4854_v51 }
 0x271   : >> { %v1060_v24 = vpack.c.bf16 %v1026_v46, %v1022_v48 }
 0x272   : >> { %v1061_v15 = vpack.c.bf16 %v1028_v0, %v1024_v59 }
 0x274   : >> { %v1031_v29 = vpop.f32.mrb[24].mxu0  ;;  %1205 = vmatprep.mubr.bf16.mxu1 %v1061_v15 }
 0x275   : >> { %v1033_v16 = vpop.f32.mrb[25].mxu0  ;;  %1206 = vmatmul.mubr.bf16.gmra.mrb[20].mxu1 %v1060_v24  ;;  %v1032_v23 = vadd.f32 %v1031_v29, %v4851_v37 }
 0x276   : >> { %v1035_v60 = vpop.f32.mrb[26].mxu0  ;;  %v1034_v38 = vadd.f32 %v1033_v16, %v4854_v51 }
 0x277   : >> { %v1036_v44 = vadd.f32 %v1035_v60, %v4851_v37  ;;  %v1037_v31 = vpop.f32.mrb[27].mxu0 }
 0x278   : >> { %v1038_v45 = vadd.f32 %v1037_v31, %v4854_v51 }
 0x279   : >> { %v1062_v52 = vpack.c.bf16 %v1036_v44, %v1032_v23 }
 0x27a   : >> { %v1063_v57 = vpack.c.bf16 %v1038_v45, %v1034_v38 }
 0x27c   : >> { %v1041_v50 = vpop.f32.mrb[28].mxu0  ;;  %1213 = vmatprep.mubr.bf16.mxu1 %v1063_v57 }
 0x27d   : >> { %v1043_v58 = vpop.f32.mrb[29].mxu0  ;;  %1214 = vmatmul.mubr.bf16.gmra.mrb[24].mxu1 %v1062_v52  ;;  %v1042_v54 = vadd.f32 %v1041_v50, %v4851_v37 }
 0x27e   : >> { %v1045_v53 = vpop.f32.mrb[30].mxu0  ;;  %v1044_v55 = vadd.f32 %v1043_v58, %v4854_v51 }
 0x27f   : >> { %v1046_v17 = vadd.f32 %v1045_v53, %v4851_v37  ;;  %v1047_v56 = vpop.f32.mrb[31].mxu0 }
 0x280   : >> { %v1048_v22 = vadd.f32 %v1047_v56, %v4854_v51 }
 0x281   : >> { %v1064_v61 = vpack.c.bf16 %v1046_v17, %v1042_v54 }
 0x282   : >> { %v1065_v43 = vpack.c.bf16 %v1048_v22, %v1044_v55  ;;  %v3248_v22 = vld [vmem:[%s4556_s23] sm:$0xff]  }
 0x284   : >> { %1221 = vmatprep.mubr.bf16.mxu1 %v1065_v43 }
 0x285   : >> { %1222 = vmatmul.mubr.bf16.gmra.mrb[28].mxu1 %v1064_v61 }
 0x286   : >> { %1495 = vmatprep.mubr.bf16.mxu1 %v4173_v47 }
 0x320   : >> { %v3302_v62 = vpop.f32.mrb[0].mxu1 }
 0x321   : >> { %v3303_v49 = vpop.f32.mrb[1].mxu1 }
 0x322   : >> { %v3304_v48 = vadd.f32 %v3303_v49, %v3302_v62  ;;  %v3305_v46 = vpop.f32.mrb[2].mxu1 }
 0x323   : >> { %v3306_v63 = vpop.f32.mrb[3].mxu1 }
 0x324   : >> { %v3116_v59 = vmul.f32 -1.442695, %v3304_v48  ;;  %v3307_v0 = vadd.f32 %v3306_v63, %v3305_v46 }
 0x326   : >> { %3689 = vpow2.f32 %v3116_v59  ;;  %v3117_v37 = vmul.f32 -1.442695, %v3307_v0  ;;  %v3249_v59 = vunpack.c.l.bf16 %v3248_v22 }
 0x328   : >> { %3691 = vpow2.f32 %v3117_v37  ;;  %v3308_v24 = vpop.f32.mrb[4].mxu1 }
 0x329   : >> { %v3309_v15 = vpop.f32.mrb[5].mxu1 }
 0x32a   : >> { %v3310_v51 = vadd.f32 %v3309_v15, %v3308_v24  ;;  %v3311_v29 = vpop.f32.mrb[6].mxu1 }
 0x32b   : >> { %v3312_v16 = vpop.f32.mrb[7].mxu1 }
 0x32c   : >> { %v3118_v60 = vmul.f32 -1.442695, %v3310_v51  ;;  %v3313_v23 = vadd.f32 %v3312_v16, %v3311_v29  ;;  %v3250_v51 = vunpack.c.h.bf16 %v3248_v22 }
 0x32e   : >> { %3693 = vpow2.f32 %v3118_v60  ;;  %v3119_v44 = vmul.f32 -1.442695, %v3313_v23 }
 0x330   : >> { %v3690_v31 = vpop.eup %3689  ;;  %3695 = vpow2.f32 %v3119_v44  ;;  %v3314_v38 = vpop.f32.mrb[8].mxu1 }
 0x331   : >> { %v1278_v45 = vadd.f32 1.0, %v3690_v31  ;;  %v3315_v52 = vpop.f32.mrb[9].mxu1  ;;  %v3279_v31 = vld [vmem:[%s4556_s23 + $0x8] sm:$0xff]  }
 0x332   : >> { %v3692_v57 = vpop.eup %3691  ;;  %v3316_v50 = vadd.f32 %v3315_v52, %v3314_v38  ;;  %v3317_v58 = vpop.f32.mrb[10].mxu1  ;;  %v3253_v22 = vunpack.c.l.bf16 %v3279_v31 }
 0x333   : >> { %3697 = vrcp.f32 %v1278_v45  ;;  %v1279_v53 = vadd.f32 1.0, %v3692_v57  ;;  %v3318_v54 = vpop.f32.mrb[11].mxu1 }
 0x334   : >> { %v3120_v17 = vmul.f32 -1.442695, %v3316_v50  ;;  %v3319_v56 = vadd.f32 %v3318_v54, %v3317_v58 }
 0x335   : >> { %3699 = vrcp.f32 %v1279_v53 }
 0x336   : >> { %3701 = vpow2.f32 %v3120_v17  ;;  %v3121_v55 = vmul.f32 -1.442695, %v3319_v56 }
 0x338   : >> { %v3694_v61 = vpop.eup %3693  ;;  %3703 = vpow2.f32 %v3121_v55  ;;  %v3320_v43 = vpop.f32.mrb[12].mxu1 }
 0x339   : >> { %v1280_v62 = vadd.f32 1.0, %v3694_v61  ;;  %v3321_v49 = vpop.f32.mrb[13].mxu1 }
 0x33a   : >> { %v3696_v48 = vpop.eup %3695  ;;  %v3322_v46 = vadd.f32 %v3321_v49, %v3320_v43  ;;  %v3323_v63 = vpop.f32.mrb[14].mxu1 }
 0x33b   : >> { %3705 = vrcp.f32 %v1280_v62  ;;  %v1281_v0 = vadd.f32 1.0, %v3696_v48  ;;  %v3324_v37 = vpop.f32.mrb[15].mxu1 }
 0x33c   : >> { %v3122_v24 = vmul.f32 -1.442695, %v3322_v46  ;;  %v3325_v15 = vadd.f32 %v3324_v37, %v3323_v63  ;;  %v3254_v46 = vunpack.c.h.bf16 %v3279_v31 }
 0x33d   : >> { %v3698_v29 = vpop.eup %3697  ;;  %3707 = vrcp.f32 %v1281_v0 }
 0x33e   : >> { %3709 = vpow2.f32 %v3122_v24  ;;  %v3123_v16 = vmul.f32 -1.442695, %v3325_v15  ;;  %v1343_v60 = vadd.f32 1e-05, %v3698_v29  ;;  %v1375_v23 = vmul.f32 %v3698_v29, %v3249_v59  ;;  %v3280_v15 = vld [vmem:[%s4556_s23 + $0x10] sm:$0xff]  }
 0x33f   : >> { %v3700_v44 = vpop.eup %3699 }
 0x340   : >> { %v3702_v38 = vpop.eup %3701  ;;  %3711 = vpow2.f32 %v3123_v16  ;;  %v3326_v45 = vpop.f32.mrb[16].mxu1  ;;  %v1391_v52 = vsel %vm1327_vm0, %v1343_v60, %v1375_v23  ;;  %v1344_v57 = vadd.f32 1e-05, %v3700_v44  ;;  %v1376_v50 = vmul.f32 %v3700_v44, %v3250_v51 }
 0x341   : >> { %v1282_v58 = vadd.f32 1.0, %v3702_v38  ;;  %v3327_v53 = vpop.f32.mrb[17].mxu1  ;;  %1407 = vadd.xlane.f32.xlu0 %v1391_v52 }
 0x342   : >> { %v3704_v54 = vpop.eup %3703  ;;  %v3328_v17 = vadd.f32 %v3327_v53, %v3326_v45  ;;  %v3329_v56 = vpop.f32.mrb[18].mxu1  ;;  %v1392_v55 = vsel %vm1328_vm1, %v1344_v57, %v1376_v50  ;;  %v3257_v50 = vunpack.c.l.bf16 %v3280_v15 }
 0x343   : >> { %3713 = vrcp.f32 %v1282_v58  ;;  %v1283_v61 = vadd.f32 1.0, %v3704_v54  ;;  %v3330_v43 = vpop.f32.mrb[19].mxu1  ;;  %1409 = vadd.xlane.f32.xlu1 %v1392_v55  ;;  %v1439_v62 = vpack.c.bf16 %v1392_v55, %v1391_v52  ;;  %v3258_v55 = vunpack.c.h.bf16 %v3280_v15 }
 0x344   : >> { %v3124_v49 = vmul.f32 -1.442695, %v3328_v17  ;;  %v3331_v48 = vadd.f32 %v3330_v43, %v3329_v56 }
 0x345   : >> { %v3706_v63 = vpop.eup %3705  ;;  %3715 = vrcp.f32 %v1283_v61  ;;  %1496 = vmatmul.mubr.bf16.vlgmr.msra.gmra.mrb[32].mxu1 %v1439_v62 }
 0x346   : >> { %3717 = vpow2.f32 %v3124_v49  ;;  %v3125_v59 = vmul.f32 -1.442695, %v3331_v48  ;;  %v1345_v0 = vadd.f32 1e-05, %v3706_v63  ;;  %v1377_v37 = vmul.f32 %v3706_v63, %v3253_v22  ;;  %1505 = vmatprep.mubr.bf16.mxu1 %v4173_v47  ;;  %v3281_v48 = vld [vmem:[%s4556_s23 + $0x18] sm:$0xff]  }
 0x347   : >> { %v3708_v24 = vpop.eup %3707 }
 0x348   : >> { %v3710_v51 = vpop.eup %3709  ;;  %3719 = vpow2.f32 %v3125_v59  ;;  %v3332_v29 = vpop.f32.mrb[20].mxu1  ;;  %v1393_v16 = vsel %vm1329_vm2, %v1345_v0, %v1377_v37  ;;  %v1346_v60 = vadd.f32 1e-05, %v3708_v24  ;;  %v1378_v23 = vmul.f32 %v3708_v24, %v3254_v46 }
 0x349   : >> { %v1284_v44 = vadd.f32 1.0, %v3710_v51  ;;  %v3333_v31 = vpop.f32.mrb[21].mxu1  ;;  %1411 = vadd.xlane.f32.xlu0 %v1393_v16 }
 0x34a   : >> { %v3712_v38 = vpop.eup %3711  ;;  %v3334_v45 = vadd.f32 %v3333_v31, %v3332_v29  ;;  %v3335_v52 = vpop.f32.mrb[22].mxu1  ;;  %v1394_v57 = vsel %vm1330_vm3, %v1346_v60, %v1378_v23  ;;  %v3261_v23 = vunpack.c.l.bf16 %v3281_v48 }
 0x34b   : >> { %3721 = vrcp.f32 %v1284_v44  ;;  %v1285_v58 = vadd.f32 1.0, %v3712_v38  ;;  %v3336_v53 = vpop.f32.mrb[23].mxu1  ;;  %v1440_v54 = vpack.c.bf16 %v1394_v57, %v1393_v16  ;;  %1413 = vadd.xlane.f32.xlu1 %v1394_v57  ;;  %v3262_v57 = vunpack.c.h.bf16 %v3281_v48 }
 0x34c   : >> { %v3126_v17 = vmul.f32 -1.442695, %v3334_v45  ;;  %v3337_v56 = vadd.f32 %v3336_v53, %v3335_v52 }
 0x34d   : >> { %v3714_v22 = vpop.eup %3713  ;;  %3723 = vrcp.f32 %v1285_v58  ;;  %1506 = vmatmul.mubr.bf16.gmra.mrb[36].mxu1 %v1440_v54 }
 0x34e   : >> { %3725 = vpow2.f32 %v3126_v17  ;;  %v3127_v61 = vmul.f32 -1.442695, %v3337_v56  ;;  %v1347_v43 = vadd.f32 1e-05, %v3714_v22  ;;  %v1379_v62 = vmul.f32 %v3714_v22, %v3257_v50  ;;  %1515 = vmatprep.mubr.bf16.mxu1 %v4173_v47  ;;  %v3282_v56 = vld [vmem:[%s4556_s23 + $0x20] sm:$0xff]  }
 0x34f   : >> { %v3716_v49 = vpop.eup %3715 }
 0x350   : >> { %v3718_v46 = vpop.eup %3717  ;;  %3727 = vpow2.f32 %v3127_v61  ;;  %v3338_v63 = vpop.f32.mrb[24].mxu1  ;;  %v1395_v59 = vsel %vm1331_vm4, %v1347_v43, %v1379_v62  ;;  %v1348_v0 = vadd.f32 1e-05, %v3716_v49  ;;  %v1380_v37 = vmul.f32 %v3716_v49, %v3258_v55 }
 0x351   : >> { %v1286_v24 = vadd.f32 1.0, %v3718_v46  ;;  %v3339_v15 = vpop.f32.mrb[25].mxu1  ;;  %1415 = vadd.xlane.f32.xlu0 %v1395_v59 }
 0x352   : >> { %v3720_v51 = vpop.eup %3719  ;;  %v3340_v29 = vadd.f32 %v3339_v15, %v3338_v63  ;;  %v3341_v16 = vpop.f32.mrb[26].mxu1  ;;  %v1396_v60 = vsel %vm1332_vm5, %v1348_v0, %v1380_v37  ;;  %v3265_v37 = vunpack.c.l.bf16 %v3282_v56 }
 0x353   : >> { %3729 = vrcp.f32 %v1286_v24  ;;  %v1287_v44 = vadd.f32 1.0, %v3720_v51  ;;  %v3342_v31 = vpop.f32.mrb[27].mxu1  ;;  %v1441_v38 = vpack.c.bf16 %v1396_v60, %v1395_v59  ;;  %1417 = vadd.xlane.f32.xlu1 %v1396_v60  ;;  %v3266_v60 = vunpack.c.h.bf16 %v3282_v56 }
 0x354   : >> { %v3128_v45 = vmul.f32 -1.442695, %v3340_v29  ;;  %v3343_v52 = vadd.f32 %v3342_v31, %v3341_v16 }
 0x355   : >> { %v3722_v50 = vpop.eup %3721  ;;  %3731 = vrcp.f32 %v1287_v44  ;;  %1516 = vmatmul.mubr.bf16.gmra.mrb[40].mxu1 %v1441_v38 }
 0x356   : >> { %3733 = vpow2.f32 %v3128_v45  ;;  %v3129_v58 = vmul.f32 -1.442695, %v3343_v52  ;;  %v1349_v53 = vadd.f32 1e-05, %v3722_v50  ;;  %v1381_v54 = vmul.f32 %v3722_v50, %v3261_v23  ;;  %1525 = vmatprep.mubr.bf16.mxu1 %v4173_v47  ;;  %v3283_v45 = vld [vmem:[%s4556_s23 + $0x28] sm:$0xff]  }
 0x357   : >> { %v3724_v17 = vpop.eup %3723 }
 0x358   : >> { %v3726_v55 = vpop.eup %3725  ;;  %3735 = vpow2.f32 %v3129_v58  ;;  %v3344_v22 = vpop.f32.mrb[28].mxu1  ;;  %v1397_v61 = vsel %vm1333_vm6, %v1349_v53, %v1381_v54  ;;  %v1350_v43 = vadd.f32 1e-05, %v3724_v17  ;;  %v1382_v62 = vmul.f32 %v3724_v17, %v3262_v57  ;;  %v3593_v57 = vld [vmem:[%s4945_s7] ss:$8 sps:$4 sm:$0xff]  }
 0x359   : >> { %v1288_v49 = vadd.f32 1.0, %v3726_v55  ;;  %v3345_v48 = vpop.f32.mrb[29].mxu1  ;;  %1419 = vadd.xlane.f32.xlu0 %v1397_v61  ;;  %v3595_v17 = vld [vmem:[%s4945_s7 + $0x4] ss:$8 sps:$4 sm:$0xff]   ;;  %v3596_v55 = vld [vmem:[%s4945_s7 + $0x10] ss:$8 sps:$4 sm:$0xff]  }
 0x35a   : >> { %v3728_v46 = vpop.eup %3727  ;;  %v3346_v63 = vadd.f32 %v3345_v48, %v3344_v22  ;;  %v3347_v59 = vpop.f32.mrb[30].mxu1  ;;  %v1398_v0 = vsel %vm1334_vm7, %v1350_v43, %v1382_v62  ;;  %v3598_v22 = vld [vmem:[%s4945_s7 + $0x14] ss:$8 sps:$4 sm:$0xff]   ;;  %v3269_v62 = vunpack.c.l.bf16 %v3283_v45  ;;  %1847 = vmatprep.subr.bf16.mxu0 %v3595_v17 }
 0x35b   : >> { %3737 = vrcp.f32 %v1288_v49  ;;  %v1289_v24 = vadd.f32 1.0, %v3728_v46  ;;  %v3348_v15 = vpop.f32.mrb[31].mxu1  ;;  %v1442_v51 = vpack.c.bf16 %v1398_v0, %v1397_v61  ;;  %1421 = vadd.xlane.f32.xlu1 %v1398_v0  ;;  %1848 = vmatpush1.bf16.msra.mxu0 %v3593_v57  ;;  %v3270_v46 = vunpack.c.h.bf16 %v3283_v45 }
 0x35c   : >> { %v3130_v29 = vmul.f32 -1.442695, %v3346_v63  ;;  %v3349_v16 = vadd.f32 %v3348_v15, %v3347_v59  ;;  %1849 = vmatprep.subr.bf16.mxu0 %v3598_v22  ;;  %v3284_v59 = vld [vmem:[%s4556_s23 + $0x30] sm:$0xff]   ;;  %v3599_v15 = vld [vmem:[%s4945_s7 + $0x20] ss:$8 sps:$4 sm:$0xff]   ;;  %v5499_v22 = vsub.s32 %v5484_v2, %v4622_v18 }
 0x35d   : >> { %v3730_v23 = vpop.eup %3729  ;;  %3739 = vrcp.f32 %v1289_v24  ;;  %1526 = vmatmul.mubr.bf16.gmra.mrb[44].mxu1 %v1442_v51  ;;  %v3601_v51 = vld [vmem:[%s4945_s7 + $0x24] ss:$8 sps:$4 sm:$0xff]   ;;  %v3273_v57 = vunpack.c.l.bf16 %v3284_v59  ;;  %v3806_v18 = vld [vmem:[#allocation18 + $0x74] ss:$8 sps:$4 sm:$0xff] (%p607_p7)  }
 0x35e   : >> { %3741 = vpow2.f32 %v3130_v29  ;;  %v3131_v44 = vmul.f32 -1.442695, %v3349_v16  ;;  %v1351_v31 = vadd.f32 1e-05, %v3730_v23  ;;  %v1383_v38 = vmul.f32 %v3730_v23, %v3265_v37  ;;  %1535 = vmatprep.mubr.bf16.mxu1 %v4173_v47 }
 0x35f   : >> { %v3732_v52 = vpop.eup %3731  ;;  %1850 = vmatpush1.bf16.msra.mxu0 %v3596_v55  ;;  %vm1340_vm13 = vcmp.eq.s32.totalorder %v5499_v22, 0  ;;  %v3623_v22 = vld [vmem:[%s4945_s7 + $0xa0] ss:$8 sps:$4 sm:$0xff]  }
 0x360   : >> { %v3734_v50 = vpop.eup %3733  ;;  %3743 = vpow2.f32 %v3131_v44  ;;  %v1399_v58 = vsel %vm1335_vm8, %v1351_v31, %v1383_v38  ;;  %v1352_v53 = vadd.f32 1e-05, %v3732_v52  ;;  %v1384_v54 = vmul.f32 %v3732_v52, %v3266_v60  ;;  %1851 = vmatprep.subr.bf16.mxu0 %v3601_v51  ;;  %v3602_v31 = vld [vmem:[%s4945_s7 + $0x30] ss:$8 sps:$4 sm:$0xff]   ;;  %v3604_v38 = vld [vmem:[%s4945_s7 + $0x34] ss:$8 sps:$4 sm:$0xff]  }
 0x361   : >> { %v1290_v56 = vadd.f32 1.0, %v3734_v50  ;;  %1423 = vadd.xlane.f32.xlu0 %v1399_v58 }
 0x362   : >> { %v3736_v61 = vpop.eup %3735  ;;  %v1400_v43 = vsel %vm1336_vm9, %v1352_v53, %v1384_v54  ;;  %v3274_v53 = vunpack.c.h.bf16 %v3284_v59 }
 0x363   : >> { %3745 = vrcp.f32 %v1290_v56  ;;  %v1291_v49 = vadd.f32 1.0, %v3736_v61  ;;  %v1443_v48 = vpack.c.bf16 %v1400_v43, %v1399_v58  ;;  %1425 = vadd.xlane.f32.xlu1 %v1400_v43  ;;  %1852 = vmatpush1.bf16.msra.mxu0 %v3599_v15  ;;  %v3285_v61 = vld [vmem:[%s4556_s23 + $0x38] sm:$0xff]   ;;  %v3605_v43 = vld [vmem:[%s4945_s7 + $0x40] ss:$8 sps:$4 sm:$0xff]  }
 0x364   : >> { %1853 = vmatprep.subr.bf16.mxu0 %v3604_v38  ;;  %v3278_v15 = vunpack.c.h.bf16 %v3285_v61  ;;  %v3613_v38 = vld [vmem:[%s4945_s7 + $0x64] ss:$8 sps:$4 sm:$0xff]  }
 0x365   : >> { %v3738_v63 = vpop.eup %3737  ;;  %3747 = vrcp.f32 %v1291_v49  ;;  %1536 = vmatmul.mubr.bf16.gmra.mrb[48].mxu1 %v1443_v48 }
 0x366   : >> { %v1353_v0 = vadd.f32 1e-05, %v3738_v63  ;;  %v1385_v37 = vmul.f32 %v3738_v63, %v3269_v62  ;;  %1545 = vmatprep.mubr.bf16.mxu1 %v4173_v47  ;;  %v3607_v62 = vld [vmem:[%s4945_s7 + $0x44] ss:$8 sps:$4 sm:$0xff]   ;;  %v3610_v63 = vld [vmem:[%s4945_s7 + $0x54] ss:$8 sps:$4 sm:$0xff]  }
 0x367   : >> { %v3740_v24 = vpop.eup %3739  ;;  %1854 = vmatpush1.bf16.msra.mxu0 %v3602_v31  ;;  %v3611_v31 = vld [vmem:[%s4945_s7 + $0x60] ss:$8 sps:$4 sm:$0xff]  }
 0x368   : >> { %v3742_v29 = vpop.eup %3741  ;;  %v1401_v16 = vsel %vm1337_vm10, %v1353_v0, %v1385_v37  ;;  %v1354_v60 = vadd.f32 1e-05, %v3740_v24  ;;  %v1386_v23 = vmul.f32 %v3740_v24, %v3270_v46  ;;  %1855 = vmatprep.subr.bf16.mxu0 %v3607_v62  ;;  %v3277_v0 = vunpack.c.l.bf16 %v3285_v61  ;;  %v3608_v24 = vld [vmem:[%s4945_s7 + $0x50] ss:$8 sps:$4 sm:$0xff]   ;;  %v3625_v61 = vld [vmem:[%s4945_s7 + $0xa4] ss:$8 sps:$4 sm:$0xff]  }
 0x369   : >> { %v1292_v44 = vadd.f32 1.0, %v3742_v29  ;;  %1427 = vadd.xlane.f32.xlu0 %v1401_v16  ;;  %v5500_v29 = vsub.s32 %v5484_v2, %v4625_v19  ;;  %v3626_v62 = vld [vmem:[%s4945_s7 + $0xb0] ss:$8 sps:$4 sm:$0xff]   ;;  %v3808_v19 = vld [vmem:[#allocation18 + $0x70] ss:$8 sps:$4 sm:$0xff] (%p607_p7)  }
 0x36a   : >> { %v3744_v45 = vpop.eup %3743  ;;  %v1402_v52 = vsel %vm1338_vm11, %v1354_v60, %v1386_v23 }
 0x36b   : >> { %3749 = vrcp.f32 %v1292_v44  ;;  %v1293_v50 = vadd.f32 1.0, %v3744_v45  ;;  %v1444_v58 = vpack.c.bf16 %v1402_v52, %v1401_v16  ;;  %1429 = vadd.xlane.f32.xlu1 %v1402_v52  ;;  %1856 = vmatpush1.bf16.msra.mxu0 %v3605_v43  ;;  %vm1341_vm14 = vcmp.eq.s32.totalorder %v5500_v29, 0  ;;  %v3628_v43 = vld [vmem:[%s4945_s7 + $0xb4] ss:$8 sps:$4 sm:$0xff]  }
 0x36c   : >> { %1857 = vmatprep.subr.bf16.mxu0 %v3610_v63  ;;  %v5501_v44 = vsub.s32 %v5484_v2, %v4628_v20  ;;  %v3632_v63 = vld [vmem:[%s4945_s7 + $0xd0] ss:$8 sps:$4 sm:$0xff]   ;;  %v5010_v29 = vld [vmem:[%s5003_s18 + $0x14] ss:$8 sps:$4 sm:$0xff]   ;;  %v3809_v20 = vld [vmem:[#allocation18 + $0x84] ss:$8 sps:$4 sm:$0xff] (%p607_p7)  }
 0x36d   : >> { %v3746_v54 = vpop.eup %3745  ;;  %3751 = vrcp.f32 %v1293_v50  ;;  %1546 = vmatmul.mubr.bf16.gmra.mrb[52].mxu1 %v1444_v58  ;;  %v3616_v50 = vld [vmem:[%s4945_s7 + $0x74] ss:$8 sps:$4 sm:$0xff]  }
 0x36e   : >> { %v1355_v17 = vadd.f32 1e-05, %v3746_v54  ;;  %v1387_v56 = vmul.f32 %v3746_v54, %v3273_v57  ;;  %1555 = vmatprep.mubr.bf16.mxu1 %v4173_v47  ;;  %vm1342_vm15 = vcmp.eq.s32.totalorder %v5501_v44, 0  ;;  %v3617_v54 = vld [vmem:[%s4945_s7 + $0x80] ss:$8 sps:$4 sm:$0xff]  }
 0x36f   : >> { %v3748_v55 = vpop.eup %3747  ;;  %1858 = vmatpush1.bf16.msra.mxu0 %v3608_v24  ;;  %v3638_v24 = vld [vmem:[%s4945_s7 + $0xf0] ss:$8 sps:$4 sm:$0xff]   ;;  %v5026_v44 = vld [vmem:[%s5003_s18 + $0x34] ss:$8 sps:$4 sm:$0xff]  }
 0x370   : >> { %v1403_v49 = vsel %vm1339_vm12, %v1355_v17, %v1387_v56  ;;  %v1356_v48 = vadd.f32 1e-05, %v3748_v55  ;;  %v1388_v46 = vmul.f32 %v3748_v55, %v3274_v53  ;;  %1859 = vmatprep.subr.bf16.mxu0 %v3613_v38  ;;  %v3614_v53 = vld [vmem:[%s4945_s7 + $0x70] ss:$8 sps:$4 sm:$0xff]   ;;  %v3619_v17 = vld [vmem:[%s4945_s7 + $0x84] ss:$8 sps:$4 sm:$0xff]  }
 0x371   : >> { %1431 = vadd.xlane.f32.xlu0 %v1403_v49  ;;  %v3622_v56 = vld [vmem:[%s4945_s7 + $0x94] ss:$8 sps:$4 sm:$0xff]   ;;  %v3620_v55 = vld [vmem:[%s4945_s7 + $0x90] ss:$8 sps:$4 sm:$0xff]   ;;  %v5034_v38 = vld [vmem:[%s5003_s18 + $0x44] ss:$8 sps:$4 sm:$0xff]  }
 0x372   : >> { %v1404_v59 = vsel %vm1340_vm13, %v1356_v48, %v1388_v46  ;;  %v3629_v48 = vld [vmem:[%s4945_s7 + $0xc0] ss:$8 sps:$4 sm:$0xff]   ;;  %v3634_v46 = vld [vmem:[%s4945_s7 + $0xd4] ss:$8 sps:$4 sm:$0xff]  }
 0x373   : >> { %v1445_v37 = vpack.c.bf16 %v1404_v59, %v1403_v49  ;;  %1433 = vadd.xlane.f32.xlu1 %v1404_v59  ;;  %1860 = vmatpush1.bf16.msra.mxu0 %v3611_v31  ;;  %v3631_v49 = vld [vmem:[%s4945_s7 + $0xc4] ss:$8 sps:$4 sm:$0xff]   ;;  %v5031_v31 = vld [vmem:[%s5003_s18 + $0x30] ss:$8 sps:$4 sm:$0xff]  }
 0x374   : >> { %1861 = vmatprep.subr.bf16.mxu0 %v3616_v50  ;;  %v3637_v59 = vld [vmem:[%s4945_s7 + $0xe4] ss:$8 sps:$4 sm:$0xff]  }
 0x375   : >> { %v3750_v51 = vpop.eup %3749  ;;  %1556 = vmatmul.mubr.bf16.gmra.mrb[56].mxu1 %v1445_v37  ;;  %v3640_v37 = vld [vmem:[%s4945_s7 + $0xf4] ss:$8 sps:$4 sm:$0xff]   ;;  %v5050_v50 = vld [vmem:[%s5003_s18 + $0x64] ss:$8 sps:$4 sm:$0xff]  }
 0x376   : >> { %v1357_v16 = vadd.f32 1e-05, %v3750_v51  ;;  %v1389_v60 = vmul.f32 %v3750_v51, %v3277_v0  ;;  %1565 = vmatprep.mubr.bf16.mxu1 %v4173_v47  ;;  %v3635_v0 = vld [vmem:[%s4945_s7 + $0xe0] ss:$8 sps:$4 sm:$0xff]   ;;  %s2863_s7 = scalar_lea.sflag (%p607_p7), [#allocation8], %s4542_s10 }
 0x377   : >> { %v3752_v23 = vpop.eup %3751  ;;  %1862 = vmatpush1.bf16.msra.mxu0 %v3614_v53  ;;  %v5007_v51 = vld [vmem:[%s5003_s18] ss:$8 sps:$4 sm:$0xff]   ;;  %v5063_v53 = vld [vmem:[%s5003_s18 + $0x70] ss:$8 sps:$4 sm:$0xff]  }
 0x378   : >> { %v1405_v45 = vsel %vm1341_vm14, %v1357_v16, %v1389_v60  ;;  %v1358_v52 = vadd.f32 1e-05, %v3752_v23  ;;  %v1390_v57 = vmul.f32 %v3752_v23, %v3278_v15  ;;  %1863 = vmatprep.subr.bf16.mxu0 %v3619_v17  ;;  %v3643_v15 = vld [vmem:[%s5003_s18 + $0x4] ss:$8 sps:$4 sm:$0xff]   ;;  %v5015_v16 = vld [vmem:[%s5003_s18 + $0x10] ss:$8 sps:$4 sm:$0xff]  }
 0x379   : >> { %1435 = vadd.xlane.f32.xlu0 %v1405_v45  ;;  %3350 = vmatprep.subr.bf16.mxu1 %v3643_v15  ;;  %v5018_v60 = vld [vmem:[%s5003_s18 + $0x24] ss:$8 sps:$4 sm:$0xff]   ;;  %v5023_v23 = vld [vmem:[%s5003_s18 + $0x20] ss:$8 sps:$4 sm:$0xff]  }
 0x37a   : >> { %v1406_v47 = vsel %vm1342_vm15, %v1358_v52, %v1390_v57  ;;  %3366 = vmatpush1.bf16.msra.mxu1 %v5007_v51  ;;  %v5042_v52 = vld [vmem:[%s5003_s18 + $0x54] ss:$8 sps:$4 sm:$0xff]   ;;  %v5047_v57 = vld [vmem:[%s5003_s18 + $0x50] ss:$8 sps:$4 sm:$0xff]   ;;  %v5071_v17 = vld [vmem:[%s5003_s18 + $0x80] ss:$8 sps:$4 sm:$0xff]  }
 0x37b   : >> { %v1446_v58 = vpack.c.bf16 %v1406_v47, %v1405_v45  ;;  %1437 = vadd.xlane.f32.xlu1 %v1406_v47  ;;  %1864 = vmatpush1.bf16.msra.mxu0 %v3617_v54  ;;  %v5039_v45 = vld [vmem:[%s5003_s18 + $0x40] ss:$8 sps:$4 sm:$0xff]   ;;  %v5066_v54 = vld [vmem:[%s5003_s18 + $0x84] ss:$8 sps:$4 sm:$0xff]  }
 0x37c   : >> { %1865 = vmatprep.subr.bf16.mxu0 %v3622_v56  ;;  %3351 = vmatprep.subr.bf16.mxu1 %v5010_v29  ;;  %v5055_v47 = vld [vmem:[%s5003_s18 + $0x60] ss:$8 sps:$4 sm:$0xff]   ;;  %v5074_v56 = vld [vmem:[%s5003_s18 + $0x94] ss:$8 sps:$4 sm:$0xff]  }
 0x37d   : >> { %1566 = vmatmul.mubr.bf16.gmra.mrb[60].mxu1 %v1446_v58  ;;  %v5058_v58 = vld [vmem:[%s5003_s18 + $0x74] ss:$8 sps:$4 sm:$0xff]  }
 0x37e   : >> { %3367 = vmatpush1.bf16.msra.mxu1 %v5015_v16 }
 0x37f   : >> { %1866 = vmatpush1.bf16.msra.mxu0 %v3620_v55  ;;  %3352 = vmatprep.subr.bf16.mxu1 %v5018_v60  ;;  %v5079_v55 = vld [vmem:[%s5003_s18 + $0x90] ss:$8 sps:$4 sm:$0xff]  }
 0x380   : >> { %1867 = vmatprep.subr.bf16.mxu0 %v3625_v61  ;;  %v5087_v61 = vld [vmem:[%s5003_s18 + $0xa0] ss:$8 sps:$4 sm:$0xff]  }
 0x382   : >> { %3368 = vmatpush1.bf16.msra.mxu1 %v5023_v23 }
 0x383   : >> { %1868 = vmatpush1.bf16.msra.mxu0 %v3623_v22  ;;  %3353 = vmatprep.subr.bf16.mxu1 %v5026_v44  ;;  %v5082_v22 = vld [vmem:[%s5003_s18 + $0xa4] ss:$8 sps:$4 sm:$0xff]  }
 0x384   : >> { %1869 = vmatprep.subr.bf16.mxu0 %v3628_v43  ;;  %v5090_v43 = vld [vmem:[%s5003_s18 + $0xb4] ss:$8 sps:$4 sm:$0xff]  }
 0x386   : >> { %3369 = vmatpush1.bf16.msra.mxu1 %v5031_v31 }
 0x387   : >> { %1870 = vmatpush1.bf16.msra.mxu0 %v3626_v62  ;;  %3354 = vmatprep.subr.bf16.mxu1 %v5034_v38  ;;  %v5095_v62 = vld [vmem:[%s5003_s18 + $0xb0] ss:$8 sps:$4 sm:$0xff]  }
 0x388   : >> { %1871 = vmatprep.subr.bf16.mxu0 %v3631_v49  ;;  %v5098_v49 = vld [vmem:[%s5003_s18 + $0xc4] ss:$8 sps:$4 sm:$0xff]  }
 0x38a   : >> { %3370 = vmatpush1.bf16.msra.mxu1 %v5039_v45 }
 0x38b   : >> { %1872 = vmatpush1.bf16.msra.mxu0 %v3629_v48  ;;  %3355 = vmatprep.subr.bf16.mxu1 %v5042_v52 }
 0x38c   : >> { %1873 = vmatprep.subr.bf16.mxu0 %v3634_v46  ;;  %v5103_v46 = vld [vmem:[%s5003_s18 + $0xc0] ss:$8 sps:$4 sm:$0xff]  }
 0x38e   : >> { %3371 = vmatpush1.bf16.msra.mxu1 %v5047_v57 }
 0x38f   : >> { %1874 = vmatpush1.bf16.msra.mxu0 %v3632_v63  ;;  %3356 = vmatprep.subr.bf16.mxu1 %v5050_v50 }
 0x390   : >> { %1875 = vmatprep.subr.bf16.mxu0 %v3637_v59  ;;  %v5106_v59 = vld [vmem:[%s5003_s18 + $0xd4] ss:$8 sps:$4 sm:$0xff]  }
 0x392   : >> { %3372 = vmatpush1.bf16.msra.mxu1 %v5055_v47 }
 0x393   : >> { %1876 = vmatpush1.bf16.msra.mxu0 %v3635_v0  ;;  %3357 = vmatprep.subr.bf16.mxu1 %v5058_v58  ;;  %v5111_v0 = vld [vmem:[%s5003_s18 + $0xd0] ss:$8 sps:$4 sm:$0xff]  }
 0x394   : >> { %1877 = vmatprep.subr.bf16.mxu0 %v3640_v37 }
 0x396   : >> { %3373 = vmatpush1.bf16.msra.mxu1 %v5063_v53 }
 0x397   : >> { %1878 = vmatpush1.bf16.msra.mxu0 %v3638_v24  ;;  %3358 = vmatprep.subr.bf16.mxu1 %v5066_v54 }
 0x398   : >> { %2215 = vmatprep.subr.bf16.mxu0 %v3643_v15 }
 0x39a   : >> { %3374 = vmatpush1.bf16.msra.mxu1 %v5071_v17 }
 0x39b   : >> { %3359 = vmatprep.subr.bf16.mxu1 %v5074_v56 }
 0x39e   : >> { %3375 = vmatpush1.bf16.msra.mxu1 %v5079_v55 }
 0x39f   : >> { %3360 = vmatprep.subr.bf16.mxu1 %v5082_v22 }
 0x3a2   : >> { %3376 = vmatpush1.bf16.msra.mxu1 %v5087_v61 }
 0x3a3   : >> { %3361 = vmatprep.subr.bf16.mxu1 %v5090_v43 }
 0x3a6   : >> { %3377 = vmatpush1.bf16.msra.mxu1 %v5095_v62 }
 0x3a7   : >> { %3362 = vmatprep.subr.bf16.mxu1 %v5098_v49 }
 0x3aa   : >> { %3378 = vmatpush1.bf16.msra.mxu1 %v5103_v46 }
 0x3ab   : >> { %3363 = vmatprep.subr.bf16.mxu1 %v5106_v59 }
 0x3ae   : >> { %3379 = vmatpush1.bf16.msra.mxu1 %v5111_v0 }
 0x3ce   : >> { %v1408_v48 = vpop.xlane.xlu0 %1407 }
 0x3cf   : >> { %3753 = vrcp.f32 %v1408_v48 }
 0x3d0   : >> { %v1410_v63 = vpop.xlane.xlu1 %1409 }
 0x3d1   : >> { %3755 = vrcp.f32 %v1410_v63 }
 0x3d6   : >> { %v1412_v37 = vpop.xlane.xlu0 %1411 }
 0x3d7   : >> { %3757 = vrcp.f32 %v1412_v37 }
 0x3d8   : >> { %v1414_v24 = vpop.xlane.xlu1 %1413 }
 0x3d9   : >> { %3759 = vrcp.f32 %v1414_v24  ;;  %v3754_v21 = vpop.eup %3753 }
 0x3db   : >> { %v3756_v26 = vpop.eup %3755 }
 0x3de   : >> { %v1416_v48 = vpop.xlane.xlu0 %1415 }
 0x3df   : >> { %3761 = vrcp.f32 %v1416_v48 }
 0x3e0   : >> { %v1418_v63 = vpop.xlane.xlu1 %1417 }
 0x3e1   : >> { %3763 = vrcp.f32 %v1418_v63  ;;  %v3758_v37 = vpop.eup %3757 }
 0x3e3   : >> { %v3760_v42 = vpop.eup %3759 }
 0x418   : >> { %v1497_v15 = vpop.f32.mrb[32].mxu1 }
 0x419   : >> { %v1499_v25 = vpop.f32.mrb[33].mxu1  ;;  %v1592_v28 = vmul.f32 %v3754_v21, %v1497_v15 }
 0x41a   : >> { %v1501_v27 = vpop.f32.mrb[34].mxu1  ;;  %v1593_v34 = vmul.f32 %v3754_v21, %v1499_v25  ;;  %v1420_v21 = vpop.xlane.xlu0 %1419 }
 0x41b   : >> { %v1594_v32 = vmul.f32 %v3756_v26, %v1501_v27  ;;  %v1503_v33 = vpop.f32.mrb[35].mxu1  ;;  %3765 = vrcp.f32 %v1420_v21 }
 0x41c   : >> { %v1595_v35 = vmul.f32 %v3756_v26, %v1503_v33 }
 0x41d   : >> { %v1624_v39 = vpack.c.bf16 %v1594_v32, %v1592_v28  ;;  %v1422_v28 = vpop.xlane.xlu1 %1421 }
 0x41e   : >> { %v1625_v40 = vpack.c.bf16 %v1595_v35, %v1593_v34  ;;  %3767 = vrcp.f32 %v1422_v28  ;;  %v3762_v35 = vpop.eup %3761 }
 0x420   : >> { %v1507_v41 = vpop.f32.mrb[36].mxu1  ;;  %1879 = vmatprep.mubr.bf16.mxu0 %v1625_v40 }
 0x421   : >> { %v1509_v24 = vpop.f32.mrb[37].mxu1  ;;  %1880 = vmatmul.mubr.bf16.vlgmr.msra.gmra.mrb[32].mxu0 %v1624_v39  ;;  %v1596_v15 = vmul.f32 %v3758_v37, %v1507_v41  ;;  %v1426_v48 = vpop.xlane.xlu1 %1425 }
 0x422   : >> { %v1511_v1 = vpop.f32.mrb[38].mxu1  ;;  %2216 = vmatpush1.bf16.msra.mxu0 %v5007_v51  ;;  %v1597_v25 = vmul.f32 %v3758_v37, %v1509_v24  ;;  %v1424_v51 = vpop.xlane.xlu0 %1423 }
 0x423   : >> { %v1598_v27 = vmul.f32 %v3760_v42, %v1511_v1  ;;  %v1513_v2 = vpop.f32.mrb[39].mxu1  ;;  %2217 = vmatprep.subr.bf16.mxu0 %v5010_v29  ;;  %v3764_v1 = vpop.eup %3763  ;;  %3769 = vrcp.f32 %v1424_v51 }
 0x424   : >> { %v1599_v26 = vmul.f32 %v3760_v42, %v1513_v2  ;;  %3771 = vrcp.f32 %v1426_v48 }
 0x425   : >> { %v1626_v32 = vpack.c.bf16 %v1598_v27, %v1596_v15 }
 0x426   : >> { %v1627_v33 = vpack.c.bf16 %v1599_v26, %v1597_v25  ;;  %2218 = vmatpush1.bf16.msra.mxu0 %v5015_v16  ;;  %v1428_v26 = vpop.xlane.xlu0 %1427 }
 0x427   : >> { %2219 = vmatprep.subr.bf16.mxu0 %v5018_v60  ;;  %3773 = vrcp.f32 %v1428_v26 }
 0x428   : >> { %v1517_v34 = vpop.f32.mrb[40].mxu1  ;;  %1889 = vmatprep.mubr.bf16.mxu0 %v1627_v33 }
 0x429   : >> { %v1519_v39 = vpop.f32.mrb[41].mxu1  ;;  %1890 = vmatmul.mubr.bf16.gmra.mrb[36].mxu0 %v1626_v32  ;;  %v1600_v41 = vmul.f32 %v3762_v35, %v1517_v34  ;;  %v1430_v32 = vpop.xlane.xlu1 %1429 }
 0x42a   : >> { %v1521_v40 = vpop.f32.mrb[42].mxu1  ;;  %2220 = vmatpush1.bf16.msra.mxu0 %v5023_v23  ;;  %v1601_v29 = vmul.f32 %v3762_v35, %v1519_v39  ;;  %v3766_v23 = vpop.eup %3765  ;;  %3775 = vrcp.f32 %v1430_v32 }
 0x42b   : >> { %v1602_v2 = vmul.f32 %v3764_v1, %v1521_v40  ;;  %v1523_v42 = vpop.f32.mrb[43].mxu1  ;;  %2221 = vmatprep.subr.bf16.mxu0 %v5026_v44  ;;  %v3768_v15 = vpop.eup %3767 }
 0x42c   : >> { %v1603_v16 = vmul.f32 %v3764_v1, %v1523_v42 }
 0x42d   : >> { %v1628_v60 = vpack.c.bf16 %v1602_v2, %v1600_v41  ;;  %v1432_v2 = vpop.xlane.xlu0 %1431  ;;  %v1434_v51 = vpop.xlane.xlu1 %1433 }
 0x42e   : >> { %v1629_v63 = vpack.c.bf16 %v1603_v16, %v1601_v29  ;;  %2222 = vmatpush1.bf16.msra.mxu0 %v5031_v31  ;;  %3777 = vrcp.f32 %v1432_v2  ;;  %v3685_v2 = vld [vmem:[%s5003_s18 + $0xe4] ss:$8 sps:$4 sm:$0xff]  }
 0x42f   : >> { %2223 = vmatprep.subr.bf16.mxu0 %v5034_v38  ;;  %3779 = vrcp.f32 %v1434_v51  ;;  %3364 = vmatprep.subr.bf16.mxu1 %v3685_v2 }
 0x430   : >> { %v1527_v37 = vpop.f32.mrb[44].mxu1  ;;  %1899 = vmatprep.mubr.bf16.mxu0 %v1629_v63 }
 0x431   : >> { %v1529_v24 = vpop.f32.mrb[45].mxu1  ;;  %1900 = vmatmul.mubr.bf16.gmra.mrb[40].mxu0 %v1628_v60  ;;  %v1604_v44 = vmul.f32 %v3766_v23, %v1527_v37 }
 0x432   : >> { %v1531_v27 = vpop.f32.mrb[46].mxu1  ;;  %2224 = vmatpush1.bf16.msra.mxu0 %v5039_v45  ;;  %v1605_v31 = vmul.f32 %v3766_v23, %v1529_v24  ;;  %v3770_v45 = vpop.eup %3769 }
 0x433   : >> { %v1606_v21 = vmul.f32 %v3768_v15, %v1531_v27  ;;  %v1533_v25 = vpop.f32.mrb[47].mxu1  ;;  %2225 = vmatprep.subr.bf16.mxu0 %v5042_v52  ;;  %v3772_v39 = vpop.eup %3771 }
 0x434   : >> { %v1607_v28 = vmul.f32 %v3768_v15, %v1533_v25  ;;  %v1436_v24 = vpop.xlane.xlu0 %1435  ;;  %v1438_v27 = vpop.xlane.xlu1 %1437 }
 0x435   : >> { %v1630_v38 = vpack.c.bf16 %v1606_v21, %v1604_v44  ;;  %3781 = vrcp.f32 %v1436_v24 }
 0x436   : >> { %v1631_v33 = vpack.c.bf16 %v1607_v28, %v1605_v31  ;;  %2226 = vmatpush1.bf16.msra.mxu0 %v5047_v57  ;;  %3783 = vrcp.f32 %v1438_v27 }
 0x437   : >> { %2227 = vmatprep.subr.bf16.mxu0 %v5050_v50 }
 0x438   : >> { %v1537_v34 = vpop.f32.mrb[48].mxu1  ;;  %1909 = vmatprep.mubr.bf16.mxu0 %v1631_v33 }
 0x439   : >> { %v1539_v35 = vpop.f32.mrb[49].mxu1  ;;  %1910 = vmatmul.mubr.bf16.gmra.mrb[44].mxu0 %v1630_v38  ;;  %v1608_v52 = vmul.f32 %v3770_v45, %v1537_v34 }
 0x43a   : >> { %v1541_v1 = vpop.f32.mrb[50].mxu1  ;;  %2228 = vmatpush1.bf16.msra.mxu0 %v5055_v47  ;;  %v1609_v57 = vmul.f32 %v3770_v45, %v1539_v35  ;;  %v3774_v47 = vpop.eup %3773 }
 0x43b   : >> { %v1610_v40 = vmul.f32 %v3772_v39, %v1541_v1  ;;  %v1543_v41 = vpop.f32.mrb[51].mxu1  ;;  %2229 = vmatprep.subr.bf16.mxu0 %v5058_v58  ;;  %v3776_v60 = vpop.eup %3775 }
 0x43c   : >> { %v1611_v42 = vmul.f32 %v3772_v39, %v1543_v41 }
 0x43d   : >> { %v1632_v50 = vpack.c.bf16 %v1610_v40, %v1608_v52 }
 0x43e   : >> { %v1633_v29 = vpack.c.bf16 %v1611_v42, %v1609_v57  ;;  %2230 = vmatpush1.bf16.msra.mxu0 %v5063_v53  ;;  %v3683_v57 = vld [vmem:[%s5003_s18 + $0xe0] ss:$8 sps:$4 sm:$0xff]   ;;  %v3686_v42 = vld [vmem:[%s5003_s18 + $0xf0] ss:$8 sps:$4 sm:$0xff]  }
 0x43f   : >> { %2231 = vmatprep.subr.bf16.mxu0 %v5066_v54  ;;  %3380 = vmatpush1.bf16.msra.mxu1 %v3683_v57 }
 0x440   : >> { %v1547_v16 = vpop.f32.mrb[52].mxu1  ;;  %1919 = vmatprep.mubr.bf16.mxu0 %v1633_v29 }
 0x441   : >> { %v1549_v48 = vpop.f32.mrb[53].mxu1  ;;  %1920 = vmatmul.mubr.bf16.gmra.mrb[48].mxu0 %v1632_v50  ;;  %v1612_v58 = vmul.f32 %v3774_v47, %v1547_v16 }
 0x442   : >> { %v1551_v63 = vpop.f32.mrb[54].mxu1  ;;  %2232 = vmatpush1.bf16.msra.mxu0 %v5071_v17  ;;  %v1613_v53 = vmul.f32 %v3774_v47, %v1549_v48  ;;  %v3778_v17 = vpop.eup %3777 }
 0x443   : >> { %v1614_v37 = vmul.f32 %v3776_v60, %v1551_v63  ;;  %v1553_v23 = vpop.f32.mrb[55].mxu1  ;;  %2233 = vmatprep.subr.bf16.mxu0 %v5074_v56  ;;  %v3780_v26 = vpop.eup %3779 }
 0x444   : >> { %v1615_v15 = vmul.f32 %v3776_v60, %v1553_v23  ;;  %v3782_v45 = vpop.eup %3781 }
 0x445   : >> { %v1634_v54 = vpack.c.bf16 %v1614_v37, %v1612_v58 }
 0x446   : >> { %v1635_v44 = vpack.c.bf16 %v1615_v15, %v1613_v53  ;;  %2234 = vmatpush1.bf16.msra.mxu0 %v5079_v55 }
 0x447   : >> { %2235 = vmatprep.subr.bf16.mxu0 %v5082_v22 }
 0x448   : >> { %v1557_v21 = vpop.f32.mrb[56].mxu1  ;;  %1929 = vmatprep.mubr.bf16.mxu0 %v1635_v44 }
 0x449   : >> { %v1559_v25 = vpop.f32.mrb[57].mxu1  ;;  %1930 = vmatmul.mubr.bf16.gmra.mrb[52].mxu0 %v1634_v54  ;;  %v1616_v56 = vmul.f32 %v3778_v17, %v1557_v21 }
 0x44a   : >> { %v1561_v31 = vpop.f32.mrb[58].mxu1  ;;  %2236 = vmatpush1.bf16.msra.mxu0 %v5087_v61  ;;  %v1617_v38 = vmul.f32 %v3778_v17, %v1559_v25  ;;  %v3784_v61 = vpop.eup %3783 }
 0x44b   : >> { %v1618_v28 = vmul.f32 %v3780_v26, %v1561_v31  ;;  %v1563_v32 = vpop.f32.mrb[59].mxu1  ;;  %2237 = vmatprep.subr.bf16.mxu0 %v5090_v43 }
 0x44c   : >> { %v1619_v55 = vmul.f32 %v3780_v26, %v1563_v32 }
 0x44d   : >> { %v1636_v33 = vpack.c.bf16 %v1618_v28, %v1616_v56 }
 0x44e   : >> { %v1637_v34 = vpack.c.bf16 %v1619_v55, %v1617_v38  ;;  %2238 = vmatpush1.bf16.msra.mxu0 %v5095_v62 }
 0x44f   : >> { %2239 = vmatprep.subr.bf16.mxu0 %v5098_v49 }
 0x450   : >> { %v1567_v22 = vpop.f32.mrb[60].mxu1  ;;  %1939 = vmatprep.mubr.bf16.mxu0 %v1637_v34 }
 0x451   : >> { %v1569_v35 = vpop.f32.mrb[61].mxu1  ;;  %1940 = vmatmul.mubr.bf16.gmra.mrb[56].mxu0 %v1636_v33  ;;  %v1620_v43 = vmul.f32 %v3782_v45, %v1567_v22 }
 0x452   : >> { %v1571_v39 = vpop.f32.mrb[62].mxu1  ;;  %2240 = vmatpush1.bf16.msra.mxu0 %v5103_v46  ;;  %v1621_v62 = vmul.f32 %v3782_v45, %v1569_v35  ;;  %v3688_v46 = vld [vmem:[%s5003_s18 + $0xf4] ss:$8 sps:$4 sm:$0xff]   ;;  %s4061_s18 = scalar_lea.vmem (%p607_p7), %s5369_s0, 4096 }
 0x453   : >> { %v1622_v1 = vmul.f32 %v3784_v61, %v1571_v39  ;;  %v1573_v52 = vpop.f32.mrb[63].mxu1  ;;  %2241 = vmatprep.subr.bf16.mxu0 %v5106_v59  ;;  %3365 = vmatprep.subr.bf16.mxu1 %v3688_v46  ;;  %v1675_v59 = vld [vmem:[%s1674_s30] sm:$0x3]  ;;  %p4062_p9 = scmp.ne.s32.totalorder (%p607_p7), %s5369_s0, %s4061_s18  ;;  %s4067_s30 = scalar_lea.vmem (%p607_p7), %s4066_s28, 8192 }
 0x454   : >> { %v1623_v49 = vmul.f32 %v3784_v61, %v1573_v52  ;;  %3381 = vmatpush1.bf16.msra.mxu1 %v3686_v42  ;;  %v5153_v51 = vrot.slane %v1675_v59, %v4848_v36  ;;  %p4069_p4 = scmp.lt.s32.totalorder (%p607_p7), %s4067_s30, %s4061_s18 }
 0x455   : >> { %v1638_v40 = vpack.c.bf16 %v1622_v1, %v1620_v43  ;;  %p4063_p2 = pnand (%p607_p7), %p4062_p9, %p5504_p0 }
 0x456   : >> { %v1639_v41 = vpack.c.bf16 %v1623_v49, %v1621_v62  ;;  %2242 = vmatpush1.bf16.msra.mxu0 %v5111_v0  ;;  %v5150_v0 = vrot.slane %v1675_v59, %v4844_v30  ;;  %p4070_p3 = por (%p607_p7), %p4069_p4, %p4068_p8 }
 0x457   : >> { %2243 = vmatprep.subr.bf16.mxu0 %v3685_v2  ;;  %p4064_p5 = pneg (%p607_p7), %p4063_p2 }
 0x458   : >> { %1949 = vmatprep.mubr.bf16.mxu0 %v1639_v41 }
 0x459   : >> { %1950 = vmatmul.mubr.bf16.gmra.mrb[60].mxu0 %v1638_v40  ;;  %p4071_p10 = pnand (%p607_p7), %p4070_p3, %p4064_p5 }
 0x45a   : >> { %2244 = vmatpush1.bf16.msra.mxu0 %v3683_v57 }
 0x45b   : >> { %2245 = vmatprep.subr.bf16.mxu0 %v3688_v46 }
 0x45e   : >> { %2246 = vmatpush1.bf16.msra.mxu0 %v3686_v42 }
 0x4f4   : >> { %v1881_v50 = vpop.f32.mrb[32].mxu0 }
 0x4f5   : >> { %v1882_v29 = vadd.f32 %v1881_v50, %v5150_v0  ;;  %v1883_v16 = vpop.f32.mrb[33].mxu0 }
 0x4f6   : >> { %v1884_v47 = vadd.f32 %v1883_v16, %v5153_v51  ;;  %v1885_v48 = vpop.f32.mrb[34].mxu0 }
 0x4f7   : >> { %v1886_v60 = vadd.f32 %v1885_v48, %v5150_v0  ;;  %v1887_v63 = vpop.f32.mrb[35].mxu0  ;;  %v1960_v37 = vmax.f32 %v1882_v29, 0.0 }
 0x4f8   : >> { %v1888_v58 = vadd.f32 %v1887_v63, %v5153_v51  ;;  %v1961_v24 = vmax.f32 %v1884_v47, 0.0 }
 0x4f9   : >> { %v1962_v23 = vmax.f32 %v1886_v60, 0.0 }
 0x4fa   : >> { %v1963_v53 = vmax.f32 %v1888_v58, 0.0 }
 0x4fb   : >> { %v1992_v15 = vpack.c.bf16 %v1962_v23, %v1960_v37 }
 0x4fc   : >> { %v1993_v27 = vpack.c.bf16 %v1963_v53, %v1961_v24  ;;  %v1891_v54 = vpop.f32.mrb[36].mxu0 }
 0x4fd   : >> { %v1892_v44 = vadd.f32 %v1891_v54, %v5150_v0  ;;  %v1893_v21 = vpop.f32.mrb[37].mxu0 }
 0x4fe   : >> { %v1894_v17 = vadd.f32 %v1893_v21, %v5153_v51  ;;  %v1895_v25 = vpop.f32.mrb[38].mxu0  ;;  %2247 = vmatprep.mubr.bf16.mxu0 %v1993_v27 }
 0x4ff   : >> { %v1896_v26 = vadd.f32 %v1895_v25, %v5150_v0  ;;  %v1897_v31 = vpop.f32.mrb[39].mxu0  ;;  %2248 = vmatmul.mubr.bf16.vlgmr.msra.gmra.mrb[64].mxu0 %v1992_v15  ;;  %v1964_v28 = vmax.f32 %v1892_v44, 0.0 }
 0x500   : >> { %v1898_v56 = vadd.f32 %v1897_v31, %v5153_v51  ;;  %v1965_v38 = vmax.f32 %v1894_v17, 0.0 }
 0x501   : >> { %v1966_v32 = vmax.f32 %v1896_v26, 0.0 }
 0x502   : >> { %v1967_v55 = vmax.f32 %v1898_v56, 0.0 }
 0x503   : >> { %v1994_v33 = vpack.c.bf16 %v1966_v32, %v1964_v28 }
 0x504   : >> { %v1995_v34 = vpack.c.bf16 %v1967_v55, %v1965_v38  ;;  %v1901_v22 = vpop.f32.mrb[40].mxu0 }
 0x505   : >> { %v1902_v45 = vadd.f32 %v1901_v22, %v5150_v0  ;;  %v1903_v35 = vpop.f32.mrb[41].mxu0 }
 0x506   : >> { %v1904_v61 = vadd.f32 %v1903_v35, %v5153_v51  ;;  %v1905_v39 = vpop.f32.mrb[42].mxu0  ;;  %2257 = vmatprep.mubr.bf16.mxu0 %v1995_v34 }
 0x507   : >> { %v1906_v43 = vadd.f32 %v1905_v39, %v5150_v0  ;;  %v1907_v1 = vpop.f32.mrb[43].mxu0  ;;  %2258 = vmatmul.mubr.bf16.gmra.mrb[68].mxu0 %v1994_v33  ;;  %v1968_v62 = vmax.f32 %v1902_v45, 0.0 }
 0x508   : >> { %v1908_v52 = vadd.f32 %v1907_v1, %v5153_v51  ;;  %v1969_v40 = vmax.f32 %v1904_v61, 0.0 }
 0x509   : >> { %v1970_v49 = vmax.f32 %v1906_v43, 0.0 }
 0x50a   : >> { %v1971_v41 = vmax.f32 %v1908_v52, 0.0 }
 0x50b   : >> { %v1996_v2 = vpack.c.bf16 %v1970_v49, %v1968_v62 }
 0x50c   : >> { %v1997_v57 = vpack.c.bf16 %v1971_v41, %v1969_v40  ;;  %v1911_v46 = vpop.f32.mrb[44].mxu0 }
 0x50d   : >> { %v1912_v42 = vadd.f32 %v1911_v46, %v5150_v0  ;;  %v1913_v59 = vpop.f32.mrb[45].mxu0 }
 0x50e   : >> { %v1914_v50 = vadd.f32 %v1913_v59, %v5153_v51  ;;  %v1915_v29 = vpop.f32.mrb[46].mxu0  ;;  %2267 = vmatprep.mubr.bf16.mxu1 %v1997_v57 }
 0x50f   : >> { %v1916_v16 = vadd.f32 %v1915_v29, %v5150_v0  ;;  %v1917_v47 = vpop.f32.mrb[47].mxu0  ;;  %2268 = vmatmul.mubr.bf16.vlgmr.msra.gmra.mrb[64].mxu1 %v1996_v2  ;;  %v1972_v60 = vmax.f32 %v1912_v42, 0.0 }
 0x510   : >> { %v1918_v48 = vadd.f32 %v1917_v47, %v5153_v51  ;;  %v1973_v58 = vmax.f32 %v1914_v50, 0.0 }
 0x511   : >> { %v1974_v63 = vmax.f32 %v1916_v16, 0.0 }
 0x512   : >> { %v1975_v37 = vmax.f32 %v1918_v48, 0.0 }
 0x513   : >> { %v1998_v23 = vpack.c.bf16 %v1974_v63, %v1972_v60 }
 0x514   : >> { %v1999_v24 = vpack.c.bf16 %v1975_v37, %v1973_v58  ;;  %v1921_v53 = vpop.f32.mrb[48].mxu0 }
 0x515   : >> { %v1922_v15 = vadd.f32 %v1921_v53, %v5150_v0  ;;  %v1923_v27 = vpop.f32.mrb[49].mxu0 }
 0x516   : >> { %v1924_v54 = vadd.f32 %v1923_v27, %v5153_v51  ;;  %v1925_v44 = vpop.f32.mrb[50].mxu0  ;;  %2277 = vmatprep.mubr.bf16.mxu1 %v1999_v24 }
 0x517   : >> { %v1926_v21 = vadd.f32 %v1925_v44, %v5150_v0  ;;  %v1927_v17 = vpop.f32.mrb[51].mxu0  ;;  %2278 = vmatmul.mubr.bf16.gmra.mrb[68].mxu1 %v1998_v23  ;;  %v1976_v26 = vmax.f32 %v1922_v15, 0.0 }
 0x518   : >> { %v1928_v25 = vadd.f32 %v1927_v17, %v5153_v51  ;;  %v1977_v56 = vmax.f32 %v1924_v54, 0.0 }
 0x519   : >> { %v1978_v31 = vmax.f32 %v1926_v21, 0.0 }
 0x51a   : >> { %v1979_v28 = vmax.f32 %v1928_v25, 0.0 }
 0x51b   : >> { %v2000_v32 = vpack.c.bf16 %v1978_v31, %v1976_v26 }
 0x51c   : >> { %v2001_v38 = vpack.c.bf16 %v1979_v28, %v1977_v56  ;;  %v1931_v55 = vpop.f32.mrb[52].mxu0  ;;  %v2043_v28 = vld [vmem:[%s2042_s3] sm:$0x3] }
 0x51d   : >> { %v1932_v33 = vadd.f32 %v1931_v55, %v5150_v0  ;;  %v1933_v34 = vpop.f32.mrb[53].mxu0 }
 0x51e   : >> { %v1934_v22 = vadd.f32 %v1933_v34, %v5153_v51  ;;  %v1935_v45 = vpop.f32.mrb[54].mxu0  ;;  %2287 = vmatprep.mubr.bf16.mxu1 %v2001_v38 }
 0x51f   : >> { %v1936_v35 = vadd.f32 %v1935_v45, %v5150_v0  ;;  %v1937_v61 = vpop.f32.mrb[55].mxu0  ;;  %2288 = vmatmul.mubr.bf16.gmra.mrb[72].mxu1 %v2000_v32  ;;  %v1980_v43 = vmax.f32 %v1932_v33, 0.0  ;;  %v5189_v32 = vrot.slane %v2043_v28, %v4844_v30  ;;  %v2364_v33 = vld [vmem:[%s4722_s4] sm:$0xff] }
 0x520   : >> { %v1938_v39 = vadd.f32 %v1937_v61, %v5153_v51  ;;  %v1981_v52 = vmax.f32 %v1934_v22, 0.0 }
 0x521   : >> { %v1982_v1 = vmax.f32 %v1936_v35, 0.0  ;;  %v2365_v35 = vld [vmem:[%s4722_s4 + $0x8] sm:$0xff] }
 0x522   : >> { %v1983_v62 = vmax.f32 %v1938_v39, 0.0 }
 0x523   : >> { %v2002_v49 = vpack.c.bf16 %v1982_v1, %v1980_v43  ;;  %v2366_v1 = vld [vmem:[%s4722_s4 + $0x10] sm:$0xff] }
 0x524   : >> { %v2003_v40 = vpack.c.bf16 %v1983_v62, %v1981_v52  ;;  %v1941_v41 = vpop.f32.mrb[56].mxu0 }
 0x525   : >> { %v1942_v2 = vadd.f32 %v1941_v41, %v5150_v0  ;;  %v1943_v57 = vpop.f32.mrb[57].mxu0 }
 0x526   : >> { %v1944_v46 = vadd.f32 %v1943_v57, %v5153_v51  ;;  %v1945_v42 = vpop.f32.mrb[58].mxu0  ;;  %2297 = vmatprep.mubr.bf16.mxu1 %v2003_v40  ;;  %v2367_v40 = vld [vmem:[%s4722_s4 + $0x18] sm:$0xff] }
 0x527   : >> { %v1946_v59 = vadd.f32 %v1945_v42, %v5150_v0  ;;  %v1947_v50 = vpop.f32.mrb[59].mxu0  ;;  %2298 = vmatmul.mubr.bf16.gmra.mrb[76].mxu1 %v2002_v49  ;;  %v1984_v16 = vmax.f32 %v1942_v2, 0.0 }
 0x528   : >> { %v1948_v29 = vadd.f32 %v1947_v50, %v5153_v51  ;;  %v1985_v48 = vmax.f32 %v1944_v46, 0.0 }
 0x529   : >> { %v1986_v47 = vmax.f32 %v1946_v59, 0.0 }
 0x52a   : >> { %v1987_v60 = vmax.f32 %v1948_v29, 0.0 }
 0x52b   : >> { %v2004_v63 = vpack.c.bf16 %v1986_v47, %v1984_v16 }
 0x52c   : >> { %v2005_v58 = vpack.c.bf16 %v1987_v60, %v1985_v48  ;;  %v1951_v37 = vpop.f32.mrb[60].mxu0 }
 0x52d   : >> { %v1952_v23 = vadd.f32 %v1951_v37, %v5150_v0  ;;  %v1953_v24 = vpop.f32.mrb[61].mxu0 }
 0x52e   : >> { %v1954_v53 = vadd.f32 %v1953_v24, %v5153_v51  ;;  %v1955_v15 = vpop.f32.mrb[62].mxu0  ;;  %2307 = vmatprep.mubr.bf16.mxu1 %v2005_v58 }
 0x52f   : >> { %v1956_v27 = vadd.f32 %v1955_v15, %v5150_v0  ;;  %v1957_v54 = vpop.f32.mrb[63].mxu0  ;;  %2308 = vmatmul.mubr.bf16.gmra.mrb[80].mxu1 %v2004_v63  ;;  %v1988_v21 = vmax.f32 %v1952_v23, 0.0  ;;  %v5194_v0 = vrot.slane %v2043_v28, %v4848_v36 }
 0x530   : >> { %v1958_v44 = vadd.f32 %v1957_v54, %v5153_v51  ;;  %v1989_v25 = vmax.f32 %v1954_v53, 0.0 }
 0x531   : >> { %v1990_v17 = vmax.f32 %v1956_v27, 0.0 }
 0x532   : >> { %v1991_v26 = vmax.f32 %v1958_v44, 0.0 }
 0x533   : >> { %v2006_v31 = vpack.c.bf16 %v1990_v17, %v1988_v21 }
 0x534   : >> { %v2007_v56 = vpack.c.bf16 %v1991_v26, %v1989_v25 }
 0x536   : >> { %2317 = vmatprep.mubr.bf16.mxu1 %v2007_v56 }
 0x537   : >> { %2318 = vmatmul.mubr.bf16.gmra.mrb[84].mxu1 %v2006_v31 }
 0x5d2   : >> { %v2249_v51 = vpop.f32.mrb[64].mxu0 }
 0x5d3   : >> { %v2250_v38 = vadd.f32 %v2249_v51, %v5189_v32  ;;  %v2251_v55 = vpop.f32.mrb[65].mxu0 }
 0x5d4   : >> { %v2252_v34 = vadd.f32 %v2251_v55, %v5194_v0  ;;  %v2253_v22 = vpop.f32.mrb[66].mxu0 }
 0x5d5   : >> { %v2328_v45 = vmax.f32 %v2250_v38, 0.0  ;;  %v2254_v61 = vadd.f32 %v2253_v22, %v5189_v32  ;;  %v2255_v39 = vpop.f32.mrb[67].mxu0 }
 0x5d6   : >> { %v2329_v43 = vmax.f32 %v2252_v34, 0.0  ;;  %v2256_v52 = vadd.f32 %v2255_v39, %v5194_v0 }
 0x5d7   : >> { %v2396_v62 = vadd.f32 %v2364_v33, %v2328_v45  ;;  %v2330_v49 = vmax.f32 %v2254_v61, 0.0 }
 0x5d8   : >> { %v2397_v41 = vadd.f32 %v2365_v35, %v2329_v43  ;;  %v2331_v2 = vmax.f32 %v2256_v52, 0.0 }
 0x5d9   : >> { %2432 = vst [vmem:[%s5204_s25] sm:$0xff] %v2396_v62  ;;  %v2398_v57 = vadd.f32 %v2366_v1, %v2330_v49 }
 0x5da   : >> { %2433 = vst [vmem:[%s5204_s25 + $0x8] sm:$0xff] %v2397_v41  ;;  %v2399_v46 = vadd.f32 %v2367_v40, %v2331_v2  ;;  %v2259_v42 = vpop.f32.mrb[68].mxu0 }
 0x5db   : >> { %2434 = vst [vmem:[%s5204_s25 + $0x10] sm:$0xff] %v2398_v57  ;;  %v2260_v59 = vadd.f32 %v2259_v42, %v5189_v32  ;;  %v2261_v50 = vpop.f32.mrb[69].mxu0 }
 0x5dc   : >> { %2435 = vst [vmem:[%s5204_s25 + $0x18] sm:$0xff] %v2399_v46  ;;  %v2262_v16 = vadd.f32 %v2261_v50, %v5194_v0  ;;  %v2263_v47 = vpop.f32.mrb[70].mxu0 }
 0x5dd   : >> { %v2332_v48 = vmax.f32 %v2260_v59, 0.0  ;;  %v2264_v63 = vadd.f32 %v2263_v47, %v5189_v32  ;;  %v2265_v58 = vpop.f32.mrb[71].mxu0 }
 0x5de   : >> { %v2333_v37 = vmax.f32 %v2262_v16, 0.0  ;;  %v2266_v24 = vadd.f32 %v2265_v58, %v5194_v0 }
 0x5df   : >> { %v2334_v15 = vmax.f32 %v2264_v63, 0.0 }
 0x5e0   : >> { %v2335_v44 = vmax.f32 %v2266_v24, 0.0 }
 0x5e2   : >> { %v2269_v25 = vpop.f32.mrb[64].mxu1 }
 0x5e3   : >> { %v2368_v29 = vld [vmem:[%s4722_s4 + $0x20] sm:$0xff]  ;;  %v2369_v60 = vld [vmem:[%s4722_s4 + $0x28] sm:$0xff]  ;;  %v2370_v23 = vld [vmem:[%s4722_s4 + $0x30] sm:$0xff]  ;;  %v2270_v26 = vadd.f32 %v2269_v25, %v5189_v32  ;;  %v2271_v31 = vpop.f32.mrb[65].mxu1 }
 0x5e4   : >> { %v2400_v53 = vadd.f32 %v2368_v29, %v2332_v48  ;;  %v2371_v27 = vld [vmem:[%s4722_s4 + $0x38] sm:$0xff]  ;;  %v2401_v54 = vadd.f32 %v2369_v60, %v2333_v37  ;;  %v2402_v21 = vadd.f32 %v2370_v23, %v2334_v15  ;;  %v2272_v28 = vadd.f32 %v2271_v31, %v5194_v0  ;;  %v2273_v51 = vpop.f32.mrb[66].mxu1 }
 0x5e5   : >> { %v2403_v17 = vadd.f32 %v2371_v27, %v2335_v44  ;;  %v2336_v38 = vmax.f32 %v2270_v26, 0.0  ;;  %v2274_v33 = vadd.f32 %v2273_v51, %v5189_v32  ;;  %v2275_v34 = vpop.f32.mrb[67].mxu1 }
 0x5e6   : >> { %2436 = vst [vmem:[%s5204_s25 + $0x20] sm:$0xff] %v2400_v53  ;;  %2437 = vst [vmem:[%s5204_s25 + $0x28] sm:$0xff] %v2401_v54  ;;  %v2337_v22 = vmax.f32 %v2272_v28, 0.0  ;;  %v2276_v35 = vadd.f32 %v2275_v34, %v5194_v0 }
 0x5e7   : >> { %2438 = vst [vmem:[%s5204_s25 + $0x30] sm:$0xff] %v2402_v21  ;;  %2439 = vst [vmem:[%s5204_s25 + $0x38] sm:$0xff] %v2403_v17  ;;  %v2338_v39 = vmax.f32 %v2274_v33, 0.0 }
 0x5e8   : >> { %v2339_v52 = vmax.f32 %v2276_v35, 0.0 }
 0x5ea   : >> { %v2279_v40 = vpop.f32.mrb[68].mxu1 }
 0x5eb   : >> { %v2280_v41 = vadd.f32 %v2279_v40, %v5189_v32  ;;  %v2281_v2 = vpop.f32.mrb[69].mxu1 }
 0x5ec   : >> { %v2282_v46 = vadd.f32 %v2281_v2, %v5194_v0  ;;  %v2283_v42 = vpop.f32.mrb[70].mxu1 }
 0x5ed   : >> { %v2340_v59 = vmax.f32 %v2280_v41, 0.0  ;;  %v2284_v29 = vadd.f32 %v2283_v42, %v5189_v32  ;;  %v2285_v16 = vpop.f32.mrb[71].mxu1 }
 0x5ee   : >> { %v2372_v56 = vld [vmem:[%s4722_s4 + $0x40] sm:$0xff]  ;;  %v2373_v55 = vld [vmem:[%s4722_s4 + $0x48] sm:$0xff]  ;;  %v2374_v45 = vld [vmem:[%s4722_s4 + $0x50] sm:$0xff]  ;;  %v2341_v47 = vmax.f32 %v2282_v46, 0.0  ;;  %v2286_v60 = vadd.f32 %v2285_v16, %v5194_v0 }
 0x5ef   : >> { %v2404_v61 = vadd.f32 %v2372_v56, %v2336_v38  ;;  %v2375_v43 = vld [vmem:[%s4722_s4 + $0x58] sm:$0xff]  ;;  %v2405_v1 = vadd.f32 %v2373_v55, %v2337_v22  ;;  %v2406_v62 = vadd.f32 %v2374_v45, %v2338_v39  ;;  %v2342_v58 = vmax.f32 %v2284_v29, 0.0 }
 0x5f0   : >> { %v2407_v49 = vadd.f32 %v2375_v43, %v2339_v52  ;;  %v2343_v24 = vmax.f32 %v2286_v60, 0.0 }
 0x5f1   : >> { %2440 = vst [vmem:[%s5204_s25 + $0x40] sm:$0xff] %v2404_v61  ;;  %2441 = vst [vmem:[%s5204_s25 + $0x48] sm:$0xff] %v2405_v1 }
 0x5f2   : >> { %2442 = vst [vmem:[%s5204_s25 + $0x50] sm:$0xff] %v2406_v62  ;;  %2443 = vst [vmem:[%s5204_s25 + $0x58] sm:$0xff] %v2407_v49  ;;  %v2289_v27 = vpop.f32.mrb[72].mxu1 }
 0x5f3   : >> { %v2290_v54 = vadd.f32 %v2289_v27, %v5189_v32  ;;  %v2291_v44 = vpop.f32.mrb[73].mxu1 }
 0x5f4   : >> { %v2292_v17 = vadd.f32 %v2291_v44, %v5194_v0  ;;  %v2293_v25 = vpop.f32.mrb[74].mxu1 }
 0x5f5   : >> { %v2344_v26 = vmax.f32 %v2290_v54, 0.0  ;;  %v2294_v56 = vadd.f32 %v2293_v25, %v5189_v32  ;;  %v2295_v28 = vpop.f32.mrb[75].mxu1 }
 0x5f6   : >> { %v2345_v51 = vmax.f32 %v2292_v17, 0.0  ;;  %v2296_v55 = vadd.f32 %v2295_v28, %v5194_v0 }
 0x5f7   : >> { %v2346_v34 = vmax.f32 %v2294_v56, 0.0 }
 0x5f8   : >> { %v2347_v35 = vmax.f32 %v2296_v55, 0.0 }
 0x5f9   : >> { %v2376_v57 = vld [vmem:[%s4722_s4 + $0x60] sm:$0xff]  ;;  %v2377_v50 = vld [vmem:[%s4722_s4 + $0x68] sm:$0xff]  ;;  %v2378_v48 = vld [vmem:[%s4722_s4 + $0x70] sm:$0xff] }
 0x5fa   : >> { %v2408_v63 = vadd.f32 %v2376_v57, %v2340_v59  ;;  %v2379_v37 = vld [vmem:[%s4722_s4 + $0x78] sm:$0xff]  ;;  %v2409_v23 = vadd.f32 %v2377_v50, %v2341_v47  ;;  %v2410_v53 = vadd.f32 %v2378_v48, %v2342_v58  ;;  %v2299_v43 = vpop.f32.mrb[76].mxu1 }
 0x5fb   : >> { %v2411_v15 = vadd.f32 %v2379_v37, %v2343_v24  ;;  %v2300_v1 = vadd.f32 %v2299_v43, %v5189_v32  ;;  %v2301_v52 = vpop.f32.mrb[77].mxu1 }
 0x5fc   : >> { %2444 = vst [vmem:[%s5204_s25 + $0x60] sm:$0xff] %v2408_v63  ;;  %2445 = vst [vmem:[%s5204_s25 + $0x68] sm:$0xff] %v2409_v23  ;;  %v2302_v49 = vadd.f32 %v2301_v52, %v5194_v0  ;;  %v2303_v40 = vpop.f32.mrb[78].mxu1 }
 0x5fd   : >> { %2446 = vst [vmem:[%s5204_s25 + $0x70] sm:$0xff] %v2410_v53  ;;  %2447 = vst [vmem:[%s5204_s25 + $0x78] sm:$0xff] %v2411_v15  ;;  %v2348_v41 = vmax.f32 %v2300_v1, 0.0  ;;  %v2304_v57 = vadd.f32 %v2303_v40, %v5189_v32  ;;  %v2305_v46 = vpop.f32.mrb[79].mxu1 }
 0x5fe   : >> { %v2349_v42 = vmax.f32 %v2302_v49, 0.0  ;;  %v2306_v50 = vadd.f32 %v2305_v46, %v5194_v0 }
 0x5ff   : >> { %v2350_v16 = vmax.f32 %v2304_v57, 0.0 }
 0x600   : >> { %v2351_v60 = vmax.f32 %v2306_v50, 0.0 }
 0x602   : >> { %v2309_v37 = vpop.f32.mrb[80].mxu1 }
 0x603   : >> { %v2310_v23 = vadd.f32 %v2309_v37, %v5189_v32  ;;  %v2311_v24 = vpop.f32.mrb[81].mxu1  ;;  %v3796_v37 = vld [vmem:[#allocation18 + $0x30] ss:$8 sps:$4 sm:$0xff] (%p607_p7)  }
 0x604   : >> { %v2380_v21 = vld [vmem:[%s4722_s4 + $0x80] sm:$0xff]  ;;  %v2381_v31 = vld [vmem:[%s4722_s4 + $0x88] sm:$0xff]  ;;  %v2382_v38 = vld [vmem:[%s4722_s4 + $0x90] sm:$0xff]  ;;  %v2312_v15 = vadd.f32 %v2311_v24, %v5194_v0  ;;  %v2313_v27 = vpop.f32.mrb[82].mxu1 }
 0x605   : >> { %v2412_v33 = vadd.f32 %v2380_v21, %v2344_v26  ;;  %v2383_v22 = vld [vmem:[%s4722_s4 + $0x98] sm:$0xff]  ;;  %v2413_v45 = vadd.f32 %v2381_v31, %v2345_v51  ;;  %v2414_v61 = vadd.f32 %v2382_v38, %v2346_v34  ;;  %v2352_v54 = vmax.f32 %v2310_v23, 0.0  ;;  %v2315_v17 = vpop.f32.mrb[83].mxu1 }
 0x606   : >> { %v2415_v39 = vadd.f32 %v2383_v22, %v2347_v35  ;;  %v2314_v21 = vadd.f32 %v2313_v27, %v5189_v32  ;;  %v2353_v25 = vmax.f32 %v2312_v15, 0.0  ;;  %v2316_v31 = vadd.f32 %v2315_v17, %v5194_v0  ;;  %v3811_v23 = vld [vmem:[#allocation18 + $0x80] ss:$8 sps:$4 sm:$0xff] (%p607_p7)   ;;  %v3812_v24 = vld [vmem:[#allocation18 + $0x94] ss:$8 sps:$4 sm:$0xff] (%p607_p7)  }
 0x607   : >> { %2448 = vst [vmem:[%s5204_s25 + $0x80] sm:$0xff] %v2412_v33  ;;  %2449 = vst [vmem:[%s5204_s25 + $0x88] sm:$0xff] %v2413_v45  ;;  %v3815_v15 = vld [vmem:[#allocation18 + $0xa4] ss:$8 sps:$4 sm:$0xff] (%p607_p7)   ;;  %v3817_v27 = vld [vmem:[#allocation18 + $0xa0] ss:$8 sps:$4 sm:$0xff] (%p607_p7)  }
 0x608   : >> { %2450 = vst [vmem:[%s5204_s25 + $0x90] sm:$0xff] %v2414_v61  ;;  %2451 = vst [vmem:[%s5204_s25 + $0x98] sm:$0xff] %v2415_v39  ;;  %v2354_v28 = vmax.f32 %v2314_v21, 0.0  ;;  %v2355_v55 = vmax.f32 %v2316_v31, 0.0  ;;  %v3821_v21 = vld [vmem:[#allocation18 + $0xc4] ss:$8 sps:$4 sm:$0xff] (%p607_p7)  }
 0x609   : > { %v3823_v17 = vld [vmem:[#allocation18 + $0xc0] ss:$8 sps:$4 sm:$0xff] (%p607_p7)   ;;  %v3827_v31 = vld [vmem:[#allocation18 + $0xe4] ss:$8 sps:$4 sm:$0xff] (%p607_p7)  }
 0x60a   : >> { %v2319_v22 = vpop.f32.mrb[84].mxu1 }
 0x60b   : >> { %v2320_v45 = vadd.f32 %v2319_v22, %v5189_v32  ;;  %v2321_v35 = vpop.f32.mrb[85].mxu1 }
 0x60c   : >> { %v2322_v39 = vadd.f32 %v2321_v35, %v5194_v0  ;;  %v2323_v43 = vpop.f32.mrb[86].mxu1 }
 0x60d   : >> { %v2356_v1 = vmax.f32 %v2320_v45, 0.0  ;;  %v2325_v49 = vpop.f32.mrb[87].mxu1 }
 0x60e   : >> { %v2357_v40 = vmax.f32 %v2322_v39, 0.0 }
 0x60f   : >> { %v2384_v62 = vld [vmem:[%s4722_s4 + $0xa0] sm:$0xff]  ;;  %v2385_v2 = vld [vmem:[%s4722_s4 + $0xa8] sm:$0xff]  ;;  %v2386_v59 = vld [vmem:[%s4722_s4 + $0xb0] sm:$0xff] }
 0x610   : >> { %v2416_v29 = vadd.f32 %v2384_v62, %v2348_v41  ;;  %v2387_v47 = vld [vmem:[%s4722_s4 + $0xb8] sm:$0xff]  ;;  %v2417_v48 = vadd.f32 %v2385_v2, %v2349_v42  ;;  %v2418_v63 = vadd.f32 %v2386_v59, %v2350_v16  ;;  %v2324_v62 = vadd.f32 %v2323_v43, %v5189_v32  ;;  %v3785_v32 = vld [vmem:[#allocation18 + $0x4] ss:$8 sps:$4 sm:$0xff] (%p607_p7)  }
 0x611   : >> { %v2419_v58 = vadd.f32 %v2387_v47, %v2351_v60  ;;  %v2326_v2 = vadd.f32 %v2325_v49, %v5194_v0  ;;  %v3787_v47 = vld [vmem:[#allocation18] ss:$8 sps:$4 sm:$0xff] (%p607_p7)   ;;  %2717 = vmatprep.subr.bf16.mxu0 (%p607_p7), %v3785_v32  ;;  %3382 = vmatprep.subr.bf16.mxu1 (%p607_p7), %v3785_v32  ;;  %v3788_v0 = vld [vmem:[#allocation18 + $0x14] ss:$8 sps:$4 sm:$0xff] (%p607_p7)   ;;  %v3791_v60 = vld [vmem:[#allocation18 + $0x24] ss:$8 sps:$4 sm:$0xff] (%p607_p7)  }
 0x612   : >> { %2452 = vst [vmem:[%s5204_s25 + $0xa0] sm:$0xff] %v2416_v29  ;;  %2453 = vst [vmem:[%s5204_s25 + $0xa8] sm:$0xff] %v2417_v48  ;;  %v2358_v46 = vmax.f32 %v2324_v62, 0.0  ;;  %2718 = vmatpush1.bf16.msra.mxu0 (%p607_p7), %v3787_v47  ;;  %3398 = vmatpush1.bf16.msra.mxu1 (%p607_p7), %v3787_v47  ;;  %v3790_v48 = vld [vmem:[#allocation18 + $0x10] ss:$8 sps:$4 sm:$0xff] (%p607_p7)  }
 0x613   : >> { %2454 = vst [vmem:[%s5204_s25 + $0xb0] sm:$0xff] %v2418_v63  ;;  %2455 = vst [vmem:[%s5204_s25 + $0xb8] sm:$0xff] %v2419_v58  ;;  %v2359_v50 = vmax.f32 %v2326_v2, 0.0  ;;  %2719 = vmatprep.subr.bf16.mxu0 (%p607_p7), %v3788_v0  ;;  %3383 = vmatprep.subr.bf16.mxu1 (%p607_p7), %v3788_v0  ;;  %v3793_v63 = vld [vmem:[#allocation18 + $0x20] ss:$8 sps:$4 sm:$0xff] (%p607_p7)  }
 0x614   : > { %v3794_v58 = vld [vmem:[#allocation18 + $0x34] ss:$8 sps:$4 sm:$0xff] (%p607_p7)  }
 0x616   : > { %2720 = vmatpush1.bf16.msra.mxu0 (%p607_p7), %v3790_v48  ;;  %3399 = vmatpush1.bf16.msra.mxu1 (%p607_p7), %v3790_v48 }
 0x617   : > { %2721 = vmatprep.subr.bf16.mxu0 (%p607_p7), %v3791_v60  ;;  %3384 = vmatprep.subr.bf16.mxu1 (%p607_p7), %v3791_v60 }
 0x61a   : >> { %v2388_v53 = vld [vmem:[%s4722_s4 + $0xc0] sm:$0xff]  ;;  %v2389_v44 = vld [vmem:[%s4722_s4 + $0xc8] sm:$0xff]  ;;  %v2390_v26 = vld [vmem:[%s4722_s4 + $0xd0] sm:$0xff]  ;;  %2722 = vmatpush1.bf16.msra.mxu0 (%p607_p7), %v3793_v63  ;;  %3400 = vmatpush1.bf16.msra.mxu1 (%p607_p7), %v3793_v63 }
 0x61b   : >> { %v2420_v56 = vadd.f32 %v2388_v53, %v2352_v54  ;;  %v2391_v51 = vld [vmem:[%s4722_s4 + $0xd8] sm:$0xff]  ;;  %v2421_v38 = vadd.f32 %v2389_v44, %v2353_v25  ;;  %v2422_v33 = vadd.f32 %v2390_v26, %v2354_v28  ;;  %2723 = vmatprep.subr.bf16.mxu0 (%p607_p7), %v3794_v58  ;;  %3385 = vmatprep.subr.bf16.mxu1 (%p607_p7), %v3794_v58  ;;  %v3814_v53 = vld [vmem:[#allocation18 + $0x90] ss:$8 sps:$4 sm:$0xff] (%p607_p7)  }
 0x61c   : >> { %v2423_v34 = vadd.f32 %v2391_v51, %v2355_v55  ;;  %v3818_v54 = vld [vmem:[#allocation18 + $0xb4] ss:$8 sps:$4 sm:$0xff] (%p607_p7)   ;;  %v3820_v44 = vld [vmem:[#allocation18 + $0xb0] ss:$8 sps:$4 sm:$0xff] (%p607_p7)  }
 0x61d   : >> { %2456 = vst [vmem:[%s5204_s25 + $0xc0] sm:$0xff] %v2420_v56  ;;  %2457 = vst [vmem:[%s5204_s25 + $0xc8] sm:$0xff] %v2421_v38  ;;  %v3824_v25 = vld [vmem:[#allocation18 + $0xd4] ss:$8 sps:$4 sm:$0xff] (%p607_p7)   ;;  %v3826_v26 = vld [vmem:[#allocation18 + $0xd0] ss:$8 sps:$4 sm:$0xff] (%p607_p7)  }
 0x61e   : >> { %2458 = vst [vmem:[%s5204_s25 + $0xd0] sm:$0xff] %v2422_v33  ;;  %2459 = vst [vmem:[%s5204_s25 + $0xd8] sm:$0xff] %v2423_v34  ;;  %2724 = vmatpush1.bf16.msra.mxu0 (%p607_p7), %v3796_v37  ;;  %3401 = vmatpush1.bf16.msra.mxu1 (%p607_p7), %v3796_v37  ;;  %v3829_v56 = vld [vmem:[#allocation18 + $0xe0] ss:$8 sps:$4 sm:$0xff] (%p607_p7)   ;;  %v3830_v28 = vld [vmem:[#allocation18 + $0xf4] ss:$8 sps:$4 sm:$0xff] (%p607_p7)  }
 0x61f   : > { %2725 = vmatprep.subr.bf16.mxu0 (%p607_p7), %v3797_v3  ;;  %3386 = vmatprep.subr.bf16.mxu1 (%p607_p7), %v3797_v3  ;;  %v3832_v51 = vld [vmem:[#allocation18 + $0xf0] ss:$8 sps:$4 sm:$0xff] (%p607_p7)  }
 0x622   : > { %2726 = vmatpush1.bf16.msra.mxu0 (%p607_p7), %v3799_v4  ;;  %3402 = vmatpush1.bf16.msra.mxu1 (%p607_p7), %v3799_v4 }
 0x623   : > { %609 = sbr.rel (!%p607_p7) target bundleno = 302 (0x12e), region = 160  ;;  %2727 = vmatprep.subr.bf16.mxu0 (%p607_p7), %v3800_v5  ;;  %3387 = vmatprep.subr.bf16.mxu1 (%p607_p7), %v3800_v5 }
 0x625   : >> { %v2392_v61 = vld [vmem:[%s4722_s4 + $0xe0] sm:$0xff]  ;;  %v2393_v52 = vld [vmem:[%s4722_s4 + $0xe8] sm:$0xff]  ;;  %v2394_v41 = vld [vmem:[%s4722_s4 + $0xf0] sm:$0xff] }
 0x626   : >> { %v2424_v57 = vadd.f32 %v2392_v61, %v2356_v1  ;;  %v2395_v42 = vld [vmem:[%s4722_s4 + $0xf8] sm:$0xff]  ;;  %v2425_v59 = vadd.f32 %v2393_v52, %v2357_v40  ;;  %v2426_v29 = vadd.f32 %v2394_v41, %v2358_v46  ;;  %2728 = vmatpush1.bf16.msra.mxu0 (%p607_p7), %v3802_v6  ;;  %3403 = vmatpush1.bf16.msra.mxu1 (%p607_p7), %v3802_v6 }
 0x627   : >> { %v2427_v16 = vadd.f32 %v2395_v42, %v2359_v50  ;;  %2729 = vmatprep.subr.bf16.mxu0 (%p607_p7), %v3803_v7  ;;  %3388 = vmatprep.subr.bf16.mxu1 (%p607_p7), %v3803_v7 }
 0x628   : >> { %2460 = vst [vmem:[%s5204_s25 + $0xe0] sm:$0xff] %v2424_v57  ;;  %2461 = vst [vmem:[%s5204_s25 + $0xe8] sm:$0xff] %v2425_v59 }
 0x629   : >> { %2462 = vst [vmem:[%s5204_s25 + $0xf0] sm:$0xff] %v2426_v29  ;;  %2463 = vst [vmem:[%s5204_s25 + $0xf8] sm:$0xff] %v2427_v16 }
 0x62a   : > { %2730 = vmatpush1.bf16.msra.mxu0 %v3805_v13  ;;  %3404 = vmatpush1.bf16.msra.mxu1 %v3805_v13  ;;  %v2545_v13 = vld [vmem:[%s5502_s27] sm:$0x3] }
 0x62b   : > { %2731 = vmatprep.subr.bf16.mxu0 %v3806_v18  ;;  %3389 = vmatprep.subr.bf16.mxu1 %v3806_v18  ;;  %v5304_v18 = vrot.slane %v2545_v13, %v4848_v36 }
 0x62e   : > { %2732 = vmatpush1.bf16.msra.mxu0 %v3808_v19  ;;  %3405 = vmatpush1.bf16.msra.mxu1 %v3808_v19 }
 0x62f   : > { %2733 = vmatprep.subr.bf16.mxu0 %v3809_v20  ;;  %3390 = vmatprep.subr.bf16.mxu1 %v3809_v20 }
 0x630   : > { %v2466_v8 = vld [vmem:[#allocation2 + $0x108] sm:$0xff]  ;;  %v2468_v9 = vld [vmem:[#allocation2 + $0x118] sm:$0xff]  ;;  %v2465_v38 = vld [vmem:[#allocation2 + $0x100] sm:$0xff] }
 0x631   : > { %v2498_v10 = vpack.c.bf16 %v2468_v9, %v2466_v8  ;;  %v2482_v11 = vld [vmem:[#allocation2 + $0x188] sm:$0xff]  ;;  %v2484_v12 = vld [vmem:[#allocation2 + $0x198] sm:$0xff]  ;;  %v2467_v55 = vld [vmem:[#allocation2 + $0x110] sm:$0xff] }
 0x632   : > { %v2506_v14 = vpack.c.bf16 %v2484_v12, %v2482_v11  ;;  %2734 = vmatpush1.bf16.msra.mxu0 %v3811_v23  ;;  %3406 = vmatpush1.bf16.msra.mxu1 %v3811_v23  ;;  %v2481_v33 = vld [vmem:[#allocation2 + $0x180] sm:$0xff]  ;;  %v2483_v34 = vld [vmem:[#allocation2 + $0x190] sm:$0xff]  ;;  %v2470_v22 = vld [vmem:[#allocation2 + $0x128] sm:$0xff]  ;;  %v2497_v39 = vpack.c.bf16 %v2467_v55, %v2465_v38 }
 0x633   : > { %2749 = vmatprep.mubr.bf16.mxu0 %v2498_v10  ;;  %2735 = vmatprep.subr.bf16.mxu0 %v3812_v24  ;;  %v2472_v45 = vld [vmem:[#allocation2 + $0x138] sm:$0xff]  ;;  %v2486_v35 = vld [vmem:[#allocation2 + $0x1a8] sm:$0xff]  ;;  %v2505_v43 = vpack.c.bf16 %v2483_v34, %v2481_v33  ;;  %v2469_v62 = vld [vmem:[#allocation2 + $0x120] sm:$0xff] }
 0x634   : > { %2789 = vmatprep.mubr.bf16.mxu1 %v2506_v14  ;;  %3391 = vmatprep.subr.bf16.mxu1 %v3812_v24  ;;  %v2488_v61 = vld [vmem:[#allocation2 + $0x1b8] sm:$0xff]  ;;  %v2500_v1 = vpack.c.bf16 %v2472_v45, %v2470_v22  ;;  %v2471_v49 = vld [vmem:[#allocation2 + $0x130] sm:$0xff]  ;;  %v2485_v40 = vld [vmem:[#allocation2 + $0x1a0] sm:$0xff]  ;;  %v5301_v14 = vrot.slane %v2545_v13, %v4844_v30 }
 0x635   : > { %v2508_v52 = vpack.c.bf16 %v2488_v61, %v2486_v35  ;;  %v2487_v41 = vld [vmem:[#allocation2 + $0x1b0] sm:$0xff]  ;;  %v2474_v2 = vld [vmem:[#allocation2 + $0x148] sm:$0xff]  ;;  %v2476_v57 = vld [vmem:[#allocation2 + $0x158] sm:$0xff]  ;;  %v2499_v59 = vpack.c.bf16 %v2471_v49, %v2469_v62 }
 0x636   : > { %2736 = vmatpush1.bf16.msra.mxu0 %v3814_v53  ;;  %3407 = vmatpush1.bf16.msra.mxu1 %v3814_v53  ;;  %v2490_v46 = vld [vmem:[#allocation2 + $0x1c8] sm:$0xff]  ;;  %v2492_v42 = vld [vmem:[#allocation2 + $0x1d8] sm:$0xff]  ;;  %v2507_v50 = vpack.c.bf16 %v2487_v41, %v2485_v40  ;;  %v2502_v29 = vpack.c.bf16 %v2476_v57, %v2474_v2  ;;  %v2473_v32 = vld [vmem:[#allocation2 + $0x140] sm:$0xff] }
 0x637   : > { %2737 = vmatprep.subr.bf16.mxu0 %v3815_v15  ;;  %3392 = vmatprep.subr.bf16.mxu1 %v3815_v15  ;;  %v2510_v16 = vpack.c.bf16 %v2492_v42, %v2490_v46  ;;  %v2475_v47 = vld [vmem:[#allocation2 + $0x150] sm:$0xff]  ;;  %v2489_v0 = vld [vmem:[#allocation2 + $0x1c0] sm:$0xff]  ;;  %v2478_v60 = vld [vmem:[#allocation2 + $0x168] sm:$0xff] }
 0x638   : > { %v2491_v48 = vld [vmem:[#allocation2 + $0x1d0] sm:$0xff]  ;;  %v2480_v63 = vld [vmem:[#allocation2 + $0x178] sm:$0xff]  ;;  %v2494_v58 = vld [vmem:[#allocation2 + $0x1e8] sm:$0xff]  ;;  %v2501_v3 = vpack.c.bf16 %v2475_v47, %v2473_v32 }
 0x639   : > { %v2496_v37 = vld [vmem:[#allocation2 + $0x1f8] sm:$0xff]  ;;  %v2509_v4 = vpack.c.bf16 %v2491_v48, %v2489_v0  ;;  %v2504_v5 = vpack.c.bf16 %v2480_v63, %v2478_v60  ;;  %v2477_v7 = vld [vmem:[#allocation2 + $0x160] sm:$0xff]  ;;  %v2479_v8 = vld [vmem:[#allocation2 + $0x170] sm:$0xff] }
 0x63a   : > { %2738 = vmatpush1.bf16.msra.mxu0 %v3817_v27  ;;  %3408 = vmatpush1.bf16.msra.mxu1 %v3817_v27  ;;  %v2512_v6 = vpack.c.bf16 %v2496_v37, %v2494_v58  ;;  %v2493_v9 = vld [vmem:[#allocation2 + $0x1e0] sm:$0xff]  ;;  %v2495_v10 = vld [vmem:[#allocation2 + $0x1f0] sm:$0xff]  ;;  %v2503_v11 = vpack.c.bf16 %v2479_v8, %v2477_v7 }
 0x63b   : > { %2739 = vmatprep.subr.bf16.mxu0 %v3818_v54  ;;  %3393 = vmatprep.subr.bf16.mxu1 %v3818_v54  ;;  %v2511_v12 = vpack.c.bf16 %v2495_v10, %v2493_v9 }
 0x63e   : > { %2740 = vmatpush1.bf16.msra.mxu0 %v3820_v44  ;;  %3409 = vmatpush1.bf16.msra.mxu1 %v3820_v44 }
 0x63f   : > { %2741 = vmatprep.subr.bf16.mxu0 %v3821_v21  ;;  %3394 = vmatprep.subr.bf16.mxu1 %v3821_v21 }
 0x642   : > { %2742 = vmatpush1.bf16.msra.mxu0 %v3823_v17  ;;  %3410 = vmatpush1.bf16.msra.mxu1 %v3823_v17 }
 0x643   : > { %2743 = vmatprep.subr.bf16.mxu0 %v3824_v25  ;;  %3395 = vmatprep.subr.bf16.mxu1 %v3824_v25 }
 0x646   : > { %2744 = vmatpush1.bf16.msra.mxu0 %v3826_v26  ;;  %3411 = vmatpush1.bf16.msra.mxu1 %v3826_v26 }
 0x647   : > { %2745 = vmatprep.subr.bf16.mxu0 %v3827_v31  ;;  %3396 = vmatprep.subr.bf16.mxu1 %v3827_v31 }
 0x64a   : > { %2746 = vmatpush1.bf16.msra.mxu0 %v3829_v56  ;;  %3412 = vmatpush1.bf16.msra.mxu1 %v3829_v56 }
 0x64b   : > { %2747 = vmatprep.subr.bf16.mxu0 %v3830_v28  ;;  %3397 = vmatprep.subr.bf16.mxu1 %v3830_v28 }
 0x64e   : > { %2748 = vmatpush1.bf16.msra.mxu0 %v3832_v51  ;;  %3413 = vmatpush1.bf16.msra.mxu1 %v3832_v51 }
 0x651   : > { %2750 = vmatmul.mubr.bf16.vlgmr.msra.gmra.mrb[0].mxu0 %v2497_v39  ;;  %2790 = vmatmul.mubr.bf16.vlgmr.msra.gmra.mrb[0].mxu1 %v2505_v43 }
 0x652   : > { %2759 = vmatprep.mubr.bf16.mxu0 %v2500_v1  ;;  %2799 = vmatprep.mubr.bf16.mxu1 %v2508_v52 }
 0x659   : > { %2760 = vmatmul.mubr.bf16.gmra.mrb[4].mxu0 %v2499_v59  ;;  %2800 = vmatmul.mubr.bf16.gmra.mrb[4].mxu1 %v2507_v50 }
 0x65a   : > { %2769 = vmatprep.mubr.bf16.mxu0 %v2502_v29  ;;  %2809 = vmatprep.mubr.bf16.mxu1 %v2510_v16 }
 0x661   : > { %2770 = vmatmul.mubr.bf16.gmra.mrb[8].mxu0 %v2501_v3  ;;  %2810 = vmatmul.mubr.bf16.gmra.mrb[8].mxu1 %v2509_v4 }
 0x662   : > { %2779 = vmatprep.mubr.bf16.mxu0 %v2504_v5  ;;  %2819 = vmatprep.mubr.bf16.mxu1 %v2512_v6 }
 0x669   : > { %2780 = vmatmul.mubr.bf16.gmra.mrb[12].mxu0 %v2503_v11  ;;  %2820 = vmatmul.mubr.bf16.gmra.mrb[12].mxu1 %v2511_v12 }
 0x724   : > { %v2751_v19 = vpop.f32.mrb[0].mxu0  ;;  %v2791_v20 = vpop.f32.mrb[0].mxu1 }
 0x725   : > { %v2752_v23 = vadd.f32 %v2751_v19, %v5301_v14  ;;  %v2792_v24 = vadd.f32 %v2791_v20, %v5301_v14  ;;  %v2753_v53 = vpop.f32.mrb[1].mxu0  ;;  %v2793_v15 = vpop.f32.mrb[1].mxu1 }
 0x726   : > { %v2754_v27 = vadd.f32 %v2753_v53, %v5304_v18  ;;  %v2794_v30 = vadd.f32 %v2793_v15, %v5304_v18  ;;  %v2755_v36 = vpop.f32.mrb[2].mxu0  ;;  %v2795_v54 = vpop.f32.mrb[2].mxu1 }
 0x727   : > { %2830 = vst [vmem:[%s4693_s22] sm:$0xff] %v2752_v23  ;;  %2846 = vst [vmem:[%s4693_s22 + $0x80] sm:$0xff] %v2792_v24  ;;  %v2756_v44 = vadd.f32 %v2755_v36, %v5301_v14  ;;  %v2796_v21 = vadd.f32 %v2795_v54, %v5301_v14  ;;  %v2757_v17 = vpop.f32.mrb[3].mxu0  ;;  %v2797_v25 = vpop.f32.mrb[3].mxu1 }
 0x728   : > { %2831 = vst [vmem:[%s4693_s22 + $0x8] sm:$0xff] %v2754_v27  ;;  %2847 = vst [vmem:[%s4693_s22 + $0x88] sm:$0xff] %v2794_v30  ;;  %v2758_v26 = vadd.f32 %v2757_v17, %v5304_v18  ;;  %v2798_v31 = vadd.f32 %v2797_v25, %v5304_v18 }
 0x729   : > { %2832 = vst [vmem:[%s4693_s22 + $0x10] sm:$0xff] %v2756_v44  ;;  %2848 = vst [vmem:[%s4693_s22 + $0x90] sm:$0xff] %v2796_v21 }
 0x72a   : > { %2833 = vst [vmem:[%s4693_s22 + $0x18] sm:$0xff] %v2758_v26  ;;  %2849 = vst [vmem:[%s4693_s22 + $0x98] sm:$0xff] %v2798_v31 }
 0x72c   : > { %v2761_v56 = vpop.f32.mrb[4].mxu0  ;;  %v2801_v28 = vpop.f32.mrb[4].mxu1 }
 0x72d   : > { %v2762_v51 = vadd.f32 %v2761_v56, %v5301_v14  ;;  %v2802_v38 = vadd.f32 %v2801_v28, %v5301_v14  ;;  %v2763_v55 = vpop.f32.mrb[5].mxu0  ;;  %v2803_v33 = vpop.f32.mrb[5].mxu1 }
 0x72e   : > { %v2764_v34 = vadd.f32 %v2763_v55, %v5304_v18  ;;  %v2804_v22 = vadd.f32 %v2803_v33, %v5304_v18  ;;  %v2765_v45 = vpop.f32.mrb[6].mxu0  ;;  %v2805_v35 = vpop.f32.mrb[6].mxu1 }
 0x72f   : > { %2834 = vst [vmem:[%s4693_s22 + $0x20] sm:$0xff] %v2762_v51  ;;  %2850 = vst [vmem:[%s4693_s22 + $0xa0] sm:$0xff] %v2802_v38  ;;  %v2766_v61 = vadd.f32 %v2765_v45, %v5301_v14  ;;  %v2806_v39 = vadd.f32 %v2805_v35, %v5301_v14  ;;  %v2767_v43 = vpop.f32.mrb[7].mxu0  ;;  %v2807_v1 = vpop.f32.mrb[7].mxu1 }
 0x730   : > { %2835 = vst [vmem:[%s4693_s22 + $0x28] sm:$0xff] %v2764_v34  ;;  %2851 = vst [vmem:[%s4693_s22 + $0xa8] sm:$0xff] %v2804_v22  ;;  %v2768_v52 = vadd.f32 %v2767_v43, %v5304_v18  ;;  %v2808_v62 = vadd.f32 %v2807_v1, %v5304_v18 }
 0x731   : > { %2836 = vst [vmem:[%s4693_s22 + $0x30] sm:$0xff] %v2766_v61  ;;  %2852 = vst [vmem:[%s4693_s22 + $0xb0] sm:$0xff] %v2806_v39 }
 0x732   : > { %2837 = vst [vmem:[%s4693_s22 + $0x38] sm:$0xff] %v2768_v52  ;;  %2853 = vst [vmem:[%s4693_s22 + $0xb8] sm:$0xff] %v2808_v62 }
 0x734   : > { %v2771_v49 = vpop.f32.mrb[8].mxu0  ;;  %v2811_v40 = vpop.f32.mrb[8].mxu1 }
 0x735   : > { %v2772_v41 = vadd.f32 %v2771_v49, %v5301_v14  ;;  %v2812_v2 = vadd.f32 %v2811_v40, %v5301_v14  ;;  %v2773_v57 = vpop.f32.mrb[9].mxu0  ;;  %v2813_v46 = vpop.f32.mrb[9].mxu1 }
 0x736   : > { %v2774_v42 = vadd.f32 %v2773_v57, %v5304_v18  ;;  %v2814_v59 = vadd.f32 %v2813_v46, %v5304_v18  ;;  %v2775_v50 = vpop.f32.mrb[10].mxu0  ;;  %v2815_v29 = vpop.f32.mrb[10].mxu1 }
 0x737   : > { %2838 = vst [vmem:[%s4693_s22 + $0x40] sm:$0xff] %v2772_v41  ;;  %2854 = vst [vmem:[%s4693_s22 + $0xc0] sm:$0xff] %v2812_v2  ;;  %v2776_v16 = vadd.f32 %v2775_v50, %v5301_v14  ;;  %v2816_v32 = vadd.f32 %v2815_v29, %v5301_v14  ;;  %v2777_v47 = vpop.f32.mrb[11].mxu0  ;;  %v2817_v0 = vpop.f32.mrb[11].mxu1 }
 0x738   : > { %2839 = vst [vmem:[%s4693_s22 + $0x48] sm:$0xff] %v2774_v42  ;;  %2855 = vst [vmem:[%s4693_s22 + $0xc8] sm:$0xff] %v2814_v59  ;;  %v2778_v48 = vadd.f32 %v2777_v47, %v5304_v18  ;;  %v2818_v60 = vadd.f32 %v2817_v0, %v5304_v18 }
 0x739   : > { %2840 = vst [vmem:[%s4693_s22 + $0x50] sm:$0xff] %v2776_v16  ;;  %2856 = vst [vmem:[%s4693_s22 + $0xd0] sm:$0xff] %v2816_v32 }
 0x73a   : > { %2841 = vst [vmem:[%s4693_s22 + $0x58] sm:$0xff] %v2778_v48  ;;  %2857 = vst [vmem:[%s4693_s22 + $0xd8] sm:$0xff] %v2818_v60 }
 0x73c   : > { %v2781_v63 = vpop.f32.mrb[12].mxu0  ;;  %v2821_v58 = vpop.f32.mrb[12].mxu1 }
 0x73d   : > { %v2782_v37 = vadd.f32 %v2781_v63, %v5301_v14  ;;  %v2822_v3 = vadd.f32 %v2821_v58, %v5301_v14  ;;  %v2783_v4 = vpop.f32.mrb[13].mxu0  ;;  %v2823_v5 = vpop.f32.mrb[13].mxu1 }
 0x73e   : > { %v2784_v6 = vadd.f32 %v2783_v4, %v5304_v18  ;;  %v2824_v7 = vadd.f32 %v2823_v5, %v5304_v18  ;;  %v2785_v8 = vpop.f32.mrb[14].mxu0  ;;  %v2825_v9 = vpop.f32.mrb[14].mxu1 }
 0x73f   : > { %2842 = vst [vmem:[%s4693_s22 + $0x60] sm:$0xff] %v2782_v37  ;;  %2858 = vst [vmem:[%s4693_s22 + $0xe0] sm:$0xff] %v2822_v3  ;;  %v2786_v10 = vadd.f32 %v2785_v8, %v5301_v14  ;;  %v2826_v11 = vadd.f32 %v2825_v9, %v5301_v14  ;;  %v2787_v12 = vpop.f32.mrb[15].mxu0  ;;  %v2827_v13 = vpop.f32.mrb[15].mxu1 }
 0x740   : > { %2843 = vst [vmem:[%s4693_s22 + $0x68] sm:$0xff] %v2784_v6  ;;  %2859 = vst [vmem:[%s4693_s22 + $0xe8] sm:$0xff] %v2824_v7  ;;  %v2788_v19 = vadd.f32 %v2787_v12, %v5304_v18  ;;  %v2828_v20 = vadd.f32 %v2827_v13, %v5304_v18 }
 0x741   : > { %2844 = vst [vmem:[%s4693_s22 + $0x70] sm:$0xff] %v2786_v10  ;;  %2860 = vst [vmem:[%s4693_s22 + $0xf0] sm:$0xff] %v2826_v11 }
 0x742   : > { %2845 = vst [vmem:[%s4693_s22 + $0x78] sm:$0xff] %v2788_v19  ;;  %2861 = vst [vmem:[%s4693_s22 + $0xf8] sm:$0xff] %v2828_v20 }
 0x743   : > { %4074 = shalt.err (!%p4071_p10)
}
 0x744   : > { %s4075_s22 = scalar_lea.hbm %s5367_s26, 4096  ;;  %s4079_s20 = scalar_lea.hbm %s5503_s29, 8192 }
 0x745   : > { %p4076_p1 = scmp.ne.s32.totalorder %s5367_s26, %s4075_s22  ;;  %p4080_p6 = scmp.lt.u32.totalorder %s5367_s26, %s5503_s29 }
 0x746   : > { %p4081_p13 = scmp.lt.u32.totalorder %s4079_s20, %s4075_s22  ;;  %p4083_p9 = scmp.lt.u32.totalorder %s4075_s22, %s5367_s26 }
 0x747   : > { %p4077_p11 = pnand %p4076_p1, %p5504_p0 }
 0x748   : > { %p4082_p7 = por %p4081_p13, %p4080_p6 }
 0x749   : > { %p4078_p12 = pneg %p4077_p11 }
 0x74a   : > { %p4084_p2 = por %p4083_p9, %p4082_p7 }
 0x74c   : > { %p4085_p5 = pnand %p4084_p2, %p4078_p12 }
 0x74e   : > { %4088 = shalt.err (!%p4085_p5)
}
 0x74f   : > { %s4175_s17 = smov 256   ;;  %s4176_s27 = smov 16  }
 0x750   : > { %3442 = dma.vmem_to_hbm [thread:$0]  (%p5504_p0), %s5369_s0, 4096, %s5367_s26, %s2863_s7, %s4175_s17, %s4175_s17, %s4176_s27  }
 0x751 PF: > { %s2891_s24 = sand.u32 1, %s4139_s13   ;;  %p5505_p8 = scmp.ne.s32.totalorder %s5469_s21, 0 }
 0x752   : > { %p5506_p4 = scmp.ge.s32.totalorder %s4151_s16, 2  ;;  %s2892_s19 = scalar_lea.sflag [#allocation8], %s2891_s24 }
 0x754   : > { %p3471_p3 = pnand %p5506_p4, %p5505_p8 }
 0x756   : > { %4134 = dma.done.wait (!%p3471_p3), %s2892_s19, 4096  }
 0x757   : > { %4136 = vsyncadd (!%p3471_p3), %s2892_s19, 4294963200  ;;  %p29_p10 = scmp.ge.s32.totalorder %s4422_s11, 4   ;;  %s5507_s13 = smov %s4143_s14 }
 0x758   : > { %s5508_s14 = smov %s4147_s15  ;;  %s5509_s15 = smov %s4433_s9 }
 0x759   : > { %s5510_s16 = smov %s4422_s11  ;;  %31 = sbr.rel (!%p29_p10) target bundleno = 19 (0x13), region = 171 }
 0x760   :  { %2897 = vsyncpa [#allocation7], 1 }
 0x761   :  { %2899 = vsyncpa [#allocation7 + $0x1], 1 }
 0x762   :  { %2900 = vsyncpa [#allocation10], 1 }
 0x763   :  { %2902 = vsyncpa [#allocation10 + $0x1], 1 }
 0x764   :  { %2903 = vsyncpa [#allocation13], 1 }
 0x765   :  { %2904 = vsyncpa [#allocation16], 1 }
 0x766   :  { %2905 = vsyncpa [#allocation19], 1 }
 0x767   :  { %2906 = vsyncpa [#allocation8], 1 }
 0x768   :  { %2908 = vsyncpa [#allocation8 + $0x1], 1 }

</bundles_post_ra>
